<compile_context>
chip_gen: v7x
topology: tpu7x:2x2x1
jax: 0.10.0
libtpu: 0.0.40
codegen_flags: <defaults>
</compile_context>

<pallas_src>
import math

import jax
import jax.numpy as jnp
from jax.experimental import pallas as pl
from jax.experimental.pallas import tpu as pltpu


# Matmul operands are cast to this dtype (the MXU is bf16-native on v5e/v6e/v7x);
# accumulation is always f32.  Set to jnp.float32 for exact-f32 operand math.
COMPUTE_DTYPE = jnp.bfloat16


def _gelu(x):
    # tanh-approx GELU (== torch nn.GELU(approximate='tanh')); lowers to the EUP.
    # TODO(synk): torch nn.GELU() default is the exact erf form; switch to
    # 0.5*x*(1+lax.erf(x/sqrt(2))) if exact parity is required and erf lowers on
    # the target Mosaic build (|delta| <= ~1e-3 in activation value).
    c = 0.7978845608028654  # sqrt(2/pi)
    return 0.5 * x * (1.0 + jnp.tanh(c * (x + 0.044715 * x * x * x)))


# ----------------------------------------------------------------------------
# The fused whole-network kernel (one batch element per grid step).
# Conv metadata tuples are static Python ints: (woff, K, cin, cout, boff).
# Weights live in the packed f32 matrix rows [woff, woff + K*cin), cols [0, cout).
# ----------------------------------------------------------------------------
def _make_unet_kernel(*, L0, in_ch, depth, enc_meta, dec_meta, out_meta,
                      compute_dtype):
    cdt = compute_dtype

    def kernel(x_ref, wp_ref, bp_ref, out_ref, hf_ref, scr):
        # ---- packed-parameter accessors (all-static slices, single DMA'd arrays)
        def w_tap(meta, k):
            woff, _, cin, cout, _ = meta
            return wp_ref[woff + k * cin: woff + (k + 1) * cin, :cout].astype(cdt)

        def bias(meta):
            _, _, _, cout, boff = meta
            return bp_ref[boff:boff + 1, :cout]                    # (1, cout) f32

        # ---- scratch staging helpers -------------------------------------
        # Layout convention: a conv's input occupies scratch rows [1, 1+R) and
        # channels [0, cin); rows 0 and 1+R are zero guard rows that realise the
        # 'same' zero padding.
        def zero_guards(R, cin):
            z = jnp.zeros((1, cin), jnp.float32)
            scr[0:1, :cin] = z
            scr[1 + R:2 + R, :cin] = z

        def stage(val, R, c0=0):
            scr[1:1 + R, c0:c0 + val.shape[-1]] = val.astype(jnp.float32)

        def conv(meta, R, gelu):
            """'same' Conv1d: each tap is a shifted contiguous VMEM window ->
            one bf16 MXU matmul per tap, f32 accumulation."""
            _, K, cin, _, _ = meta
            pad = K // 2
            acc = None
            for k in range(K):                                # static unroll
                d = k - pad
                xk = scr[1 + d:1 + d + R, :cin].astype(cdt)
                t = jnp.dot(xk, w_tap(meta, k),
                            preferred_element_type=jnp.float32)
                acc = t if acc is None else acc + t
            acc = acc + bias(meta)
            return _gelu(acc) if gelu else acc

        def maxpool2(R, c):
            """MaxPool1d(2,2): stride-2 even/odd row loads, elementwise max."""
            ev = scr[pl.ds(1, R // 2, 2), :c]                 # h[0], h[2], ...
            od = scr[pl.ds(2, R // 2, 2), :c]                 # h[1], h[3], ...
            return jnp.maximum(ev, od)

        def deconv2x_to_scr(meta, h, R):
            """ConvTranspose1d(2,2): two tap matmuls; results (+bias) are
            interleaved straight into the next conv's staging rows with
            stride-2 stores (the upsampled tensor never exists as a value)."""
            hb = h.astype(cdt)
            _, _, _, cout, _ = meta
            b = bias(meta)
            y0 = jnp.dot(hb, w_tap(meta, 0),
                         preferred_element_type=jnp.float32) + b
            y1 = jnp.dot(hb, w_tap(meta, 1),
                         preferred_element_type=jnp.float32) + b
            scr[pl.ds(1, R, 2), :cout] = y0                   # rows 1,3,... -> out[2t]
            scr[pl.ds(2, R, 2), :cout] = y1                   # rows 2,4,... -> out[2t+1]

        # ---------------- encoder ----------------
        R = L0
        zero_guards(R, in_ch)
        stage(x_ref[...].astype(jnp.float32), R)

        skips = []
        h = None
        for lvl in range(depth):
            m1, m2 = enc_meta[lvl]
            h = conv(m1, R, gelu=True)
            zero_guards(R, m2[2])
            stage(h, R)
            h = conv(m2, R, gelu=True)
            skips.append(h)                                   # stays in vregs/VMEM
            stage(h, R)                                       # pool reads rows [1,1+R)
            h = maxpool2(R, m2[3])
            R //= 2
            if lvl + 1 < depth:
                nxt = enc_meta[lvl + 1][0]
                zero_guards(R, nxt[2])
                stage(h, R)
            # else: h is the bottleneck value, consumed by the first deconv

        # ---------------- decoder ----------------
        for lvl in range(depth):
            md, m1, m2 = dec_meta[lvl]
            skip = skips[depth - 1 - lvl]
            zero_guards(2 * R, m1[2])                         # guards for cat(up, skip)
            deconv2x_to_scr(md, h, R)                         # channels [0, cup)
            R *= 2
            stage(skip, R, c0=md[3])                          # channels [cup, cup+cskip)
            h = conv(m1, R, gelu=True)                        # concat never materialised
            zero_guards(R, m2[2])
            stage(h, R)
            h = conv(m2, R, gelu=True)

        hf_ref[...] = h.astype(hf_ref.dtype)

        # ---------------- 1x1 output head (plain matmul on the value) -------
        out = jnp.dot(h.astype(cdt), w_tap(out_meta, 0),
                      preferred_element_type=jnp.float32) + bias(out_meta)
        out_ref[...] = out.astype(out_ref.dtype)

    return kernel


# ----------------------------------------------------------------------------
# Parameter construction (deterministic, synthetic).
# Conv weights stored tap-major: (K, Cin, Cout); biases (1, Cout).
# ----------------------------------------------------------------------------
def init_unet_params(key, in_ch=3, base_width=8, depth=4, ksize=3):
    keys = iter(jax.random.split(key, 256))

    def conv_p(cin, cout, k):
        wk = jax.random.normal(next(keys), (k, cin, cout), jnp.float32)
        wk = wk / math.sqrt(k * cin)
        bk = 0.01 * jax.random.normal(next(keys), (1, cout), jnp.float32)
        return (wk, bk)

    params = {"downs": [], "ups": [], "out": None}
    ch, w = in_ch, base_width
    for _ in range(depth):
        params["downs"].append((conv_p(ch, w, ksize), conv_p(w, w, ksize)))
        ch = w
        w *= 2
    for _ in range(depth):
        w //= 2
        params["ups"].append(
            (conv_p(ch, w, 2), conv_p(w * 2, w, ksize), conv_p(w, w, ksize)))
        ch = w
    params["out"] = conv_p(ch, 3, 1)
    return params


# ----------------------------------------------------------------------------
# Pack every conv weight/bias into two flat f32 arrays (single DMA each) plus
# static slice metadata: meta = (woff, K, cin, cout, boff).
# ----------------------------------------------------------------------------
def _pack_params(params):
    convs = []
    for (w1, b1), (w2, b2) in params["downs"]:
        convs += [(w1, b1), (w2, b2)]
    for (wd, bd), (w1, b1), (w2, b2) in params["ups"]:
        convs += [(wd, bd), (w1, b1), (w2, b2)]
    convs.append(params["out"])

    cmax = max(int(w.shape[-1]) for w, _ in convs)
    metas, wrows, brows = [], [], []
    woff = 0
    for i, (w, b) in enumerate(convs):
        K, cin, cout = (int(s) for s in w.shape)
        wf = jnp.pad(w.reshape(K * cin, cout).astype(jnp.float32),
                     ((0, 0), (0, cmax - cout)))
        wrows.append(wf)
        brows.append(jnp.pad(b.reshape(1, cout).astype(jnp.float32),
                             ((0, 0), (0, cmax - cout))))
        metas.append((woff, K, cin, cout, i))
        woff += K * cin
    wpack = jnp.concatenate(wrows, axis=0)
    pad = (-wpack.shape[0]) % 8
    if pad:
        wpack = jnp.pad(wpack, ((0, pad), (0, 0)))
    bpack = jnp.concatenate(brows, axis=0)
    return wpack, bpack, metas, cmax


# ----------------------------------------------------------------------------
# Wrapper.  Matches the torch module: input/outputs in NCL layout, returns
# (out, h_feat).
# ----------------------------------------------------------------------------
def unet1d_forward(params, x_ncl):
    B, in_ch, L0 = x_ncl.shape
    depth = len(params["downs"])
    ksize = int(params["downs"][0][0][0].shape[0])
    assert ksize % 2 == 1, "only odd ksize has torch-'same' padding semantics"
    assert L0 % (2 ** depth) == 0, "L must be divisible by 2**depth"

    wpack, bpack, metas, cmax = _pack_params(params)
    enc_meta = [tuple(metas[2 * l: 2 * l + 2]) for l in range(depth)]
    base = 2 * depth
    dec_meta = [tuple(metas[base + 3 * l: base + 3 * l + 3]) for l in range(depth)]
    out_meta = metas[-1]

    out_ch = out_meta[3]
    feat_ch = dec_meta[-1][2][3]

    cin_max = max(m[2] for m in metas)            # widest conv input (concat conv)
    scr_cols = max(cin_max, cmax)
    scr_rows = L0 + 8                             # +2 guard rows, rounded up to 8

    x = jnp.transpose(x_ncl, (0, 2, 1))           # NCL -> NLC, once

    kernel = _make_unet_kernel(L0=L0, in_ch=in_ch, depth=depth,
                               enc_meta=enc_meta, dec_meta=dec_meta,
                               out_meta=out_meta, compute_dtype=COMPUTE_DTYPE)

    out, h_feat = pl.pallas_call(
        kernel,
        grid=(B,),
        in_specs=[pl.BlockSpec((None, L0, in_ch), lambda i: (i, 0, 0)),
                  pl.BlockSpec(wpack.shape, lambda i: (0, 0)),   # resident, 1 DMA
                  pl.BlockSpec(bpack.shape, lambda i: (0, 0))],  # resident, 1 DMA
        out_specs=(pl.BlockSpec((None, L0, out_ch), lambda i: (i, 0, 0)),
                   pl.BlockSpec((None, L0, feat_ch), lambda i: (i, 0, 0))),
        out_shape=(jax.ShapeDtypeStruct((B, L0, out_ch), x.dtype),
                   jax.ShapeDtypeStruct((B, L0, feat_ch), x.dtype)),
        scratch_shapes=[pltpu.VMEM((scr_rows, scr_cols), jnp.float32)],
        compiler_params=pltpu.CompilerParams(
            dimension_semantics=("parallel",)),   # v7x: one batch per TensorCore
    )(x, wpack, bpack)
    return jnp.transpose(out, (0, 2, 1)), jnp.transpose(h_feat, (0, 2, 1))


# ----------------------------------------------------------------------------
# Plain-XLA reference with identical operand rounding (bf16 matmul operands,
# f32 accumulation, tanh GELU), so the cross-check tolerance can be tight.
# ----------------------------------------------------------------------------
def _conv1d_ref(x, w, b):
    K = w.shape[0]
    pad = K // 2
    L = x.shape[1]
    xp = jnp.pad(x, ((0, 0), (pad, pad), (0, 0)))
    out = None
    for k in range(K):
        t = jnp.einsum("blc,cd->bld",
                       xp[:, k:k + L, :].astype(COMPUTE_DTYPE),
                       w[k].astype(COMPUTE_DTYPE),
                       preferred_element_type=jnp.float32)
        out = t if out is None else out + t
    return out + b.astype(jnp.float32)[None]


def unet1d_reference(params, x_ncl):
    h = jnp.transpose(x_ncl, (0, 2, 1)).astype(jnp.float32)
    skips = []
    for (w1, b1), (w2, b2) in params["downs"]:
        h = _gelu(_conv1d_ref(h, w1, b1))
        h = _gelu(_conv1d_ref(h, w2, b2))
        skips.append(h)
        B, L, C = h.shape
        h = jnp.max(h.reshape(B, L // 2, 2, C), axis=2)
    for ((wd, bd), (w1, b1), (w2, b2)), skip in zip(params["ups"], reversed(skips)):
        hb = h.astype(COMPUTE_DTYPE)
        y0 = jnp.einsum("blc,cd->bld", hb, wd[0].astype(COMPUTE_DTYPE),
                        preferred_element_type=jnp.float32)
        y1 = jnp.einsum("blc,cd->bld", hb, wd[1].astype(COMPUTE_DTYPE),
                        preferred_element_type=jnp.float32)
        B, L, C = y0.shape
        up = jnp.stack([y0, y1], axis=2).reshape(B, 2 * L, C) \
            + bd.astype(jnp.float32)[None]
        h = jnp.concatenate([up, skip], axis=-1)
        h = _gelu(_conv1d_ref(h, w1, b1))
        h = _gelu(_conv1d_ref(h, w2, b2))
    h_feat = h
    out = _conv1d_ref(h, *params["out"])
    return jnp.transpose(out, (0, 2, 1)), jnp.transpose(h_feat, (0, 2, 1))


if __name__ == "__main__":
    key = jax.random.PRNGKey(0)
    kp, kx = jax.random.split(key)

    B, IN_CH, L = 2, 3, 32          # L divisible by 2**depth
    BASE_W, DEPTH, KSIZE = 8, 4, 3  # small synthetic config of UNet1d

    params = init_unet_params(kp, in_ch=IN_CH, base_width=BASE_W,
                              depth=DEPTH, ksize=KSIZE)
    x = jax.random.normal(kx, (B, IN_CH, L), jnp.float32)  # NCL, like PyTorch

    out, h_feat = unet1d_forward(params, x)
    jax.block_until_ready((out, h_feat))

    assert out.shape == (B, 3, L), out.shape
    assert h_feat.shape == (B, BASE_W, L), h_feat.shape
    assert bool(jnp.all(jnp.isfinite(out))) and bool(jnp.all(jnp.isfinite(h_feat)))

    # Tight cross-check: the reference applies the same bf16 operand rounding
    # and tanh GELU, so residual differences are f32 accumulation order and
    # transcendental ulps only.
    out_ref, feat_ref = unet1d_reference(params, x)
    err = max(float(jnp.max(jnp.abs(out - out_ref))),
              float(jnp.max(jnp.abs(h_feat - feat_ref))))
    assert err < 5e-3, f"mismatch vs reference: max abs err {err}"

    print("KERNEL_OK")
</pallas_src>

<mosaic_0001>
module attributes {stable_mosaic.version = 11 : i64} {
  func.func @kernel(%arg0: i32, %arg1: memref<1x32x3xf32, #tpu.memory_space<vmem>>, %arg2: memref<1984x64xf32, #tpu.memory_space<vmem>>, %arg3: memref<21x64xf32, #tpu.memory_space<vmem>>, %arg4: memref<1x32x3xf32, #tpu.memory_space<vmem>>, %arg5: memref<1x32x8xf32, #tpu.memory_space<vmem>>, %arg6: memref<40x128xf32, #tpu.memory_space<vmem>>) attributes {dimension_semantics = [#tpu.dimension_semantics<parallel>], iteration_bounds = array<i64: 2>, scalar_prefetch = 0 : i64, scratch_operands = 1 : i64, tpu.core_type = #tpu.core_type<tc>, window_params = [{transform_indices = @transform_0, window_bounds = array<i64: 1, 32, 3>}, {pipeline_mode = #tpu.pipeline_mode<synchronous>, transform_indices = @transform_1, window_bounds = array<i64: 1984, 64>}, {pipeline_mode = #tpu.pipeline_mode<synchronous>, transform_indices = @transform_2, window_bounds = array<i64: 21, 64>}, {transform_indices = @transform_3, window_bounds = array<i64: 1, 32, 3>}, {transform_indices = @transform_4, window_bounds = array<i64: 1, 32, 8>}]} {
    %cst = arith.constant 0.000000e+00 : f32
    %0 = vector.broadcast %cst : f32 to vector<1x3xf32>
    %c0 = arith.constant 0 : index
    %c0_0 = arith.constant 0 : index
    %1 = vector.load %arg6[%c0, %c0_0] : memref<40x128xf32, #tpu.memory_space<vmem>>, vector<1x3xf32>
    tpu.vector_store %arg6[%c0, %c0_0], %0 {strides = array<i32>} : memref<40x128xf32, #tpu.memory_space<vmem>>, vector<1x3xf32>,
    %c33 = arith.constant 33 : index
    %c0_1 = arith.constant 0 : index
    %2 = vector.load %arg6[%c33, %c0_1] : memref<40x128xf32, #tpu.memory_space<vmem>>, vector<1x3xf32>
    tpu.vector_store %arg6[%c33, %c0_1], %0 {strides = array<i32>} : memref<40x128xf32, #tpu.memory_space<vmem>>, vector<1x3xf32>,
    %c0_2 = arith.constant 0 : index
    %c0_3 = arith.constant 0 : index
    %c0_4 = arith.constant 0 : index
    %3 = vector.load %arg1[%c0_2, %c0_3, %c0_4] : memref<1x32x3xf32, #tpu.memory_space<vmem>>, vector<1x32x3xf32>
    %4 = vector.shape_cast %3 : vector<1x32x3xf32> to vector<32x3xf32>
    %c1 = arith.constant 1 : index
    %c0_5 = arith.constant 0 : index
    %5 = vector.load %arg6[%c1, %c0_5] : memref<40x128xf32, #tpu.memory_space<vmem>>, vector<32x3xf32>
    tpu.vector_store %arg6[%c1, %c0_5], %4 {strides = array<i32>} : memref<40x128xf32, #tpu.memory_space<vmem>>, vector<32x3xf32>,
    %c0_6 = arith.constant 0 : index
    %c0_7 = arith.constant 0 : index
    %6 = vector.load %arg6[%c0_6, %c0_7] : memref<40x128xf32, #tpu.memory_space<vmem>>, vector<32x3xf32>
    %7 = arith.truncf %6 : vector<32x3xf32> to vector<32x3xbf16>
    %c0_8 = arith.constant 0 : index
    %c0_9 = arith.constant 0 : index
    %8 = vector.load %arg2[%c0_8, %c0_9] : memref<1984x64xf32, #tpu.memory_space<vmem>>, vector<3x8xf32>
    %9 = arith.truncf %8 : vector<3x8xf32> to vector<3x8xbf16>
    %cst_10 = arith.constant dense<0.000000e+00> : vector<32x8xf32>
    %10 = tpu.matmul %7, %9, %cst_10 {dimension_numbers = #tpu.dot_dimension_numbers<[1], [0], [0], [1], [0, 0, 1, 1], [], []>} : vector<32x3xbf16>, vector<3x8xbf16>, vector<32x8xf32> -> vector<32x8xf32>
    %c1_11 = arith.constant 1 : index
    %c0_12 = arith.constant 0 : index
    %11 = vector.load %arg6[%c1_11, %c0_12] : memref<40x128xf32, #tpu.memory_space<vmem>>, vector<32x3xf32>
    %12 = arith.truncf %11 : vector<32x3xf32> to vector<32x3xbf16>
    %c3 = arith.constant 3 : index
    %c0_13 = arith.constant 0 : index
    %13 = vector.load %arg2[%c3, %c0_13] : memref<1984x64xf32, #tpu.memory_space<vmem>>, vector<3x8xf32>
    %14 = arith.truncf %13 : vector<3x8xf32> to vector<3x8xbf16>
    %cst_14 = arith.constant dense<0.000000e+00> : vector<32x8xf32>
    %15 = tpu.matmul %12, %14, %cst_14 {dimension_numbers = #tpu.dot_dimension_numbers<[1], [0], [0], [1], [0, 0, 1, 1], [], []>} : vector<32x3xbf16>, vector<3x8xbf16>, vector<32x8xf32> -> vector<32x8xf32>
    %16 = arith.addf %10, %15 : vector<32x8xf32>
    %c2 = arith.constant 2 : index
    %c0_15 = arith.constant 0 : index
    %17 = vector.load %arg6[%c2, %c0_15] : memref<40x128xf32, #tpu.memory_space<vmem>>, vector<32x3xf32>
    %18 = arith.truncf %17 : vector<32x3xf32> to vector<32x3xbf16>
    %c6 = arith.constant 6 : index
    %c0_16 = arith.constant 0 : index
    %19 = vector.load %arg2[%c6, %c0_16] : memref<1984x64xf32, #tpu.memory_space<vmem>>, vector<3x8xf32>
    %20 = arith.truncf %19 : vector<3x8xf32> to vector<3x8xbf16>
    %cst_17 = arith.constant dense<0.000000e+00> : vector<32x8xf32>
    %21 = tpu.matmul %18, %20, %cst_17 {dimension_numbers = #tpu.dot_dimension_numbers<[1], [0], [0], [1], [0, 0, 1, 1], [], []>} : vector<32x3xbf16>, vector<3x8xbf16>, vector<32x8xf32> -> vector<32x8xf32>
    %22 = arith.addf %16, %21 : vector<32x8xf32>
    %c0_18 = arith.constant 0 : index
    %c0_19 = arith.constant 0 : index
    %23 = vector.load %arg3[%c0_18, %c0_19] : memref<21x64xf32, #tpu.memory_space<vmem>>, vector<1x8xf32>
    %24 = vector.broadcast %23 : vector<1x8xf32> to vector<32x8xf32>
    %25 = arith.addf %22, %24 : vector<32x8xf32>
    %cst_20 = arith.constant 5.000000e-01 : f32
    %26 = vector.broadcast %cst_20 : f32 to vector<32x8xf32>
    %27 = arith.mulf %26, %25 : vector<32x8xf32>
    %cst_21 = arith.constant 4.471500e-02 : f32
    %28 = vector.broadcast %cst_21 : f32 to vector<32x8xf32>
    %29 = arith.mulf %28, %25 : vector<32x8xf32>
    %30 = arith.mulf %29, %25 : vector<32x8xf32>
    %31 = arith.mulf %30, %25 : vector<32x8xf32>
    %32 = arith.addf %25, %31 : vector<32x8xf32>
    %cst_22 = arith.constant 0.797884583 : f32
    %33 = vector.broadcast %cst_22 : f32 to vector<32x8xf32>
    %34 = arith.mulf %33, %32 : vector<32x8xf32>
    %35 = math.tanh %34 : vector<32x8xf32>
    %cst_23 = arith.constant 1.000000e+00 : f32
    %36 = vector.broadcast %cst_23 : f32 to vector<32x8xf32>
    %37 = arith.addf %36, %35 : vector<32x8xf32>
    %38 = arith.mulf %27, %37 : vector<32x8xf32>
    %cst_24 = arith.constant 0.000000e+00 : f32
    %39 = vector.broadcast %cst_24 : f32 to vector<1x8xf32>
    %c0_25 = arith.constant 0 : index
    %c0_26 = arith.constant 0 : index
    %40 = vector.load %arg6[%c0_25, %c0_26] : memref<40x128xf32, #tpu.memory_space<vmem>>, vector<1x8xf32>
    tpu.vector_store %arg6[%c0_25, %c0_26], %39 {strides = array<i32>} : memref<40x128xf32, #tpu.memory_space<vmem>>, vector<1x8xf32>,
    %c33_27 = arith.constant 33 : index
    %c0_28 = arith.constant 0 : index
    %41 = vector.load %arg6[%c33_27, %c0_28] : memref<40x128xf32, #tpu.memory_space<vmem>>, vector<1x8xf32>
    tpu.vector_store %arg6[%c33_27, %c0_28], %39 {strides = array<i32>} : memref<40x128xf32, #tpu.memory_space<vmem>>, vector<1x8xf32>,
    %c1_29 = arith.constant 1 : index
    %c0_30 = arith.constant 0 : index
    %42 = vector.load %arg6[%c1_29, %c0_30] : memref<40x128xf32, #tpu.memory_space<vmem>>, vector<32x8xf32>
    tpu.vector_store %arg6[%c1_29, %c0_30], %38 {strides = array<i32>} : memref<40x128xf32, #tpu.memory_space<vmem>>, vector<32x8xf32>,
    %c0_31 = arith.constant 0 : index
    %c0_32 = arith.constant 0 : index
    %43 = vector.load %arg6[%c0_31, %c0_32] : memref<40x128xf32, #tpu.memory_space<vmem>>, vector<32x8xf32>
    %44 = arith.truncf %43 : vector<32x8xf32> to vector<32x8xbf16>
    %c9 = arith.constant 9 : index
    %c0_33 = arith.constant 0 : index
    %45 = vector.load %arg2[%c9, %c0_33] : memref<1984x64xf32, #tpu.memory_space<vmem>>, vector<8x8xf32>
    %46 = arith.truncf %45 : vector<8x8xf32> to vector<8x8xbf16>
    %cst_34 = arith.constant dense<0.000000e+00> : vector<32x8xf32>
    %47 = tpu.matmul %44, %46, %cst_34 {dimension_numbers = #tpu.dot_dimension_numbers<[1], [0], [0], [1], [0, 0, 1, 1], [], []>} : vector<32x8xbf16>, vector<8x8xbf16>, vector<32x8xf32> -> vector<32x8xf32>
    %c1_35 = arith.constant 1 : index
    %c0_36 = arith.constant 0 : index
    %48 = vector.load %arg6[%c1_35, %c0_36] : memref<40x128xf32, #tpu.memory_space<vmem>>, vector<32x8xf32>
    %49 = arith.truncf %48 : vector<32x8xf32> to vector<32x8xbf16>
    %c17 = arith.constant 17 : index
    %c0_37 = arith.constant 0 : index
    %50 = vector.load %arg2[%c17, %c0_37] : memref<1984x64xf32, #tpu.memory_space<vmem>>, vector<8x8xf32>
    %51 = arith.truncf %50 : vector<8x8xf32> to vector<8x8xbf16>
    %cst_38 = arith.constant dense<0.000000e+00> : vector<32x8xf32>
    %52 = tpu.matmul %49, %51, %cst_38 {dimension_numbers = #tpu.dot_dimension_numbers<[1], [0], [0], [1], [0, 0, 1, 1], [], []>} : vector<32x8xbf16>, vector<8x8xbf16>, vector<32x8xf32> -> vector<32x8xf32>
    %53 = arith.addf %47, %52 : vector<32x8xf32>
    %c2_39 = arith.constant 2 : index
    %c0_40 = arith.constant 0 : index
    %54 = vector.load %arg6[%c2_39, %c0_40] : memref<40x128xf32, #tpu.memory_space<vmem>>, vector<32x8xf32>
    %55 = arith.truncf %54 : vector<32x8xf32> to vector<32x8xbf16>
    %c25 = arith.constant 25 : index
    %c0_41 = arith.constant 0 : index
    %56 = vector.load %arg2[%c25, %c0_41] : memref<1984x64xf32, #tpu.memory_space<vmem>>, vector<8x8xf32>
    %57 = arith.truncf %56 : vector<8x8xf32> to vector<8x8xbf16>
    %cst_42 = arith.constant dense<0.000000e+00> : vector<32x8xf32>
    %58 = tpu.matmul %55, %57, %cst_42 {dimension_numbers = #tpu.dot_dimension_numbers<[1], [0], [0], [1], [0, 0, 1, 1], [], []>} : vector<32x8xbf16>, vector<8x8xbf16>, vector<32x8xf32> -> vector<32x8xf32>
    %59 = arith.addf %53, %58 : vector<32x8xf32>
    %c1_43 = arith.constant 1 : index
    %c0_44 = arith.constant 0 : index
    %60 = vector.load %arg3[%c1_43, %c0_44] : memref<21x64xf32, #tpu.memory_space<vmem>>, vector<1x8xf32>
    %61 = vector.broadcast %60 : vector<1x8xf32> to vector<32x8xf32>
    %62 = arith.addf %59, %61 : vector<32x8xf32>
    %cst_45 = arith.constant 5.000000e-01 : f32
    %63 = vector.broadcast %cst_45 : f32 to vector<32x8xf32>
    %64 = arith.mulf %63, %62 : vector<32x8xf32>
    %cst_46 = arith.constant 4.471500e-02 : f32
    %65 = vector.broadcast %cst_46 : f32 to vector<32x8xf32>
    %66 = arith.mulf %65, %62 : vector<32x8xf32>
    %67 = arith.mulf %66, %62 : vector<32x8xf32>
    %68 = arith.mulf %67, %62 : vector<32x8xf32>
    %69 = arith.addf %62, %68 : vector<32x8xf32>
    %cst_47 = arith.constant 0.797884583 : f32
    %70 = vector.broadcast %cst_47 : f32 to vector<32x8xf32>
    %71 = arith.mulf %70, %69 : vector<32x8xf32>
    %72 = math.tanh %71 : vector<32x8xf32>
    %cst_48 = arith.constant 1.000000e+00 : f32
    %73 = vector.broadcast %cst_48 : f32 to vector<32x8xf32>
    %74 = arith.addf %73, %72 : vector<32x8xf32>
    %75 = arith.mulf %64, %74 : vector<32x8xf32>
    %c1_49 = arith.constant 1 : index
    %c0_50 = arith.constant 0 : index
    %76 = vector.load %arg6[%c1_49, %c0_50] : memref<40x128xf32, #tpu.memory_space<vmem>>, vector<32x8xf32>
    tpu.vector_store %arg6[%c1_49, %c0_50], %75 {strides = array<i32>} : memref<40x128xf32, #tpu.memory_space<vmem>>, vector<32x8xf32>,
    %c1_51 = arith.constant 1 : index
    %c0_52 = arith.constant 0 : index
    %77 = tpu.strided_load %arg6[%c1_51, %c0_52] {strides = array<i32: 2, 1>} : memref<40x128xf32, #tpu.memory_space<vmem>>, vector<16x8xf32>
    %c2_53 = arith.constant 2 : index
    %c0_54 = arith.constant 0 : index
    %78 = tpu.strided_load %arg6[%c2_53, %c0_54] {strides = array<i32: 2, 1>} : memref<40x128xf32, #tpu.memory_space<vmem>>, vector<16x8xf32>
    %79 = arith.maximumf %77, %78 : vector<16x8xf32>
    %cst_55 = arith.constant 0.000000e+00 : f32
    %80 = vector.broadcast %cst_55 : f32 to vector<1x8xf32>
    %c0_56 = arith.constant 0 : index
    %c0_57 = arith.constant 0 : index
    %81 = vector.load %arg6[%c0_56, %c0_57] : memref<40x128xf32, #tpu.memory_space<vmem>>, vector<1x8xf32>
    tpu.vector_store %arg6[%c0_56, %c0_57], %80 {strides = array<i32>} : memref<40x128xf32, #tpu.memory_space<vmem>>, vector<1x8xf32>,
    %c17_58 = arith.constant 17 : index
    %c0_59 = arith.constant 0 : index
    %82 = vector.load %arg6[%c17_58, %c0_59] : memref<40x128xf32, #tpu.memory_space<vmem>>, vector<1x8xf32>
    tpu.vector_store %arg6[%c17_58, %c0_59], %80 {strides = array<i32>} : memref<40x128xf32, #tpu.memory_space<vmem>>, vector<1x8xf32>,
    %c1_60 = arith.constant 1 : index
    %c0_61 = arith.constant 0 : index
    %83 = vector.load %arg6[%c1_60, %c0_61] : memref<40x128xf32, #tpu.memory_space<vmem>>, vector<16x8xf32>
    tpu.vector_store %arg6[%c1_60, %c0_61], %79 {strides = array<i32>} : memref<40x128xf32, #tpu.memory_space<vmem>>, vector<16x8xf32>,
    %c0_62 = arith.constant 0 : index
    %c0_63 = arith.constant 0 : index
    %84 = vector.load %arg6[%c0_62, %c0_63] : memref<40x128xf32, #tpu.memory_space<vmem>>, vector<16x8xf32>
    %85 = arith.truncf %84 : vector<16x8xf32> to vector<16x8xbf16>
    %c33_64 = arith.constant 33 : index
    %c0_65 = arith.constant 0 : index
    %86 = vector.load %arg2[%c33_64, %c0_65] : memref<1984x64xf32, #tpu.memory_space<vmem>>, vector<8x16xf32>
    %87 = arith.truncf %86 : vector<8x16xf32> to vector<8x16xbf16>
    %cst_66 = arith.constant dense<0.000000e+00> : vector<16x16xf32>
    %88 = tpu.matmul %85, %87, %cst_66 {dimension_numbers = #tpu.dot_dimension_numbers<[1], [0], [0], [1], [0, 0, 1, 1], [], []>} : vector<16x8xbf16>, vector<8x16xbf16>, vector<16x16xf32> -> vector<16x16xf32>
    %c1_67 = arith.constant 1 : index
    %c0_68 = arith.constant 0 : index
    %89 = vector.load %arg6[%c1_67, %c0_68] : memref<40x128xf32, #tpu.memory_space<vmem>>, vector<16x8xf32>
    %90 = arith.truncf %89 : vector<16x8xf32> to vector<16x8xbf16>
    %c41 = arith.constant 41 : index
    %c0_69 = arith.constant 0 : index
    %91 = vector.load %arg2[%c41, %c0_69] : memref<1984x64xf32, #tpu.memory_space<vmem>>, vector<8x16xf32>
    %92 = arith.truncf %91 : vector<8x16xf32> to vector<8x16xbf16>
    %cst_70 = arith.constant dense<0.000000e+00> : vector<16x16xf32>
    %93 = tpu.matmul %90, %92, %cst_70 {dimension_numbers = #tpu.dot_dimension_numbers<[1], [0], [0], [1], [0, 0, 1, 1], [], []>} : vector<16x8xbf16>, vector<8x16xbf16>, vector<16x16xf32> -> vector<16x16xf32>
    %94 = arith.addf %88, %93 : vector<16x16xf32>
    %c2_71 = arith.constant 2 : index
    %c0_72 = arith.constant 0 : index
    %95 = vector.load %arg6[%c2_71, %c0_72] : memref<40x128xf32, #tpu.memory_space<vmem>>, vector<16x8xf32>
    %96 = arith.truncf %95 : vector<16x8xf32> to vector<16x8xbf16>
    %c49 = arith.constant 49 : index
    %c0_73 = arith.constant 0 : index
    %97 = vector.load %arg2[%c49, %c0_73] : memref<1984x64xf32, #tpu.memory_space<vmem>>, vector<8x16xf32>
    %98 = arith.truncf %97 : vector<8x16xf32> to vector<8x16xbf16>
    %cst_74 = arith.constant dense<0.000000e+00> : vector<16x16xf32>
    %99 = tpu.matmul %96, %98, %cst_74 {dimension_numbers = #tpu.dot_dimension_numbers<[1], [0], [0], [1], [0, 0, 1, 1], [], []>} : vector<16x8xbf16>, vector<8x16xbf16>, vector<16x16xf32> -> vector<16x16xf32>
    %100 = arith.addf %94, %99 : vector<16x16xf32>
    %c2_75 = arith.constant 2 : index
    %c0_76 = arith.constant 0 : index
    %101 = vector.load %arg3[%c2_75, %c0_76] : memref<21x64xf32, #tpu.memory_space<vmem>>, vector<1x16xf32>
    %102 = vector.broadcast %101 : vector<1x16xf32> to vector<16x16xf32>
    %103 = arith.addf %100, %102 : vector<16x16xf32>
    %cst_77 = arith.constant 5.000000e-01 : f32
    %104 = vector.broadcast %cst_77 : f32 to vector<16x16xf32>
    %105 = arith.mulf %104, %103 : vector<16x16xf32>
    %cst_78 = arith.constant 4.471500e-02 : f32
    %106 = vector.broadcast %cst_78 : f32 to vector<16x16xf32>
    %107 = arith.mulf %106, %103 : vector<16x16xf32>
    %108 = arith.mulf %107, %103 : vector<16x16xf32>
    %109 = arith.mulf %108, %103 : vector<16x16xf32>
    %110 = arith.addf %103, %109 : vector<16x16xf32>
    %cst_79 = arith.constant 0.797884583 : f32
    %111 = vector.broadcast %cst_79 : f32 to vector<16x16xf32>
    %112 = arith.mulf %111, %110 : vector<16x16xf32>
    %113 = math.tanh %112 : vector<16x16xf32>
    %cst_80 = arith.constant 1.000000e+00 : f32
    %114 = vector.broadcast %cst_80 : f32 to vector<16x16xf32>
    %115 = arith.addf %114, %113 : vector<16x16xf32>
    %116 = arith.mulf %105, %115 : vector<16x16xf32>
    %cst_81 = arith.constant 0.000000e+00 : f32
    %117 = vector.broadcast %cst_81 : f32 to vector<1x16xf32>
    %c0_82 = arith.constant 0 : index
    %c0_83 = arith.constant 0 : index
    %118 = vector.load %arg6[%c0_82, %c0_83] : memref<40x128xf32, #tpu.memory_space<vmem>>, vector<1x16xf32>
    tpu.vector_store %arg6[%c0_82, %c0_83], %117 {strides = array<i32>} : memref<40x128xf32, #tpu.memory_space<vmem>>, vector<1x16xf32>,
    %c17_84 = arith.constant 17 : index
    %c0_85 = arith.constant 0 : index
    %119 = vector.load %arg6[%c17_84, %c0_85] : memref<40x128xf32, #tpu.memory_space<vmem>>, vector<1x16xf32>
    tpu.vector_store %arg6[%c17_84, %c0_85], %117 {strides = array<i32>} : memref<40x128xf32, #tpu.memory_space<vmem>>, vector<1x16xf32>,
    %c1_86 = arith.constant 1 : index
    %c0_87 = arith.constant 0 : index
    %120 = vector.load %arg6[%c1_86, %c0_87] : memref<40x128xf32, #tpu.memory_space<vmem>>, vector<16x16xf32>
    tpu.vector_store %arg6[%c1_86, %c0_87], %116 {strides = array<i32>} : memref<40x128xf32, #tpu.memory_space<vmem>>, vector<16x16xf32>,
    %c0_88 = arith.constant 0 : index
    %c0_89 = arith.constant 0 : index
    %121 = vector.load %arg6[%c0_88, %c0_89] : memref<40x128xf32, #tpu.memory_space<vmem>>, vector<16x16xf32>
    %122 = arith.truncf %121 : vector<16x16xf32> to vector<16x16xbf16>
    %c57 = arith.constant 57 : index
    %c0_90 = arith.constant 0 : index
    %123 = vector.load %arg2[%c57, %c0_90] : memref<1984x64xf32, #tpu.memory_space<vmem>>, vector<16x16xf32>
    %124 = arith.truncf %123 : vector<16x16xf32> to vector<16x16xbf16>
    %cst_91 = arith.constant dense<0.000000e+00> : vector<16x16xf32>
    %125 = tpu.matmul %122, %124, %cst_91 {dimension_numbers = #tpu.dot_dimension_numbers<[1], [0], [0], [1], [0, 0, 1, 1], [], []>} : vector<16x16xbf16>, vector<16x16xbf16>, vector<16x16xf32> -> vector<16x16xf32>
    %c1_92 = arith.constant 1 : index
    %c0_93 = arith.constant 0 : index
    %126 = vector.load %arg6[%c1_92, %c0_93] : memref<40x128xf32, #tpu.memory_space<vmem>>, vector<16x16xf32>
    %127 = arith.truncf %126 : vector<16x16xf32> to vector<16x16xbf16>
    %c73 = arith.constant 73 : index
    %c0_94 = arith.constant 0 : index
    %128 = vector.load %arg2[%c73, %c0_94] : memref<1984x64xf32, #tpu.memory_space<vmem>>, vector<16x16xf32>
    %129 = arith.truncf %128 : vector<16x16xf32> to vector<16x16xbf16>
    %cst_95 = arith.constant dense<0.000000e+00> : vector<16x16xf32>
    %130 = tpu.matmul %127, %129, %cst_95 {dimension_numbers = #tpu.dot_dimension_numbers<[1], [0], [0], [1], [0, 0, 1, 1], [], []>} : vector<16x16xbf16>, vector<16x16xbf16>, vector<16x16xf32> -> vector<16x16xf32>
    %131 = arith.addf %125, %130 : vector<16x16xf32>
    %c2_96 = arith.constant 2 : index
    %c0_97 = arith.constant 0 : index
    %132 = vector.load %arg6[%c2_96, %c0_97] : memref<40x128xf32, #tpu.memory_space<vmem>>, vector<16x16xf32>
    %133 = arith.truncf %132 : vector<16x16xf32> to vector<16x16xbf16>
    %c89 = arith.constant 89 : index
    %c0_98 = arith.constant 0 : index
    %134 = vector.load %arg2[%c89, %c0_98] : memref<1984x64xf32, #tpu.memory_space<vmem>>, vector<16x16xf32>
    %135 = arith.truncf %134 : vector<16x16xf32> to vector<16x16xbf16>
    %cst_99 = arith.constant dense<0.000000e+00> : vector<16x16xf32>
    %136 = tpu.matmul %133, %135, %cst_99 {dimension_numbers = #tpu.dot_dimension_numbers<[1], [0], [0], [1], [0, 0, 1, 1], [], []>} : vector<16x16xbf16>, vector<16x16xbf16>, vector<16x16xf32> -> vector<16x16xf32>
    %137 = arith.addf %131, %136 : vector<16x16xf32>
    %c3_100 = arith.constant 3 : index
    %c0_101 = arith.constant 0 : index
    %138 = vector.load %arg3[%c3_100, %c0_101] : memref<21x64xf32, #tpu.memory_space<vmem>>, vector<1x16xf32>
    %139 = vector.broadcast %138 : vector<1x16xf32> to vector<16x16xf32>
    %140 = arith.addf %137, %139 : vector<16x16xf32>
    %cst_102 = arith.constant 5.000000e-01 : f32
    %141 = vector.broadcast %cst_102 : f32 to vector<16x16xf32>
    %142 = arith.mulf %141, %140 : vector<16x16xf32>
    %cst_103 = arith.constant 4.471500e-02 : f32
    %143 = vector.broadcast %cst_103 : f32 to vector<16x16xf32>
    %144 = arith.mulf %143, %140 : vector<16x16xf32>
    %145 = arith.mulf %144, %140 : vector<16x16xf32>
    %146 = arith.mulf %145, %140 : vector<16x16xf32>
    %147 = arith.addf %140, %146 : vector<16x16xf32>
    %cst_104 = arith.constant 0.797884583 : f32
    %148 = vector.broadcast %cst_104 : f32 to vector<16x16xf32>
    %149 = arith.mulf %148, %147 : vector<16x16xf32>
    %150 = math.tanh %149 : vector<16x16xf32>
    %cst_105 = arith.constant 1.000000e+00 : f32
    %151 = vector.broadcast %cst_105 : f32 to vector<16x16xf32>
    %152 = arith.addf %151, %150 : vector<16x16xf32>
    %153 = arith.mulf %142, %152 : vector<16x16xf32>
    %c1_106 = arith.constant 1 : index
    %c0_107 = arith.constant 0 : index
    %154 = vector.load %arg6[%c1_106, %c0_107] : memref<40x128xf32, #tpu.memory_space<vmem>>, vector<16x16xf32>
    tpu.vector_store %arg6[%c1_106, %c0_107], %153 {strides = array<i32>} : memref<40x128xf32, #tpu.memory_space<vmem>>, vector<16x16xf32>,
    %c1_108 = arith.constant 1 : index
    %c0_109 = arith.constant 0 : index
    %155 = tpu.strided_load %arg6[%c1_108, %c0_109] {strides = array<i32: 2, 1>} : memref<40x128xf32, #tpu.memory_space<vmem>>, vector<8x16xf32>
    %c2_110 = arith.constant 2 : index
    %c0_111 = arith.constant 0 : index
    %156 = tpu.strided_load %arg6[%c2_110, %c0_111] {strides = array<i32: 2, 1>} : memref<40x128xf32, #tpu.memory_space<vmem>>, vector<8x16xf32>
    %157 = arith.maximumf %155, %156 : vector<8x16xf32>
    %cst_112 = arith.constant 0.000000e+00 : f32
    %158 = vector.broadcast %cst_112 : f32 to vector<1x16xf32>
    %c0_113 = arith.constant 0 : index
    %c0_114 = arith.constant 0 : index
    %159 = vector.load %arg6[%c0_113, %c0_114] : memref<40x128xf32, #tpu.memory_space<vmem>>, vector<1x16xf32>
    tpu.vector_store %arg6[%c0_113, %c0_114], %158 {strides = array<i32>} : memref<40x128xf32, #tpu.memory_space<vmem>>, vector<1x16xf32>,
    %c9_115 = arith.constant 9 : index
    %c0_116 = arith.constant 0 : index
    %160 = vector.load %arg6[%c9_115, %c0_116] : memref<40x128xf32, #tpu.memory_space<vmem>>, vector<1x16xf32>
    tpu.vector_store %arg6[%c9_115, %c0_116], %158 {strides = array<i32>} : memref<40x128xf32, #tpu.memory_space<vmem>>, vector<1x16xf32>,
    %c1_117 = arith.constant 1 : index
    %c0_118 = arith.constant 0 : index
    %161 = vector.load %arg6[%c1_117, %c0_118] : memref<40x128xf32, #tpu.memory_space<vmem>>, vector<8x16xf32>
    tpu.vector_store %arg6[%c1_117, %c0_118], %157 {strides = array<i32>} : memref<40x128xf32, #tpu.memory_space<vmem>>, vector<8x16xf32>,
    %c0_119 = arith.constant 0 : index
    %c0_120 = arith.constant 0 : index
    %162 = vector.load %arg6[%c0_119, %c0_120] : memref<40x128xf32, #tpu.memory_space<vmem>>, vector<8x16xf32>
    %163 = arith.truncf %162 : vector<8x16xf32> to vector<8x16xbf16>
    %c105 = arith.constant 105 : index
    %c0_121 = arith.constant 0 : index
    %164 = vector.load %arg2[%c105, %c0_121] : memref<1984x64xf32, #tpu.memory_space<vmem>>, vector<16x32xf32>
    %165 = arith.truncf %164 : vector<16x32xf32> to vector<16x32xbf16>
    %cst_122 = arith.constant dense<0.000000e+00> : vector<8x32xf32>
    %166 = tpu.matmul %163, %165, %cst_122 {dimension_numbers = #tpu.dot_dimension_numbers<[1], [0], [0], [1], [0, 0, 1, 1], [], []>} : vector<8x16xbf16>, vector<16x32xbf16>, vector<8x32xf32> -> vector<8x32xf32>
    %c1_123 = arith.constant 1 : index
    %c0_124 = arith.constant 0 : index
    %167 = vector.load %arg6[%c1_123, %c0_124] : memref<40x128xf32, #tpu.memory_space<vmem>>, vector<8x16xf32>
    %168 = arith.truncf %167 : vector<8x16xf32> to vector<8x16xbf16>
    %c121 = arith.constant 121 : index
    %c0_125 = arith.constant 0 : index
    %169 = vector.load %arg2[%c121, %c0_125] : memref<1984x64xf32, #tpu.memory_space<vmem>>, vector<16x32xf32>
    %170 = arith.truncf %169 : vector<16x32xf32> to vector<16x32xbf16>
    %cst_126 = arith.constant dense<0.000000e+00> : vector<8x32xf32>
    %171 = tpu.matmul %168, %170, %cst_126 {dimension_numbers = #tpu.dot_dimension_numbers<[1], [0], [0], [1], [0, 0, 1, 1], [], []>} : vector<8x16xbf16>, vector<16x32xbf16>, vector<8x32xf32> -> vector<8x32xf32>
    %172 = arith.addf %166, %171 : vector<8x32xf32>
    %c2_127 = arith.constant 2 : index
    %c0_128 = arith.constant 0 : index
    %173 = vector.load %arg6[%c2_127, %c0_128] : memref<40x128xf32, #tpu.memory_space<vmem>>, vector<8x16xf32>
    %174 = arith.truncf %173 : vector<8x16xf32> to vector<8x16xbf16>
    %c137 = arith.constant 137 : index
    %c0_129 = arith.constant 0 : index
    %175 = vector.load %arg2[%c137, %c0_129] : memref<1984x64xf32, #tpu.memory_space<vmem>>, vector<16x32xf32>
    %176 = arith.truncf %175 : vector<16x32xf32> to vector<16x32xbf16>
    %cst_130 = arith.constant dense<0.000000e+00> : vector<8x32xf32>
    %177 = tpu.matmul %174, %176, %cst_130 {dimension_numbers = #tpu.dot_dimension_numbers<[1], [0], [0], [1], [0, 0, 1, 1], [], []>} : vector<8x16xbf16>, vector<16x32xbf16>, vector<8x32xf32> -> vector<8x32xf32>
    %178 = arith.addf %172, %177 : vector<8x32xf32>
    %c4 = arith.constant 4 : index
    %c0_131 = arith.constant 0 : index
    %179 = vector.load %arg3[%c4, %c0_131] : memref<21x64xf32, #tpu.memory_space<vmem>>, vector<1x32xf32>
    %180 = vector.broadcast %179 : vector<1x32xf32> to vector<8x32xf32>
    %181 = arith.addf %178, %180 : vector<8x32xf32>
    %cst_132 = arith.constant 5.000000e-01 : f32
    %182 = vector.broadcast %cst_132 : f32 to vector<8x32xf32>
    %183 = arith.mulf %182, %181 : vector<8x32xf32>
    %cst_133 = arith.constant 4.471500e-02 : f32
    %184 = vector.broadcast %cst_133 : f32 to vector<8x32xf32>
    %185 = arith.mulf %184, %181 : vector<8x32xf32>
    %186 = arith.mulf %185, %181 : vector<8x32xf32>
    %187 = arith.mulf %186, %181 : vector<8x32xf32>
    %188 = arith.addf %181, %187 : vector<8x32xf32>
    %cst_134 = arith.constant 0.797884583 : f32
    %189 = vector.broadcast %cst_134 : f32 to vector<8x32xf32>
    %190 = arith.mulf %189, %188 : vector<8x32xf32>
    %191 = math.tanh %190 : vector<8x32xf32>
    %cst_135 = arith.constant 1.000000e+00 : f32
    %192 = vector.broadcast %cst_135 : f32 to vector<8x32xf32>
    %193 = arith.addf %192, %191 : vector<8x32xf32>
    %194 = arith.mulf %183, %193 : vector<8x32xf32>
    %cst_136 = arith.constant 0.000000e+00 : f32
    %195 = vector.broadcast %cst_136 : f32 to vector<1x32xf32>
    %c0_137 = arith.constant 0 : index
    %c0_138 = arith.constant 0 : index
    %196 = vector.load %arg6[%c0_137, %c0_138] : memref<40x128xf32, #tpu.memory_space<vmem>>, vector<1x32xf32>
    tpu.vector_store %arg6[%c0_137, %c0_138], %195 {strides = array<i32>} : memref<40x128xf32, #tpu.memory_space<vmem>>, vector<1x32xf32>,
    %c9_139 = arith.constant 9 : index
    %c0_140 = arith.constant 0 : index
    %197 = vector.load %arg6[%c9_139, %c0_140] : memref<40x128xf32, #tpu.memory_space<vmem>>, vector<1x32xf32>
    tpu.vector_store %arg6[%c9_139, %c0_140], %195 {strides = array<i32>} : memref<40x128xf32, #tpu.memory_space<vmem>>, vector<1x32xf32>,
    %c1_141 = arith.constant 1 : index
    %c0_142 = arith.constant 0 : index
    %198 = vector.load %arg6[%c1_141, %c0_142] : memref<40x128xf32, #tpu.memory_space<vmem>>, vector<8x32xf32>
    tpu.vector_store %arg6[%c1_141, %c0_142], %194 {strides = array<i32>} : memref<40x128xf32, #tpu.memory_space<vmem>>, vector<8x32xf32>,
    %c0_143 = arith.constant 0 : index
    %c0_144 = arith.constant 0 : index
    %199 = vector.load %arg6[%c0_143, %c0_144] : memref<40x128xf32, #tpu.memory_space<vmem>>, vector<8x32xf32>
    %200 = arith.truncf %199 : vector<8x32xf32> to vector<8x32xbf16>
    %c153 = arith.constant 153 : index
    %c0_145 = arith.constant 0 : index
    %201 = vector.load %arg2[%c153, %c0_145] : memref<1984x64xf32, #tpu.memory_space<vmem>>, vector<32x32xf32>
    %202 = arith.truncf %201 : vector<32x32xf32> to vector<32x32xbf16>
    %cst_146 = arith.constant dense<0.000000e+00> : vector<8x32xf32>
    %203 = tpu.matmul %200, %202, %cst_146 {dimension_numbers = #tpu.dot_dimension_numbers<[1], [0], [0], [1], [0, 0, 1, 1], [], []>} : vector<8x32xbf16>, vector<32x32xbf16>, vector<8x32xf32> -> vector<8x32xf32>
    %c1_147 = arith.constant 1 : index
    %c0_148 = arith.constant 0 : index
    %204 = vector.load %arg6[%c1_147, %c0_148] : memref<40x128xf32, #tpu.memory_space<vmem>>, vector<8x32xf32>
    %205 = arith.truncf %204 : vector<8x32xf32> to vector<8x32xbf16>
    %c185 = arith.constant 185 : index
    %c0_149 = arith.constant 0 : index
    %206 = vector.load %arg2[%c185, %c0_149] : memref<1984x64xf32, #tpu.memory_space<vmem>>, vector<32x32xf32>
    %207 = arith.truncf %206 : vector<32x32xf32> to vector<32x32xbf16>
    %cst_150 = arith.constant dense<0.000000e+00> : vector<8x32xf32>
    %208 = tpu.matmul %205, %207, %cst_150 {dimension_numbers = #tpu.dot_dimension_numbers<[1], [0], [0], [1], [0, 0, 1, 1], [], []>} : vector<8x32xbf16>, vector<32x32xbf16>, vector<8x32xf32> -> vector<8x32xf32>
    %209 = arith.addf %203, %208 : vector<8x32xf32>
    %c2_151 = arith.constant 2 : index
    %c0_152 = arith.constant 0 : index
    %210 = vector.load %arg6[%c2_151, %c0_152] : memref<40x128xf32, #tpu.memory_space<vmem>>, vector<8x32xf32>
    %211 = arith.truncf %210 : vector<8x32xf32> to vector<8x32xbf16>
    %c217 = arith.constant 217 : index
    %c0_153 = arith.constant 0 : index
    %212 = vector.load %arg2[%c217, %c0_153] : memref<1984x64xf32, #tpu.memory_space<vmem>>, vector<32x32xf32>
    %213 = arith.truncf %212 : vector<32x32xf32> to vector<32x32xbf16>
    %cst_154 = arith.constant dense<0.000000e+00> : vector<8x32xf32>
    %214 = tpu.matmul %211, %213, %cst_154 {dimension_numbers = #tpu.dot_dimension_numbers<[1], [0], [0], [1], [0, 0, 1, 1], [], []>} : vector<8x32xbf16>, vector<32x32xbf16>, vector<8x32xf32> -> vector<8x32xf32>
    %215 = arith.addf %209, %214 : vector<8x32xf32>
    %c5 = arith.constant 5 : index
    %c0_155 = arith.constant 0 : index
    %216 = vector.load %arg3[%c5, %c0_155] : memref<21x64xf32, #tpu.memory_space<vmem>>, vector<1x32xf32>
    %217 = vector.broadcast %216 : vector<1x32xf32> to vector<8x32xf32>
    %218 = arith.addf %215, %217 : vector<8x32xf32>
    %cst_156 = arith.constant 5.000000e-01 : f32
    %219 = vector.broadcast %cst_156 : f32 to vector<8x32xf32>
    %220 = arith.mulf %219, %218 : vector<8x32xf32>
    %cst_157 = arith.constant 4.471500e-02 : f32
    %221 = vector.broadcast %cst_157 : f32 to vector<8x32xf32>
    %222 = arith.mulf %221, %218 : vector<8x32xf32>
    %223 = arith.mulf %222, %218 : vector<8x32xf32>
    %224 = arith.mulf %223, %218 : vector<8x32xf32>
    %225 = arith.addf %218, %224 : vector<8x32xf32>
    %cst_158 = arith.constant 0.797884583 : f32
    %226 = vector.broadcast %cst_158 : f32 to vector<8x32xf32>
    %227 = arith.mulf %226, %225 : vector<8x32xf32>
    %228 = math.tanh %227 : vector<8x32xf32>
    %cst_159 = arith.constant 1.000000e+00 : f32
    %229 = vector.broadcast %cst_159 : f32 to vector<8x32xf32>
    %230 = arith.addf %229, %228 : vector<8x32xf32>
    %231 = arith.mulf %220, %230 : vector<8x32xf32>
    %c1_160 = arith.constant 1 : index
    %c0_161 = arith.constant 0 : index
    %232 = vector.load %arg6[%c1_160, %c0_161] : memref<40x128xf32, #tpu.memory_space<vmem>>, vector<8x32xf32>
    tpu.vector_store %arg6[%c1_160, %c0_161], %231 {strides = array<i32>} : memref<40x128xf32, #tpu.memory_space<vmem>>, vector<8x32xf32>,
    %c1_162 = arith.constant 1 : index
    %c0_163 = arith.constant 0 : index
    %233 = tpu.strided_load %arg6[%c1_162, %c0_163] {strides = array<i32: 2, 1>} : memref<40x128xf32, #tpu.memory_space<vmem>>, vector<4x32xf32>
    %c2_164 = arith.constant 2 : index
    %c0_165 = arith.constant 0 : index
    %234 = tpu.strided_load %arg6[%c2_164, %c0_165] {strides = array<i32: 2, 1>} : memref<40x128xf32, #tpu.memory_space<vmem>>, vector<4x32xf32>
    %235 = arith.maximumf %233, %234 : vector<4x32xf32>
    %cst_166 = arith.constant 0.000000e+00 : f32
    %236 = vector.broadcast %cst_166 : f32 to vector<1x32xf32>
    %c0_167 = arith.constant 0 : index
    %c0_168 = arith.constant 0 : index
    %237 = vector.load %arg6[%c0_167, %c0_168] : memref<40x128xf32, #tpu.memory_space<vmem>>, vector<1x32xf32>
    tpu.vector_store %arg6[%c0_167, %c0_168], %236 {strides = array<i32>} : memref<40x128xf32, #tpu.memory_space<vmem>>, vector<1x32xf32>,
    %c5_169 = arith.constant 5 : index
    %c0_170 = arith.constant 0 : index
    %238 = vector.load %arg6[%c5_169, %c0_170] : memref<40x128xf32, #tpu.memory_space<vmem>>, vector<1x32xf32>
    tpu.vector_store %arg6[%c5_169, %c0_170], %236 {strides = array<i32>} : memref<40x128xf32, #tpu.memory_space<vmem>>, vector<1x32xf32>,
    %c1_171 = arith.constant 1 : index
    %c0_172 = arith.constant 0 : index
    %239 = vector.load %arg6[%c1_171, %c0_172] : memref<40x128xf32, #tpu.memory_space<vmem>>, vector<4x32xf32>
    tpu.vector_store %arg6[%c1_171, %c0_172], %235 {strides = array<i32>} : memref<40x128xf32, #tpu.memory_space<vmem>>, vector<4x32xf32>,
    %c0_173 = arith.constant 0 : index
    %c0_174 = arith.constant 0 : index
    %240 = vector.load %arg6[%c0_173, %c0_174] : memref<40x128xf32, #tpu.memory_space<vmem>>, vector<4x32xf32>
    %241 = arith.truncf %240 : vector<4x32xf32> to vector<4x32xbf16>
    %c249 = arith.constant 249 : index
    %c0_175 = arith.constant 0 : index
    %242 = vector.load %arg2[%c249, %c0_175] : memref<1984x64xf32, #tpu.memory_space<vmem>>, vector<32x64xf32>
    %243 = arith.truncf %242 : vector<32x64xf32> to vector<32x64xbf16>
    %cst_176 = arith.constant dense<0.000000e+00> : vector<4x64xf32>
    %244 = tpu.matmul %241, %243, %cst_176 {dimension_numbers = #tpu.dot_dimension_numbers<[1], [0], [0], [1], [0, 0, 1, 1], [], []>} : vector<4x32xbf16>, vector<32x64xbf16>, vector<4x64xf32> -> vector<4x64xf32>
    %c1_177 = arith.constant 1 : index
    %c0_178 = arith.constant 0 : index
    %245 = vector.load %arg6[%c1_177, %c0_178] : memref<40x128xf32, #tpu.memory_space<vmem>>, vector<4x32xf32>
    %246 = arith.truncf %245 : vector<4x32xf32> to vector<4x32xbf16>
    %c281 = arith.constant 281 : index
    %c0_179 = arith.constant 0 : index
    %247 = vector.load %arg2[%c281, %c0_179] : memref<1984x64xf32, #tpu.memory_space<vmem>>, vector<32x64xf32>
    %248 = arith.truncf %247 : vector<32x64xf32> to vector<32x64xbf16>
    %cst_180 = arith.constant dense<0.000000e+00> : vector<4x64xf32>
    %249 = tpu.matmul %246, %248, %cst_180 {dimension_numbers = #tpu.dot_dimension_numbers<[1], [0], [0], [1], [0, 0, 1, 1], [], []>} : vector<4x32xbf16>, vector<32x64xbf16>, vector<4x64xf32> -> vector<4x64xf32>
    %250 = arith.addf %244, %249 : vector<4x64xf32>
    %c2_181 = arith.constant 2 : index
    %c0_182 = arith.constant 0 : index
    %251 = vector.load %arg6[%c2_181, %c0_182] : memref<40x128xf32, #tpu.memory_space<vmem>>, vector<4x32xf32>
    %252 = arith.truncf %251 : vector<4x32xf32> to vector<4x32xbf16>
    %c313 = arith.constant 313 : index
    %c0_183 = arith.constant 0 : index
    %253 = vector.load %arg2[%c313, %c0_183] : memref<1984x64xf32, #tpu.memory_space<vmem>>, vector<32x64xf32>
    %254 = arith.truncf %253 : vector<32x64xf32> to vector<32x64xbf16>
    %cst_184 = arith.constant dense<0.000000e+00> : vector<4x64xf32>
    %255 = tpu.matmul %252, %254, %cst_184 {dimension_numbers = #tpu.dot_dimension_numbers<[1], [0], [0], [1], [0, 0, 1, 1], [], []>} : vector<4x32xbf16>, vector<32x64xbf16>, vector<4x64xf32> -> vector<4x64xf32>
    %256 = arith.addf %250, %255 : vector<4x64xf32>
    %c6_185 = arith.constant 6 : index
    %c0_186 = arith.constant 0 : index
    %257 = vector.load %arg3[%c6_185, %c0_186] : memref<21x64xf32, #tpu.memory_space<vmem>>, vector<1x64xf32>
    %258 = vector.broadcast %257 : vector<1x64xf32> to vector<4x64xf32>
    %259 = arith.addf %256, %258 : vector<4x64xf32>
    %cst_187 = arith.constant 5.000000e-01 : f32
    %260 = vector.broadcast %cst_187 : f32 to vector<4x64xf32>
    %261 = arith.mulf %260, %259 : vector<4x64xf32>
    %cst_188 = arith.constant 4.471500e-02 : f32
    %262 = vector.broadcast %cst_188 : f32 to vector<4x64xf32>
    %263 = arith.mulf %262, %259 : vector<4x64xf32>
    %264 = arith.mulf %263, %259 : vector<4x64xf32>
    %265 = arith.mulf %264, %259 : vector<4x64xf32>
    %266 = arith.addf %259, %265 : vector<4x64xf32>
    %cst_189 = arith.constant 0.797884583 : f32
    %267 = vector.broadcast %cst_189 : f32 to vector<4x64xf32>
    %268 = arith.mulf %267, %266 : vector<4x64xf32>
    %269 = math.tanh %268 : vector<4x64xf32>
    %cst_190 = arith.constant 1.000000e+00 : f32
    %270 = vector.broadcast %cst_190 : f32 to vector<4x64xf32>
    %271 = arith.addf %270, %269 : vector<4x64xf32>
    %272 = arith.mulf %261, %271 : vector<4x64xf32>
    %cst_191 = arith.constant 0.000000e+00 : f32
    %273 = vector.broadcast %cst_191 : f32 to vector<1x64xf32>
    %c0_192 = arith.constant 0 : index
    %c0_193 = arith.constant 0 : index
    %274 = vector.load %arg6[%c0_192, %c0_193] : memref<40x128xf32, #tpu.memory_space<vmem>>, vector<1x64xf32>
    tpu.vector_store %arg6[%c0_192, %c0_193], %273 {strides = array<i32>} : memref<40x128xf32, #tpu.memory_space<vmem>>, vector<1x64xf32>,
    %c5_194 = arith.constant 5 : index
    %c0_195 = arith.constant 0 : index
    %275 = vector.load %arg6[%c5_194, %c0_195] : memref<40x128xf32, #tpu.memory_space<vmem>>, vector<1x64xf32>
    tpu.vector_store %arg6[%c5_194, %c0_195], %273 {strides = array<i32>} : memref<40x128xf32, #tpu.memory_space<vmem>>, vector<1x64xf32>,
    %c1_196 = arith.constant 1 : index
    %c0_197 = arith.constant 0 : index
    %276 = vector.load %arg6[%c1_196, %c0_197] : memref<40x128xf32, #tpu.memory_space<vmem>>, vector<4x64xf32>
    tpu.vector_store %arg6[%c1_196, %c0_197], %272 {strides = array<i32>} : memref<40x128xf32, #tpu.memory_space<vmem>>, vector<4x64xf32>,
    %c0_198 = arith.constant 0 : index
    %c0_199 = arith.constant 0 : index
    %277 = vector.load %arg6[%c0_198, %c0_199] : memref<40x128xf32, #tpu.memory_space<vmem>>, vector<4x64xf32>
    %278 = arith.truncf %277 : vector<4x64xf32> to vector<4x64xbf16>
    %c345 = arith.constant 345 : index
    %c0_200 = arith.constant 0 : index
    %279 = vector.load %arg2[%c345, %c0_200] : memref<1984x64xf32, #tpu.memory_space<vmem>>, vector<64x64xf32>
    %280 = arith.truncf %279 : vector<64x64xf32> to vector<64x64xbf16>
    %cst_201 = arith.constant dense<0.000000e+00> : vector<4x64xf32>
    %281 = tpu.matmul %278, %280, %cst_201 {dimension_numbers = #tpu.dot_dimension_numbers<[1], [0], [0], [1], [0, 0, 1, 1], [], []>} : vector<4x64xbf16>, vector<64x64xbf16>, vector<4x64xf32> -> vector<4x64xf32>
    %c1_202 = arith.constant 1 : index
    %c0_203 = arith.constant 0 : index
    %282 = vector.load %arg6[%c1_202, %c0_203] : memref<40x128xf32, #tpu.memory_space<vmem>>, vector<4x64xf32>
    %283 = arith.truncf %282 : vector<4x64xf32> to vector<4x64xbf16>
    %c409 = arith.constant 409 : index
    %c0_204 = arith.constant 0 : index
    %284 = vector.load %arg2[%c409, %c0_204] : memref<1984x64xf32, #tpu.memory_space<vmem>>, vector<64x64xf32>
    %285 = arith.truncf %284 : vector<64x64xf32> to vector<64x64xbf16>
    %cst_205 = arith.constant dense<0.000000e+00> : vector<4x64xf32>
    %286 = tpu.matmul %283, %285, %cst_205 {dimension_numbers = #tpu.dot_dimension_numbers<[1], [0], [0], [1], [0, 0, 1, 1], [], []>} : vector<4x64xbf16>, vector<64x64xbf16>, vector<4x64xf32> -> vector<4x64xf32>
    %287 = arith.addf %281, %286 : vector<4x64xf32>
    %c2_206 = arith.constant 2 : index
    %c0_207 = arith.constant 0 : index
    %288 = vector.load %arg6[%c2_206, %c0_207] : memref<40x128xf32, #tpu.memory_space<vmem>>, vector<4x64xf32>
    %289 = arith.truncf %288 : vector<4x64xf32> to vector<4x64xbf16>
    %c473 = arith.constant 473 : index
    %c0_208 = arith.constant 0 : index
    %290 = vector.load %arg2[%c473, %c0_208] : memref<1984x64xf32, #tpu.memory_space<vmem>>, vector<64x64xf32>
    %291 = arith.truncf %290 : vector<64x64xf32> to vector<64x64xbf16>
    %cst_209 = arith.constant dense<0.000000e+00> : vector<4x64xf32>
    %292 = tpu.matmul %289, %291, %cst_209 {dimension_numbers = #tpu.dot_dimension_numbers<[1], [0], [0], [1], [0, 0, 1, 1], [], []>} : vector<4x64xbf16>, vector<64x64xbf16>, vector<4x64xf32> -> vector<4x64xf32>
    %293 = arith.addf %287, %292 : vector<4x64xf32>
    %c7 = arith.constant 7 : index
    %c0_210 = arith.constant 0 : index
    %294 = vector.load %arg3[%c7, %c0_210] : memref<21x64xf32, #tpu.memory_space<vmem>>, vector<1x64xf32>
    %295 = vector.broadcast %294 : vector<1x64xf32> to vector<4x64xf32>
    %296 = arith.addf %293, %295 : vector<4x64xf32>
    %cst_211 = arith.constant 5.000000e-01 : f32
    %297 = vector.broadcast %cst_211 : f32 to vector<4x64xf32>
    %298 = arith.mulf %297, %296 : vector<4x64xf32>
    %cst_212 = arith.constant 4.471500e-02 : f32
    %299 = vector.broadcast %cst_212 : f32 to vector<4x64xf32>
    %300 = arith.mulf %299, %296 : vector<4x64xf32>
    %301 = arith.mulf %300, %296 : vector<4x64xf32>
    %302 = arith.mulf %301, %296 : vector<4x64xf32>
    %303 = arith.addf %296, %302 : vector<4x64xf32>
    %cst_213 = arith.constant 0.797884583 : f32
    %304 = vector.broadcast %cst_213 : f32 to vector<4x64xf32>
    %305 = arith.mulf %304, %303 : vector<4x64xf32>
    %306 = math.tanh %305 : vector<4x64xf32>
    %cst_214 = arith.constant 1.000000e+00 : f32
    %307 = vector.broadcast %cst_214 : f32 to vector<4x64xf32>
    %308 = arith.addf %307, %306 : vector<4x64xf32>
    %309 = arith.mulf %298, %308 : vector<4x64xf32>
    %c1_215 = arith.constant 1 : index
    %c0_216 = arith.constant 0 : index
    %310 = vector.load %arg6[%c1_215, %c0_216] : memref<40x128xf32, #tpu.memory_space<vmem>>, vector<4x64xf32>
    tpu.vector_store %arg6[%c1_215, %c0_216], %309 {strides = array<i32>} : memref<40x128xf32, #tpu.memory_space<vmem>>, vector<4x64xf32>,
    %c1_217 = arith.constant 1 : index
    %c0_218 = arith.constant 0 : index
    %311 = tpu.strided_load %arg6[%c1_217, %c0_218] {strides = array<i32: 2, 1>} : memref<40x128xf32, #tpu.memory_space<vmem>>, vector<2x64xf32>
    %c2_219 = arith.constant 2 : index
    %c0_220 = arith.constant 0 : index
    %312 = tpu.strided_load %arg6[%c2_219, %c0_220] {strides = array<i32: 2, 1>} : memref<40x128xf32, #tpu.memory_space<vmem>>, vector<2x64xf32>
    %313 = arith.maximumf %311, %312 : vector<2x64xf32>
    %cst_221 = arith.constant 0.000000e+00 : f32
    %314 = vector.broadcast %cst_221 : f32 to vector<1x128xf32>
    %c0_222 = arith.constant 0 : index
    %c0_223 = arith.constant 0 : index
    %315 = vector.load %arg6[%c0_222, %c0_223] : memref<40x128xf32, #tpu.memory_space<vmem>>, vector<1x128xf32>
    tpu.vector_store %arg6[%c0_222, %c0_223], %314 {strides = array<i32>} : memref<40x128xf32, #tpu.memory_space<vmem>>, vector<1x128xf32>,
    %c5_224 = arith.constant 5 : index
    %c0_225 = arith.constant 0 : index
    %316 = vector.load %arg6[%c5_224, %c0_225] : memref<40x128xf32, #tpu.memory_space<vmem>>, vector<1x128xf32>
    tpu.vector_store %arg6[%c5_224, %c0_225], %314 {strides = array<i32>} : memref<40x128xf32, #tpu.memory_space<vmem>>, vector<1x128xf32>,
    %317 = arith.truncf %313 : vector<2x64xf32> to vector<2x64xbf16>
    %c8 = arith.constant 8 : index
    %c0_226 = arith.constant 0 : index
    %318 = vector.load %arg3[%c8, %c0_226] : memref<21x64xf32, #tpu.memory_space<vmem>>, vector<1x64xf32>
    %c537 = arith.constant 537 : index
    %c0_227 = arith.constant 0 : index
    %319 = vector.load %arg2[%c537, %c0_227] : memref<1984x64xf32, #tpu.memory_space<vmem>>, vector<64x64xf32>
    %320 = arith.truncf %319 : vector<64x64xf32> to vector<64x64xbf16>
    %cst_228 = arith.constant dense<0.000000e+00> : vector<2x64xf32>
    %321 = tpu.matmul %317, %320, %cst_228 {dimension_numbers = #tpu.dot_dimension_numbers<[1], [0], [0], [1], [0, 0, 1, 1], [], []>} : vector<2x64xbf16>, vector<64x64xbf16>, vector<2x64xf32> -> vector<2x64xf32>
    %322 = vector.broadcast %318 : vector<1x64xf32> to vector<2x64xf32>
    %323 = arith.addf %321, %322 : vector<2x64xf32>
    %c601 = arith.constant 601 : index
    %c0_229 = arith.constant 0 : index
    %324 = vector.load %arg2[%c601, %c0_229] : memref<1984x64xf32, #tpu.memory_space<vmem>>, vector<64x64xf32>
    %325 = arith.truncf %324 : vector<64x64xf32> to vector<64x64xbf16>
    %cst_230 = arith.constant dense<0.000000e+00> : vector<2x64xf32>
    %326 = tpu.matmul %317, %325, %cst_230 {dimension_numbers = #tpu.dot_dimension_numbers<[1], [0], [0], [1], [0, 0, 1, 1], [], []>} : vector<2x64xbf16>, vector<64x64xbf16>, vector<2x64xf32> -> vector<2x64xf32>
    %327 = vector.broadcast %318 : vector<1x64xf32> to vector<2x64xf32>
    %328 = arith.addf %326, %327 : vector<2x64xf32>
    %c1_231 = arith.constant 1 : index
    %c0_232 = arith.constant 0 : index
    %329 = tpu.strided_load %arg6[%c1_231, %c0_232] {strides = array<i32: 2, 1>} : memref<40x128xf32, #tpu.memory_space<vmem>>, vector<2x64xf32>
    tpu.strided_store %arg6[%c1_231, %c0_232], %323 {strides = array<i32: 2, 1>} : memref<40x128xf32, #tpu.memory_space<vmem>>, vector<2x64xf32>
    %c2_233 = arith.constant 2 : index
    %c0_234 = arith.constant 0 : index
    %330 = tpu.strided_load %arg6[%c2_233, %c0_234] {strides = array<i32: 2, 1>} : memref<40x128xf32, #tpu.memory_space<vmem>>, vector<2x64xf32>
    tpu.strided_store %arg6[%c2_233, %c0_234], %328 {strides = array<i32: 2, 1>} : memref<40x128xf32, #tpu.memory_space<vmem>>, vector<2x64xf32>
    %c1_235 = arith.constant 1 : index
    %c64 = arith.constant 64 : index
    %331 = vector.load %arg6[%c1_235, %c64] : memref<40x128xf32, #tpu.memory_space<vmem>>, vector<4x64xf32>
    tpu.vector_store %arg6[%c1_235, %c64], %309 {strides = array<i32>} : memref<40x128xf32, #tpu.memory_space<vmem>>, vector<4x64xf32>,
    %c0_236 = arith.constant 0 : index
    %c0_237 = arith.constant 0 : index
    %332 = vector.load %arg6[%c0_236, %c0_237] : memref<40x128xf32, #tpu.memory_space<vmem>>, vector<4x128xf32>
    %333 = arith.truncf %332 : vector<4x128xf32> to vector<4x128xbf16>
    %c665 = arith.constant 665 : index
    %c0_238 = arith.constant 0 : index
    %334 = vector.load %arg2[%c665, %c0_238] : memref<1984x64xf32, #tpu.memory_space<vmem>>, vector<128x64xf32>
    %335 = arith.truncf %334 : vector<128x64xf32> to vector<128x64xbf16>
    %cst_239 = arith.constant dense<0.000000e+00> : vector<4x64xf32>
    %336 = tpu.matmul %333, %335, %cst_239 {dimension_numbers = #tpu.dot_dimension_numbers<[1], [0], [0], [1], [0, 0, 1, 1], [], []>} : vector<4x128xbf16>, vector<128x64xbf16>, vector<4x64xf32> -> vector<4x64xf32>
    %c1_240 = arith.constant 1 : index
    %c0_241 = arith.constant 0 : index
    %337 = vector.load %arg6[%c1_240, %c0_241] : memref<40x128xf32, #tpu.memory_space<vmem>>, vector<4x128xf32>
    %338 = arith.truncf %337 : vector<4x128xf32> to vector<4x128xbf16>
    %c793 = arith.constant 793 : index
    %c0_242 = arith.constant 0 : index
    %339 = vector.load %arg2[%c793, %c0_242] : memref<1984x64xf32, #tpu.memory_space<vmem>>, vector<128x64xf32>
    %340 = arith.truncf %339 : vector<128x64xf32> to vector<128x64xbf16>
    %cst_243 = arith.constant dense<0.000000e+00> : vector<4x64xf32>
    %341 = tpu.matmul %338, %340, %cst_243 {dimension_numbers = #tpu.dot_dimension_numbers<[1], [0], [0], [1], [0, 0, 1, 1], [], []>} : vector<4x128xbf16>, vector<128x64xbf16>, vector<4x64xf32> -> vector<4x64xf32>
    %342 = arith.addf %336, %341 : vector<4x64xf32>
    %c2_244 = arith.constant 2 : index
    %c0_245 = arith.constant 0 : index
    %343 = vector.load %arg6[%c2_244, %c0_245] : memref<40x128xf32, #tpu.memory_space<vmem>>, vector<4x128xf32>
    %344 = arith.truncf %343 : vector<4x128xf32> to vector<4x128xbf16>
    %c921 = arith.constant 921 : index
    %c0_246 = arith.constant 0 : index
    %345 = vector.load %arg2[%c921, %c0_246] : memref<1984x64xf32, #tpu.memory_space<vmem>>, vector<128x64xf32>
    %346 = arith.truncf %345 : vector<128x64xf32> to vector<128x64xbf16>
    %cst_247 = arith.constant dense<0.000000e+00> : vector<4x64xf32>
    %347 = tpu.matmul %344, %346, %cst_247 {dimension_numbers = #tpu.dot_dimension_numbers<[1], [0], [0], [1], [0, 0, 1, 1], [], []>} : vector<4x128xbf16>, vector<128x64xbf16>, vector<4x64xf32> -> vector<4x64xf32>
    %348 = arith.addf %342, %347 : vector<4x64xf32>
    %c9_248 = arith.constant 9 : index
    %c0_249 = arith.constant 0 : index
    %349 = vector.load %arg3[%c9_248, %c0_249] : memref<21x64xf32, #tpu.memory_space<vmem>>, vector<1x64xf32>
    %350 = vector.broadcast %349 : vector<1x64xf32> to vector<4x64xf32>
    %351 = arith.addf %348, %350 : vector<4x64xf32>
    %cst_250 = arith.constant 5.000000e-01 : f32
    %352 = vector.broadcast %cst_250 : f32 to vector<4x64xf32>
    %353 = arith.mulf %352, %351 : vector<4x64xf32>
    %cst_251 = arith.constant 4.471500e-02 : f32
    %354 = vector.broadcast %cst_251 : f32 to vector<4x64xf32>
    %355 = arith.mulf %354, %351 : vector<4x64xf32>
    %356 = arith.mulf %355, %351 : vector<4x64xf32>
    %357 = arith.mulf %356, %351 : vector<4x64xf32>
    %358 = arith.addf %351, %357 : vector<4x64xf32>
    %cst_252 = arith.constant 0.797884583 : f32
    %359 = vector.broadcast %cst_252 : f32 to vector<4x64xf32>
    %360 = arith.mulf %359, %358 : vector<4x64xf32>
    %361 = math.tanh %360 : vector<4x64xf32>
    %cst_253 = arith.constant 1.000000e+00 : f32
    %362 = vector.broadcast %cst_253 : f32 to vector<4x64xf32>
    %363 = arith.addf %362, %361 : vector<4x64xf32>
    %364 = arith.mulf %353, %363 : vector<4x64xf32>
    %cst_254 = arith.constant 0.000000e+00 : f32
    %365 = vector.broadcast %cst_254 : f32 to vector<1x64xf32>
    %c0_255 = arith.constant 0 : index
    %c0_256 = arith.constant 0 : index
    %366 = vector.load %arg6[%c0_255, %c0_256] : memref<40x128xf32, #tpu.memory_space<vmem>>, vector<1x64xf32>
    tpu.vector_store %arg6[%c0_255, %c0_256], %365 {strides = array<i32>} : memref<40x128xf32, #tpu.memory_space<vmem>>, vector<1x64xf32>,
    %c5_257 = arith.constant 5 : index
    %c0_258 = arith.constant 0 : index
    %367 = vector.load %arg6[%c5_257, %c0_258] : memref<40x128xf32, #tpu.memory_space<vmem>>, vector<1x64xf32>
    tpu.vector_store %arg6[%c5_257, %c0_258], %365 {strides = array<i32>} : memref<40x128xf32, #tpu.memory_space<vmem>>, vector<1x64xf32>,
    %c1_259 = arith.constant 1 : index
    %c0_260 = arith.constant 0 : index
    %368 = vector.load %arg6[%c1_259, %c0_260] : memref<40x128xf32, #tpu.memory_space<vmem>>, vector<4x64xf32>
    tpu.vector_store %arg6[%c1_259, %c0_260], %364 {strides = array<i32>} : memref<40x128xf32, #tpu.memory_space<vmem>>, vector<4x64xf32>,
    %c0_261 = arith.constant 0 : index
    %c0_262 = arith.constant 0 : index
    %369 = vector.load %arg6[%c0_261, %c0_262] : memref<40x128xf32, #tpu.memory_space<vmem>>, vector<4x64xf32>
    %370 = arith.truncf %369 : vector<4x64xf32> to vector<4x64xbf16>
    %c1049 = arith.constant 1049 : index
    %c0_263 = arith.constant 0 : index
    %371 = vector.load %arg2[%c1049, %c0_263] : memref<1984x64xf32, #tpu.memory_space<vmem>>, vector<64x64xf32>
    %372 = arith.truncf %371 : vector<64x64xf32> to vector<64x64xbf16>
    %cst_264 = arith.constant dense<0.000000e+00> : vector<4x64xf32>
    %373 = tpu.matmul %370, %372, %cst_264 {dimension_numbers = #tpu.dot_dimension_numbers<[1], [0], [0], [1], [0, 0, 1, 1], [], []>} : vector<4x64xbf16>, vector<64x64xbf16>, vector<4x64xf32> -> vector<4x64xf32>
    %c1_265 = arith.constant 1 : index
    %c0_266 = arith.constant 0 : index
    %374 = vector.load %arg6[%c1_265, %c0_266] : memref<40x128xf32, #tpu.memory_space<vmem>>, vector<4x64xf32>
    %375 = arith.truncf %374 : vector<4x64xf32> to vector<4x64xbf16>
    %c1113 = arith.constant 1113 : index
    %c0_267 = arith.constant 0 : index
    %376 = vector.load %arg2[%c1113, %c0_267] : memref<1984x64xf32, #tpu.memory_space<vmem>>, vector<64x64xf32>
    %377 = arith.truncf %376 : vector<64x64xf32> to vector<64x64xbf16>
    %cst_268 = arith.constant dense<0.000000e+00> : vector<4x64xf32>
    %378 = tpu.matmul %375, %377, %cst_268 {dimension_numbers = #tpu.dot_dimension_numbers<[1], [0], [0], [1], [0, 0, 1, 1], [], []>} : vector<4x64xbf16>, vector<64x64xbf16>, vector<4x64xf32> -> vector<4x64xf32>
    %379 = arith.addf %373, %378 : vector<4x64xf32>
    %c2_269 = arith.constant 2 : index
    %c0_270 = arith.constant 0 : index
    %380 = vector.load %arg6[%c2_269, %c0_270] : memref<40x128xf32, #tpu.memory_space<vmem>>, vector<4x64xf32>
    %381 = arith.truncf %380 : vector<4x64xf32> to vector<4x64xbf16>
    %c1177 = arith.constant 1177 : index
    %c0_271 = arith.constant 0 : index
    %382 = vector.load %arg2[%c1177, %c0_271] : memref<1984x64xf32, #tpu.memory_space<vmem>>, vector<64x64xf32>
    %383 = arith.truncf %382 : vector<64x64xf32> to vector<64x64xbf16>
    %cst_272 = arith.constant dense<0.000000e+00> : vector<4x64xf32>
    %384 = tpu.matmul %381, %383, %cst_272 {dimension_numbers = #tpu.dot_dimension_numbers<[1], [0], [0], [1], [0, 0, 1, 1], [], []>} : vector<4x64xbf16>, vector<64x64xbf16>, vector<4x64xf32> -> vector<4x64xf32>
    %385 = arith.addf %379, %384 : vector<4x64xf32>
    %c10 = arith.constant 10 : index
    %c0_273 = arith.constant 0 : index
    %386 = vector.load %arg3[%c10, %c0_273] : memref<21x64xf32, #tpu.memory_space<vmem>>, vector<1x64xf32>
    %387 = vector.broadcast %386 : vector<1x64xf32> to vector<4x64xf32>
    %388 = arith.addf %385, %387 : vector<4x64xf32>
    %cst_274 = arith.constant 5.000000e-01 : f32
    %389 = vector.broadcast %cst_274 : f32 to vector<4x64xf32>
    %390 = arith.mulf %389, %388 : vector<4x64xf32>
    %cst_275 = arith.constant 4.471500e-02 : f32
    %391 = vector.broadcast %cst_275 : f32 to vector<4x64xf32>
    %392 = arith.mulf %391, %388 : vector<4x64xf32>
    %393 = arith.mulf %392, %388 : vector<4x64xf32>
    %394 = arith.mulf %393, %388 : vector<4x64xf32>
    %395 = arith.addf %388, %394 : vector<4x64xf32>
    %cst_276 = arith.constant 0.797884583 : f32
    %396 = vector.broadcast %cst_276 : f32 to vector<4x64xf32>
    %397 = arith.mulf %396, %395 : vector<4x64xf32>
    %398 = math.tanh %397 : vector<4x64xf32>
    %cst_277 = arith.constant 1.000000e+00 : f32
    %399 = vector.broadcast %cst_277 : f32 to vector<4x64xf32>
    %400 = arith.addf %399, %398 : vector<4x64xf32>
    %401 = arith.mulf %390, %400 : vector<4x64xf32>
    %cst_278 = arith.constant 0.000000e+00 : f32
    %402 = vector.broadcast %cst_278 : f32 to vector<1x64xf32>
    %c0_279 = arith.constant 0 : index
    %c0_280 = arith.constant 0 : index
    %403 = vector.load %arg6[%c0_279, %c0_280] : memref<40x128xf32, #tpu.memory_space<vmem>>, vector<1x64xf32>
    tpu.vector_store %arg6[%c0_279, %c0_280], %402 {strides = array<i32>} : memref<40x128xf32, #tpu.memory_space<vmem>>, vector<1x64xf32>,
    %c9_281 = arith.constant 9 : index
    %c0_282 = arith.constant 0 : index
    %404 = vector.load %arg6[%c9_281, %c0_282] : memref<40x128xf32, #tpu.memory_space<vmem>>, vector<1x64xf32>
    tpu.vector_store %arg6[%c9_281, %c0_282], %402 {strides = array<i32>} : memref<40x128xf32, #tpu.memory_space<vmem>>, vector<1x64xf32>,
    %405 = arith.truncf %401 : vector<4x64xf32> to vector<4x64xbf16>
    %c11 = arith.constant 11 : index
    %c0_283 = arith.constant 0 : index
    %406 = vector.load %arg3[%c11, %c0_283] : memref<21x64xf32, #tpu.memory_space<vmem>>, vector<1x32xf32>
    %c1241 = arith.constant 1241 : index
    %c0_284 = arith.constant 0 : index
    %407 = vector.load %arg2[%c1241, %c0_284] : memref<1984x64xf32, #tpu.memory_space<vmem>>, vector<64x32xf32>
    %408 = arith.truncf %407 : vector<64x32xf32> to vector<64x32xbf16>
    %cst_285 = arith.constant dense<0.000000e+00> : vector<4x32xf32>
    %409 = tpu.matmul %405, %408, %cst_285 {dimension_numbers = #tpu.dot_dimension_numbers<[1], [0], [0], [1], [0, 0, 1, 1], [], []>} : vector<4x64xbf16>, vector<64x32xbf16>, vector<4x32xf32> -> vector<4x32xf32>
    %410 = vector.broadcast %406 : vector<1x32xf32> to vector<4x32xf32>
    %411 = arith.addf %409, %410 : vector<4x32xf32>
    %c1305 = arith.constant 1305 : index
    %c0_286 = arith.constant 0 : index
    %412 = vector.load %arg2[%c1305, %c0_286] : memref<1984x64xf32, #tpu.memory_space<vmem>>, vector<64x32xf32>
    %413 = arith.truncf %412 : vector<64x32xf32> to vector<64x32xbf16>
    %cst_287 = arith.constant dense<0.000000e+00> : vector<4x32xf32>
    %414 = tpu.matmul %405, %413, %cst_287 {dimension_numbers = #tpu.dot_dimension_numbers<[1], [0], [0], [1], [0, 0, 1, 1], [], []>} : vector<4x64xbf16>, vector<64x32xbf16>, vector<4x32xf32> -> vector<4x32xf32>
    %415 = vector.broadcast %406 : vector<1x32xf32> to vector<4x32xf32>
    %416 = arith.addf %414, %415 : vector<4x32xf32>
    %c1_288 = arith.constant 1 : index
    %c0_289 = arith.constant 0 : index
    %417 = tpu.strided_load %arg6[%c1_288, %c0_289] {strides = array<i32: 2, 1>} : memref<40x128xf32, #tpu.memory_space<vmem>>, vector<4x32xf32>
    tpu.strided_store %arg6[%c1_288, %c0_289], %411 {strides = array<i32: 2, 1>} : memref<40x128xf32, #tpu.memory_space<vmem>>, vector<4x32xf32>
    %c2_290 = arith.constant 2 : index
    %c0_291 = arith.constant 0 : index
    %418 = tpu.strided_load %arg6[%c2_290, %c0_291] {strides = array<i32: 2, 1>} : memref<40x128xf32, #tpu.memory_space<vmem>>, vector<4x32xf32>
    tpu.strided_store %arg6[%c2_290, %c0_291], %416 {strides = array<i32: 2, 1>} : memref<40x128xf32, #tpu.memory_space<vmem>>, vector<4x32xf32>
    %c1_292 = arith.constant 1 : index
    %c32 = arith.constant 32 : index
    %419 = vector.load %arg6[%c1_292, %c32] : memref<40x128xf32, #tpu.memory_space<vmem>>, vector<8x32xf32>
    tpu.vector_store %arg6[%c1_292, %c32], %231 {strides = array<i32>} : memref<40x128xf32, #tpu.memory_space<vmem>>, vector<8x32xf32>,
    %c0_293 = arith.constant 0 : index
    %c0_294 = arith.constant 0 : index
    %420 = vector.load %arg6[%c0_293, %c0_294] : memref<40x128xf32, #tpu.memory_space<vmem>>, vector<8x64xf32>
    %421 = arith.truncf %420 : vector<8x64xf32> to vector<8x64xbf16>
    %c1369 = arith.constant 1369 : index
    %c0_295 = arith.constant 0 : index
    %422 = vector.load %arg2[%c1369, %c0_295] : memref<1984x64xf32, #tpu.memory_space<vmem>>, vector<64x32xf32>
    %423 = arith.truncf %422 : vector<64x32xf32> to vector<64x32xbf16>
    %cst_296 = arith.constant dense<0.000000e+00> : vector<8x32xf32>
    %424 = tpu.matmul %421, %423, %cst_296 {dimension_numbers = #tpu.dot_dimension_numbers<[1], [0], [0], [1], [0, 0, 1, 1], [], []>} : vector<8x64xbf16>, vector<64x32xbf16>, vector<8x32xf32> -> vector<8x32xf32>
    %c1_297 = arith.constant 1 : index
    %c0_298 = arith.constant 0 : index
    %425 = vector.load %arg6[%c1_297, %c0_298] : memref<40x128xf32, #tpu.memory_space<vmem>>, vector<8x64xf32>
    %426 = arith.truncf %425 : vector<8x64xf32> to vector<8x64xbf16>
    %c1433 = arith.constant 1433 : index
    %c0_299 = arith.constant 0 : index
    %427 = vector.load %arg2[%c1433, %c0_299] : memref<1984x64xf32, #tpu.memory_space<vmem>>, vector<64x32xf32>
    %428 = arith.truncf %427 : vector<64x32xf32> to vector<64x32xbf16>
    %cst_300 = arith.constant dense<0.000000e+00> : vector<8x32xf32>
    %429 = tpu.matmul %426, %428, %cst_300 {dimension_numbers = #tpu.dot_dimension_numbers<[1], [0], [0], [1], [0, 0, 1, 1], [], []>} : vector<8x64xbf16>, vector<64x32xbf16>, vector<8x32xf32> -> vector<8x32xf32>
    %430 = arith.addf %424, %429 : vector<8x32xf32>
    %c2_301 = arith.constant 2 : index
    %c0_302 = arith.constant 0 : index
    %431 = vector.load %arg6[%c2_301, %c0_302] : memref<40x128xf32, #tpu.memory_space<vmem>>, vector<8x64xf32>
    %432 = arith.truncf %431 : vector<8x64xf32> to vector<8x64xbf16>
    %c1497 = arith.constant 1497 : index
    %c0_303 = arith.constant 0 : index
    %433 = vector.load %arg2[%c1497, %c0_303] : memref<1984x64xf32, #tpu.memory_space<vmem>>, vector<64x32xf32>
    %434 = arith.truncf %433 : vector<64x32xf32> to vector<64x32xbf16>
    %cst_304 = arith.constant dense<0.000000e+00> : vector<8x32xf32>
    %435 = tpu.matmul %432, %434, %cst_304 {dimension_numbers = #tpu.dot_dimension_numbers<[1], [0], [0], [1], [0, 0, 1, 1], [], []>} : vector<8x64xbf16>, vector<64x32xbf16>, vector<8x32xf32> -> vector<8x32xf32>
    %436 = arith.addf %430, %435 : vector<8x32xf32>
    %c12 = arith.constant 12 : index
    %c0_305 = arith.constant 0 : index
    %437 = vector.load %arg3[%c12, %c0_305] : memref<21x64xf32, #tpu.memory_space<vmem>>, vector<1x32xf32>
    %438 = vector.broadcast %437 : vector<1x32xf32> to vector<8x32xf32>
    %439 = arith.addf %436, %438 : vector<8x32xf32>
    %cst_306 = arith.constant 5.000000e-01 : f32
    %440 = vector.broadcast %cst_306 : f32 to vector<8x32xf32>
    %441 = arith.mulf %440, %439 : vector<8x32xf32>
    %cst_307 = arith.constant 4.471500e-02 : f32
    %442 = vector.broadcast %cst_307 : f32 to vector<8x32xf32>
    %443 = arith.mulf %442, %439 : vector<8x32xf32>
    %444 = arith.mulf %443, %439 : vector<8x32xf32>
    %445 = arith.mulf %444, %439 : vector<8x32xf32>
    %446 = arith.addf %439, %445 : vector<8x32xf32>
    %cst_308 = arith.constant 0.797884583 : f32
    %447 = vector.broadcast %cst_308 : f32 to vector<8x32xf32>
    %448 = arith.mulf %447, %446 : vector<8x32xf32>
    %449 = math.tanh %448 : vector<8x32xf32>
    %cst_309 = arith.constant 1.000000e+00 : f32
    %450 = vector.broadcast %cst_309 : f32 to vector<8x32xf32>
    %451 = arith.addf %450, %449 : vector<8x32xf32>
    %452 = arith.mulf %441, %451 : vector<8x32xf32>
    %cst_310 = arith.constant 0.000000e+00 : f32
    %453 = vector.broadcast %cst_310 : f32 to vector<1x32xf32>
    %c0_311 = arith.constant 0 : index
    %c0_312 = arith.constant 0 : index
    %454 = vector.load %arg6[%c0_311, %c0_312] : memref<40x128xf32, #tpu.memory_space<vmem>>, vector<1x32xf32>
    tpu.vector_store %arg6[%c0_311, %c0_312], %453 {strides = array<i32>} : memref<40x128xf32, #tpu.memory_space<vmem>>, vector<1x32xf32>,
    %c9_313 = arith.constant 9 : index
    %c0_314 = arith.constant 0 : index
    %455 = vector.load %arg6[%c9_313, %c0_314] : memref<40x128xf32, #tpu.memory_space<vmem>>, vector<1x32xf32>
    tpu.vector_store %arg6[%c9_313, %c0_314], %453 {strides = array<i32>} : memref<40x128xf32, #tpu.memory_space<vmem>>, vector<1x32xf32>,
    %c1_315 = arith.constant 1 : index
    %c0_316 = arith.constant 0 : index
    %456 = vector.load %arg6[%c1_315, %c0_316] : memref<40x128xf32, #tpu.memory_space<vmem>>, vector<8x32xf32>
    tpu.vector_store %arg6[%c1_315, %c0_316], %452 {strides = array<i32>} : memref<40x128xf32, #tpu.memory_space<vmem>>, vector<8x32xf32>,
    %c0_317 = arith.constant 0 : index
    %c0_318 = arith.constant 0 : index
    %457 = vector.load %arg6[%c0_317, %c0_318] : memref<40x128xf32, #tpu.memory_space<vmem>>, vector<8x32xf32>
    %458 = arith.truncf %457 : vector<8x32xf32> to vector<8x32xbf16>
    %c1561 = arith.constant 1561 : index
    %c0_319 = arith.constant 0 : index
    %459 = vector.load %arg2[%c1561, %c0_319] : memref<1984x64xf32, #tpu.memory_space<vmem>>, vector<32x32xf32>
    %460 = arith.truncf %459 : vector<32x32xf32> to vector<32x32xbf16>
    %cst_320 = arith.constant dense<0.000000e+00> : vector<8x32xf32>
    %461 = tpu.matmul %458, %460, %cst_320 {dimension_numbers = #tpu.dot_dimension_numbers<[1], [0], [0], [1], [0, 0, 1, 1], [], []>} : vector<8x32xbf16>, vector<32x32xbf16>, vector<8x32xf32> -> vector<8x32xf32>
    %c1_321 = arith.constant 1 : index
    %c0_322 = arith.constant 0 : index
    %462 = vector.load %arg6[%c1_321, %c0_322] : memref<40x128xf32, #tpu.memory_space<vmem>>, vector<8x32xf32>
    %463 = arith.truncf %462 : vector<8x32xf32> to vector<8x32xbf16>
    %c1593 = arith.constant 1593 : index
    %c0_323 = arith.constant 0 : index
    %464 = vector.load %arg2[%c1593, %c0_323] : memref<1984x64xf32, #tpu.memory_space<vmem>>, vector<32x32xf32>
    %465 = arith.truncf %464 : vector<32x32xf32> to vector<32x32xbf16>
    %cst_324 = arith.constant dense<0.000000e+00> : vector<8x32xf32>
    %466 = tpu.matmul %463, %465, %cst_324 {dimension_numbers = #tpu.dot_dimension_numbers<[1], [0], [0], [1], [0, 0, 1, 1], [], []>} : vector<8x32xbf16>, vector<32x32xbf16>, vector<8x32xf32> -> vector<8x32xf32>
    %467 = arith.addf %461, %466 : vector<8x32xf32>
    %c2_325 = arith.constant 2 : index
    %c0_326 = arith.constant 0 : index
    %468 = vector.load %arg6[%c2_325, %c0_326] : memref<40x128xf32, #tpu.memory_space<vmem>>, vector<8x32xf32>
    %469 = arith.truncf %468 : vector<8x32xf32> to vector<8x32xbf16>
    %c1625 = arith.constant 1625 : index
    %c0_327 = arith.constant 0 : index
    %470 = vector.load %arg2[%c1625, %c0_327] : memref<1984x64xf32, #tpu.memory_space<vmem>>, vector<32x32xf32>
    %471 = arith.truncf %470 : vector<32x32xf32> to vector<32x32xbf16>
    %cst_328 = arith.constant dense<0.000000e+00> : vector<8x32xf32>
    %472 = tpu.matmul %469, %471, %cst_328 {dimension_numbers = #tpu.dot_dimension_numbers<[1], [0], [0], [1], [0, 0, 1, 1], [], []>} : vector<8x32xbf16>, vector<32x32xbf16>, vector<8x32xf32> -> vector<8x32xf32>
    %473 = arith.addf %467, %472 : vector<8x32xf32>
    %c13 = arith.constant 13 : index
    %c0_329 = arith.constant 0 : index
    %474 = vector.load %arg3[%c13, %c0_329] : memref<21x64xf32, #tpu.memory_space<vmem>>, vector<1x32xf32>
    %475 = vector.broadcast %474 : vector<1x32xf32> to vector<8x32xf32>
    %476 = arith.addf %473, %475 : vector<8x32xf32>
    %cst_330 = arith.constant 5.000000e-01 : f32
    %477 = vector.broadcast %cst_330 : f32 to vector<8x32xf32>
    %478 = arith.mulf %477, %476 : vector<8x32xf32>
    %cst_331 = arith.constant 4.471500e-02 : f32
    %479 = vector.broadcast %cst_331 : f32 to vector<8x32xf32>
    %480 = arith.mulf %479, %476 : vector<8x32xf32>
    %481 = arith.mulf %480, %476 : vector<8x32xf32>
    %482 = arith.mulf %481, %476 : vector<8x32xf32>
    %483 = arith.addf %476, %482 : vector<8x32xf32>
    %cst_332 = arith.constant 0.797884583 : f32
    %484 = vector.broadcast %cst_332 : f32 to vector<8x32xf32>
    %485 = arith.mulf %484, %483 : vector<8x32xf32>
    %486 = math.tanh %485 : vector<8x32xf32>
    %cst_333 = arith.constant 1.000000e+00 : f32
    %487 = vector.broadcast %cst_333 : f32 to vector<8x32xf32>
    %488 = arith.addf %487, %486 : vector<8x32xf32>
    %489 = arith.mulf %478, %488 : vector<8x32xf32>
    %cst_334 = arith.constant 0.000000e+00 : f32
    %490 = vector.broadcast %cst_334 : f32 to vector<1x32xf32>
    %c0_335 = arith.constant 0 : index
    %c0_336 = arith.constant 0 : index
    %491 = vector.load %arg6[%c0_335, %c0_336] : memref<40x128xf32, #tpu.memory_space<vmem>>, vector<1x32xf32>
    tpu.vector_store %arg6[%c0_335, %c0_336], %490 {strides = array<i32>} : memref<40x128xf32, #tpu.memory_space<vmem>>, vector<1x32xf32>,
    %c17_337 = arith.constant 17 : index
    %c0_338 = arith.constant 0 : index
    %492 = vector.load %arg6[%c17_337, %c0_338] : memref<40x128xf32, #tpu.memory_space<vmem>>, vector<1x32xf32>
    tpu.vector_store %arg6[%c17_337, %c0_338], %490 {strides = array<i32>} : memref<40x128xf32, #tpu.memory_space<vmem>>, vector<1x32xf32>,
    %493 = arith.truncf %489 : vector<8x32xf32> to vector<8x32xbf16>
    %c14 = arith.constant 14 : index
    %c0_339 = arith.constant 0 : index
    %494 = vector.load %arg3[%c14, %c0_339] : memref<21x64xf32, #tpu.memory_space<vmem>>, vector<1x16xf32>
    %c1657 = arith.constant 1657 : index
    %c0_340 = arith.constant 0 : index
    %495 = vector.load %arg2[%c1657, %c0_340] : memref<1984x64xf32, #tpu.memory_space<vmem>>, vector<32x16xf32>
    %496 = arith.truncf %495 : vector<32x16xf32> to vector<32x16xbf16>
    %cst_341 = arith.constant dense<0.000000e+00> : vector<8x16xf32>
    %497 = tpu.matmul %493, %496, %cst_341 {dimension_numbers = #tpu.dot_dimension_numbers<[1], [0], [0], [1], [0, 0, 1, 1], [], []>} : vector<8x32xbf16>, vector<32x16xbf16>, vector<8x16xf32> -> vector<8x16xf32>
    %498 = vector.broadcast %494 : vector<1x16xf32> to vector<8x16xf32>
    %499 = arith.addf %497, %498 : vector<8x16xf32>
    %c1689 = arith.constant 1689 : index
    %c0_342 = arith.constant 0 : index
    %500 = vector.load %arg2[%c1689, %c0_342] : memref<1984x64xf32, #tpu.memory_space<vmem>>, vector<32x16xf32>
    %501 = arith.truncf %500 : vector<32x16xf32> to vector<32x16xbf16>
    %cst_343 = arith.constant dense<0.000000e+00> : vector<8x16xf32>
    %502 = tpu.matmul %493, %501, %cst_343 {dimension_numbers = #tpu.dot_dimension_numbers<[1], [0], [0], [1], [0, 0, 1, 1], [], []>} : vector<8x32xbf16>, vector<32x16xbf16>, vector<8x16xf32> -> vector<8x16xf32>
    %503 = vector.broadcast %494 : vector<1x16xf32> to vector<8x16xf32>
    %504 = arith.addf %502, %503 : vector<8x16xf32>
    %c1_344 = arith.constant 1 : index
    %c0_345 = arith.constant 0 : index
    %505 = tpu.strided_load %arg6[%c1_344, %c0_345] {strides = array<i32: 2, 1>} : memref<40x128xf32, #tpu.memory_space<vmem>>, vector<8x16xf32>
    tpu.strided_store %arg6[%c1_344, %c0_345], %499 {strides = array<i32: 2, 1>} : memref<40x128xf32, #tpu.memory_space<vmem>>, vector<8x16xf32>
    %c2_346 = arith.constant 2 : index
    %c0_347 = arith.constant 0 : index
    %506 = tpu.strided_load %arg6[%c2_346, %c0_347] {strides = array<i32: 2, 1>} : memref<40x128xf32, #tpu.memory_space<vmem>>, vector<8x16xf32>
    tpu.strided_store %arg6[%c2_346, %c0_347], %504 {strides = array<i32: 2, 1>} : memref<40x128xf32, #tpu.memory_space<vmem>>, vector<8x16xf32>
    %c1_348 = arith.constant 1 : index
    %c16 = arith.constant 16 : index
    %507 = vector.load %arg6[%c1_348, %c16] : memref<40x128xf32, #tpu.memory_space<vmem>>, vector<16x16xf32>
    tpu.vector_store %arg6[%c1_348, %c16], %153 {strides = array<i32>} : memref<40x128xf32, #tpu.memory_space<vmem>>, vector<16x16xf32>,
    %c0_349 = arith.constant 0 : index
    %c0_350 = arith.constant 0 : index
    %508 = vector.load %arg6[%c0_349, %c0_350] : memref<40x128xf32, #tpu.memory_space<vmem>>, vector<16x32xf32>
    %509 = arith.truncf %508 : vector<16x32xf32> to vector<16x32xbf16>
    %c1721 = arith.constant 1721 : index
    %c0_351 = arith.constant 0 : index
    %510 = vector.load %arg2[%c1721, %c0_351] : memref<1984x64xf32, #tpu.memory_space<vmem>>, vector<32x16xf32>
    %511 = arith.truncf %510 : vector<32x16xf32> to vector<32x16xbf16>
    %cst_352 = arith.constant dense<0.000000e+00> : vector<16x16xf32>
    %512 = tpu.matmul %509, %511, %cst_352 {dimension_numbers = #tpu.dot_dimension_numbers<[1], [0], [0], [1], [0, 0, 1, 1], [], []>} : vector<16x32xbf16>, vector<32x16xbf16>, vector<16x16xf32> -> vector<16x16xf32>
    %c1_353 = arith.constant 1 : index
    %c0_354 = arith.constant 0 : index
    %513 = vector.load %arg6[%c1_353, %c0_354] : memref<40x128xf32, #tpu.memory_space<vmem>>, vector<16x32xf32>
    %514 = arith.truncf %513 : vector<16x32xf32> to vector<16x32xbf16>
    %c1753 = arith.constant 1753 : index
    %c0_355 = arith.constant 0 : index
    %515 = vector.load %arg2[%c1753, %c0_355] : memref<1984x64xf32, #tpu.memory_space<vmem>>, vector<32x16xf32>
    %516 = arith.truncf %515 : vector<32x16xf32> to vector<32x16xbf16>
    %cst_356 = arith.constant dense<0.000000e+00> : vector<16x16xf32>
    %517 = tpu.matmul %514, %516, %cst_356 {dimension_numbers = #tpu.dot_dimension_numbers<[1], [0], [0], [1], [0, 0, 1, 1], [], []>} : vector<16x32xbf16>, vector<32x16xbf16>, vector<16x16xf32> -> vector<16x16xf32>
    %518 = arith.addf %512, %517 : vector<16x16xf32>
    %c2_357 = arith.constant 2 : index
    %c0_358 = arith.constant 0 : index
    %519 = vector.load %arg6[%c2_357, %c0_358] : memref<40x128xf32, #tpu.memory_space<vmem>>, vector<16x32xf32>
    %520 = arith.truncf %519 : vector<16x32xf32> to vector<16x32xbf16>
    %c1785 = arith.constant 1785 : index
    %c0_359 = arith.constant 0 : index
    %521 = vector.load %arg2[%c1785, %c0_359] : memref<1984x64xf32, #tpu.memory_space<vmem>>, vector<32x16xf32>
    %522 = arith.truncf %521 : vector<32x16xf32> to vector<32x16xbf16>
    %cst_360 = arith.constant dense<0.000000e+00> : vector<16x16xf32>
    %523 = tpu.matmul %520, %522, %cst_360 {dimension_numbers = #tpu.dot_dimension_numbers<[1], [0], [0], [1], [0, 0, 1, 1], [], []>} : vector<16x32xbf16>, vector<32x16xbf16>, vector<16x16xf32> -> vector<16x16xf32>
    %524 = arith.addf %518, %523 : vector<16x16xf32>
    %c15 = arith.constant 15 : index
    %c0_361 = arith.constant 0 : index
    %525 = vector.load %arg3[%c15, %c0_361] : memref<21x64xf32, #tpu.memory_space<vmem>>, vector<1x16xf32>
    %526 = vector.broadcast %525 : vector<1x16xf32> to vector<16x16xf32>
    %527 = arith.addf %524, %526 : vector<16x16xf32>
    %cst_362 = arith.constant 5.000000e-01 : f32
    %528 = vector.broadcast %cst_362 : f32 to vector<16x16xf32>
    %529 = arith.mulf %528, %527 : vector<16x16xf32>
    %cst_363 = arith.constant 4.471500e-02 : f32
    %530 = vector.broadcast %cst_363 : f32 to vector<16x16xf32>
    %531 = arith.mulf %530, %527 : vector<16x16xf32>
    %532 = arith.mulf %531, %527 : vector<16x16xf32>
    %533 = arith.mulf %532, %527 : vector<16x16xf32>
    %534 = arith.addf %527, %533 : vector<16x16xf32>
    %cst_364 = arith.constant 0.797884583 : f32
    %535 = vector.broadcast %cst_364 : f32 to vector<16x16xf32>
    %536 = arith.mulf %535, %534 : vector<16x16xf32>
    %537 = math.tanh %536 : vector<16x16xf32>
    %cst_365 = arith.constant 1.000000e+00 : f32
    %538 = vector.broadcast %cst_365 : f32 to vector<16x16xf32>
    %539 = arith.addf %538, %537 : vector<16x16xf32>
    %540 = arith.mulf %529, %539 : vector<16x16xf32>
    %cst_366 = arith.constant 0.000000e+00 : f32
    %541 = vector.broadcast %cst_366 : f32 to vector<1x16xf32>
    %c0_367 = arith.constant 0 : index
    %c0_368 = arith.constant 0 : index
    %542 = vector.load %arg6[%c0_367, %c0_368] : memref<40x128xf32, #tpu.memory_space<vmem>>, vector<1x16xf32>
    tpu.vector_store %arg6[%c0_367, %c0_368], %541 {strides = array<i32>} : memref<40x128xf32, #tpu.memory_space<vmem>>, vector<1x16xf32>,
    %c17_369 = arith.constant 17 : index
    %c0_370 = arith.constant 0 : index
    %543 = vector.load %arg6[%c17_369, %c0_370] : memref<40x128xf32, #tpu.memory_space<vmem>>, vector<1x16xf32>
    tpu.vector_store %arg6[%c17_369, %c0_370], %541 {strides = array<i32>} : memref<40x128xf32, #tpu.memory_space<vmem>>, vector<1x16xf32>,
    %c1_371 = arith.constant 1 : index
    %c0_372 = arith.constant 0 : index
    %544 = vector.load %arg6[%c1_371, %c0_372] : memref<40x128xf32, #tpu.memory_space<vmem>>, vector<16x16xf32>
    tpu.vector_store %arg6[%c1_371, %c0_372], %540 {strides = array<i32>} : memref<40x128xf32, #tpu.memory_space<vmem>>, vector<16x16xf32>,
    %c0_373 = arith.constant 0 : index
    %c0_374 = arith.constant 0 : index
    %545 = vector.load %arg6[%c0_373, %c0_374] : memref<40x128xf32, #tpu.memory_space<vmem>>, vector<16x16xf32>
    %546 = arith.truncf %545 : vector<16x16xf32> to vector<16x16xbf16>
    %c1817 = arith.constant 1817 : index
    %c0_375 = arith.constant 0 : index
    %547 = vector.load %arg2[%c1817, %c0_375] : memref<1984x64xf32, #tpu.memory_space<vmem>>, vector<16x16xf32>
    %548 = arith.truncf %547 : vector<16x16xf32> to vector<16x16xbf16>
    %cst_376 = arith.constant dense<0.000000e+00> : vector<16x16xf32>
    %549 = tpu.matmul %546, %548, %cst_376 {dimension_numbers = #tpu.dot_dimension_numbers<[1], [0], [0], [1], [0, 0, 1, 1], [], []>} : vector<16x16xbf16>, vector<16x16xbf16>, vector<16x16xf32> -> vector<16x16xf32>
    %c1_377 = arith.constant 1 : index
    %c0_378 = arith.constant 0 : index
    %550 = vector.load %arg6[%c1_377, %c0_378] : memref<40x128xf32, #tpu.memory_space<vmem>>, vector<16x16xf32>
    %551 = arith.truncf %550 : vector<16x16xf32> to vector<16x16xbf16>
    %c1833 = arith.constant 1833 : index
    %c0_379 = arith.constant 0 : index
    %552 = vector.load %arg2[%c1833, %c0_379] : memref<1984x64xf32, #tpu.memory_space<vmem>>, vector<16x16xf32>
    %553 = arith.truncf %552 : vector<16x16xf32> to vector<16x16xbf16>
    %cst_380 = arith.constant dense<0.000000e+00> : vector<16x16xf32>
    %554 = tpu.matmul %551, %553, %cst_380 {dimension_numbers = #tpu.dot_dimension_numbers<[1], [0], [0], [1], [0, 0, 1, 1], [], []>} : vector<16x16xbf16>, vector<16x16xbf16>, vector<16x16xf32> -> vector<16x16xf32>
    %555 = arith.addf %549, %554 : vector<16x16xf32>
    %c2_381 = arith.constant 2 : index
    %c0_382 = arith.constant 0 : index
    %556 = vector.load %arg6[%c2_381, %c0_382] : memref<40x128xf32, #tpu.memory_space<vmem>>, vector<16x16xf32>
    %557 = arith.truncf %556 : vector<16x16xf32> to vector<16x16xbf16>
    %c1849 = arith.constant 1849 : index
    %c0_383 = arith.constant 0 : index
    %558 = vector.load %arg2[%c1849, %c0_383] : memref<1984x64xf32, #tpu.memory_space<vmem>>, vector<16x16xf32>
    %559 = arith.truncf %558 : vector<16x16xf32> to vector<16x16xbf16>
    %cst_384 = arith.constant dense<0.000000e+00> : vector<16x16xf32>
    %560 = tpu.matmul %557, %559, %cst_384 {dimension_numbers = #tpu.dot_dimension_numbers<[1], [0], [0], [1], [0, 0, 1, 1], [], []>} : vector<16x16xbf16>, vector<16x16xbf16>, vector<16x16xf32> -> vector<16x16xf32>
    %561 = arith.addf %555, %560 : vector<16x16xf32>
    %c16_385 = arith.constant 16 : index
    %c0_386 = arith.constant 0 : index
    %562 = vector.load %arg3[%c16_385, %c0_386] : memref<21x64xf32, #tpu.memory_space<vmem>>, vector<1x16xf32>
    %563 = vector.broadcast %562 : vector<1x16xf32> to vector<16x16xf32>
    %564 = arith.addf %561, %563 : vector<16x16xf32>
    %cst_387 = arith.constant 5.000000e-01 : f32
    %565 = vector.broadcast %cst_387 : f32 to vector<16x16xf32>
    %566 = arith.mulf %565, %564 : vector<16x16xf32>
    %cst_388 = arith.constant 4.471500e-02 : f32
    %567 = vector.broadcast %cst_388 : f32 to vector<16x16xf32>
    %568 = arith.mulf %567, %564 : vector<16x16xf32>
    %569 = arith.mulf %568, %564 : vector<16x16xf32>
    %570 = arith.mulf %569, %564 : vector<16x16xf32>
    %571 = arith.addf %564, %570 : vector<16x16xf32>
    %cst_389 = arith.constant 0.797884583 : f32
    %572 = vector.broadcast %cst_389 : f32 to vector<16x16xf32>
    %573 = arith.mulf %572, %571 : vector<16x16xf32>
    %574 = math.tanh %573 : vector<16x16xf32>
    %cst_390 = arith.constant 1.000000e+00 : f32
    %575 = vector.broadcast %cst_390 : f32 to vector<16x16xf32>
    %576 = arith.addf %575, %574 : vector<16x16xf32>
    %577 = arith.mulf %566, %576 : vector<16x16xf32>
    %cst_391 = arith.constant 0.000000e+00 : f32
    %578 = vector.broadcast %cst_391 : f32 to vector<1x16xf32>
    %c0_392 = arith.constant 0 : index
    %c0_393 = arith.constant 0 : index
    %579 = vector.load %arg6[%c0_392, %c0_393] : memref<40x128xf32, #tpu.memory_space<vmem>>, vector<1x16xf32>
    tpu.vector_store %arg6[%c0_392, %c0_393], %578 {strides = array<i32>} : memref<40x128xf32, #tpu.memory_space<vmem>>, vector<1x16xf32>,
    %c33_394 = arith.constant 33 : index
    %c0_395 = arith.constant 0 : index
    %580 = vector.load %arg6[%c33_394, %c0_395] : memref<40x128xf32, #tpu.memory_space<vmem>>, vector<1x16xf32>
    tpu.vector_store %arg6[%c33_394, %c0_395], %578 {strides = array<i32>} : memref<40x128xf32, #tpu.memory_space<vmem>>, vector<1x16xf32>,
    %581 = arith.truncf %577 : vector<16x16xf32> to vector<16x16xbf16>
    %c17_396 = arith.constant 17 : index
    %c0_397 = arith.constant 0 : index
    %582 = vector.load %arg3[%c17_396, %c0_397] : memref<21x64xf32, #tpu.memory_space<vmem>>, vector<1x8xf32>
    %c1865 = arith.constant 1865 : index
    %c0_398 = arith.constant 0 : index
    %583 = vector.load %arg2[%c1865, %c0_398] : memref<1984x64xf32, #tpu.memory_space<vmem>>, vector<16x8xf32>
    %584 = arith.truncf %583 : vector<16x8xf32> to vector<16x8xbf16>
    %cst_399 = arith.constant dense<0.000000e+00> : vector<16x8xf32>
    %585 = tpu.matmul %581, %584, %cst_399 {dimension_numbers = #tpu.dot_dimension_numbers<[1], [0], [0], [1], [0, 0, 1, 1], [], []>} : vector<16x16xbf16>, vector<16x8xbf16>, vector<16x8xf32> -> vector<16x8xf32>
    %586 = vector.broadcast %582 : vector<1x8xf32> to vector<16x8xf32>
    %587 = arith.addf %585, %586 : vector<16x8xf32>
    %c1881 = arith.constant 1881 : index
    %c0_400 = arith.constant 0 : index
    %588 = vector.load %arg2[%c1881, %c0_400] : memref<1984x64xf32, #tpu.memory_space<vmem>>, vector<16x8xf32>
    %589 = arith.truncf %588 : vector<16x8xf32> to vector<16x8xbf16>
    %cst_401 = arith.constant dense<0.000000e+00> : vector<16x8xf32>
    %590 = tpu.matmul %581, %589, %cst_401 {dimension_numbers = #tpu.dot_dimension_numbers<[1], [0], [0], [1], [0, 0, 1, 1], [], []>} : vector<16x16xbf16>, vector<16x8xbf16>, vector<16x8xf32> -> vector<16x8xf32>
    %591 = vector.broadcast %582 : vector<1x8xf32> to vector<16x8xf32>
    %592 = arith.addf %590, %591 : vector<16x8xf32>
    %c1_402 = arith.constant 1 : index
    %c0_403 = arith.constant 0 : index
    %593 = tpu.strided_load %arg6[%c1_402, %c0_403] {strides = array<i32: 2, 1>} : memref<40x128xf32, #tpu.memory_space<vmem>>, vector<16x8xf32>
    tpu.strided_store %arg6[%c1_402, %c0_403], %587 {strides = array<i32: 2, 1>} : memref<40x128xf32, #tpu.memory_space<vmem>>, vector<16x8xf32>
    %c2_404 = arith.constant 2 : index
    %c0_405 = arith.constant 0 : index
    %594 = tpu.strided_load %arg6[%c2_404, %c0_405] {strides = array<i32: 2, 1>} : memref<40x128xf32, #tpu.memory_space<vmem>>, vector<16x8xf32>
    tpu.strided_store %arg6[%c2_404, %c0_405], %592 {strides = array<i32: 2, 1>} : memref<40x128xf32, #tpu.memory_space<vmem>>, vector<16x8xf32>
    %c1_406 = arith.constant 1 : index
    %c8_407 = arith.constant 8 : index
    %595 = vector.load %arg6[%c1_406, %c8_407] : memref<40x128xf32, #tpu.memory_space<vmem>>, vector<32x8xf32>
    tpu.vector_store %arg6[%c1_406, %c8_407], %75 {strides = array<i32>} : memref<40x128xf32, #tpu.memory_space<vmem>>, vector<32x8xf32>,
    %c0_408 = arith.constant 0 : index
    %c0_409 = arith.constant 0 : index
    %596 = vector.load %arg6[%c0_408, %c0_409] : memref<40x128xf32, #tpu.memory_space<vmem>>, vector<32x16xf32>
    %597 = arith.truncf %596 : vector<32x16xf32> to vector<32x16xbf16>
    %c1897 = arith.constant 1897 : index
    %c0_410 = arith.constant 0 : index
    %598 = vector.load %arg2[%c1897, %c0_410] : memref<1984x64xf32, #tpu.memory_space<vmem>>, vector<16x8xf32>
    %599 = arith.truncf %598 : vector<16x8xf32> to vector<16x8xbf16>
    %cst_411 = arith.constant dense<0.000000e+00> : vector<32x8xf32>
    %600 = tpu.matmul %597, %599, %cst_411 {dimension_numbers = #tpu.dot_dimension_numbers<[1], [0], [0], [1], [0, 0, 1, 1], [], []>} : vector<32x16xbf16>, vector<16x8xbf16>, vector<32x8xf32> -> vector<32x8xf32>
    %c1_412 = arith.constant 1 : index
    %c0_413 = arith.constant 0 : index
    %601 = vector.load %arg6[%c1_412, %c0_413] : memref<40x128xf32, #tpu.memory_space<vmem>>, vector<32x16xf32>
    %602 = arith.truncf %601 : vector<32x16xf32> to vector<32x16xbf16>
    %c1913 = arith.constant 1913 : index
    %c0_414 = arith.constant 0 : index
    %603 = vector.load %arg2[%c1913, %c0_414] : memref<1984x64xf32, #tpu.memory_space<vmem>>, vector<16x8xf32>
    %604 = arith.truncf %603 : vector<16x8xf32> to vector<16x8xbf16>
    %cst_415 = arith.constant dense<0.000000e+00> : vector<32x8xf32>
    %605 = tpu.matmul %602, %604, %cst_415 {dimension_numbers = #tpu.dot_dimension_numbers<[1], [0], [0], [1], [0, 0, 1, 1], [], []>} : vector<32x16xbf16>, vector<16x8xbf16>, vector<32x8xf32> -> vector<32x8xf32>
    %606 = arith.addf %600, %605 : vector<32x8xf32>
    %c2_416 = arith.constant 2 : index
    %c0_417 = arith.constant 0 : index
    %607 = vector.load %arg6[%c2_416, %c0_417] : memref<40x128xf32, #tpu.memory_space<vmem>>, vector<32x16xf32>
    %608 = arith.truncf %607 : vector<32x16xf32> to vector<32x16xbf16>
    %c1929 = arith.constant 1929 : index
    %c0_418 = arith.constant 0 : index
    %609 = vector.load %arg2[%c1929, %c0_418] : memref<1984x64xf32, #tpu.memory_space<vmem>>, vector<16x8xf32>
    %610 = arith.truncf %609 : vector<16x8xf32> to vector<16x8xbf16>
    %cst_419 = arith.constant dense<0.000000e+00> : vector<32x8xf32>
    %611 = tpu.matmul %608, %610, %cst_419 {dimension_numbers = #tpu.dot_dimension_numbers<[1], [0], [0], [1], [0, 0, 1, 1], [], []>} : vector<32x16xbf16>, vector<16x8xbf16>, vector<32x8xf32> -> vector<32x8xf32>
    %612 = arith.addf %606, %611 : vector<32x8xf32>
    %c18 = arith.constant 18 : index
    %c0_420 = arith.constant 0 : index
    %613 = vector.load %arg3[%c18, %c0_420] : memref<21x64xf32, #tpu.memory_space<vmem>>, vector<1x8xf32>
    %614 = vector.broadcast %613 : vector<1x8xf32> to vector<32x8xf32>
    %615 = arith.addf %612, %614 : vector<32x8xf32>
    %cst_421 = arith.constant 5.000000e-01 : f32
    %616 = vector.broadcast %cst_421 : f32 to vector<32x8xf32>
    %617 = arith.mulf %616, %615 : vector<32x8xf32>
    %cst_422 = arith.constant 4.471500e-02 : f32
    %618 = vector.broadcast %cst_422 : f32 to vector<32x8xf32>
    %619 = arith.mulf %618, %615 : vector<32x8xf32>
    %620 = arith.mulf %619, %615 : vector<32x8xf32>
    %621 = arith.mulf %620, %615 : vector<32x8xf32>
    %622 = arith.addf %615, %621 : vector<32x8xf32>
    %cst_423 = arith.constant 0.797884583 : f32
    %623 = vector.broadcast %cst_423 : f32 to vector<32x8xf32>
    %624 = arith.mulf %623, %622 : vector<32x8xf32>
    %625 = math.tanh %624 : vector<32x8xf32>
    %cst_424 = arith.constant 1.000000e+00 : f32
    %626 = vector.broadcast %cst_424 : f32 to vector<32x8xf32>
    %627 = arith.addf %626, %625 : vector<32x8xf32>
    %628 = arith.mulf %617, %627 : vector<32x8xf32>
    %cst_425 = arith.constant 0.000000e+00 : f32
    %629 = vector.broadcast %cst_425 : f32 to vector<1x8xf32>
    %c0_426 = arith.constant 0 : index
    %c0_427 = arith.constant 0 : index
    %630 = vector.load %arg6[%c0_426, %c0_427] : memref<40x128xf32, #tpu.memory_space<vmem>>, vector<1x8xf32>
    tpu.vector_store %arg6[%c0_426, %c0_427], %629 {strides = array<i32>} : memref<40x128xf32, #tpu.memory_space<vmem>>, vector<1x8xf32>,
    %c33_428 = arith.constant 33 : index
    %c0_429 = arith.constant 0 : index
    %631 = vector.load %arg6[%c33_428, %c0_429] : memref<40x128xf32, #tpu.memory_space<vmem>>, vector<1x8xf32>
    tpu.vector_store %arg6[%c33_428, %c0_429], %629 {strides = array<i32>} : memref<40x128xf32, #tpu.memory_space<vmem>>, vector<1x8xf32>,
    %c1_430 = arith.constant 1 : index
    %c0_431 = arith.constant 0 : index
    %632 = vector.load %arg6[%c1_430, %c0_431] : memref<40x128xf32, #tpu.memory_space<vmem>>, vector<32x8xf32>
    tpu.vector_store %arg6[%c1_430, %c0_431], %628 {strides = array<i32>} : memref<40x128xf32, #tpu.memory_space<vmem>>, vector<32x8xf32>,
    %c0_432 = arith.constant 0 : index
    %c0_433 = arith.constant 0 : index
    %633 = vector.load %arg6[%c0_432, %c0_433] : memref<40x128xf32, #tpu.memory_space<vmem>>, vector<32x8xf32>
    %634 = arith.truncf %633 : vector<32x8xf32> to vector<32x8xbf16>
    %c1945 = arith.constant 1945 : index
    %c0_434 = arith.constant 0 : index
    %635 = vector.load %arg2[%c1945, %c0_434] : memref<1984x64xf32, #tpu.memory_space<vmem>>, vector<8x8xf32>
    %636 = arith.truncf %635 : vector<8x8xf32> to vector<8x8xbf16>
    %cst_435 = arith.constant dense<0.000000e+00> : vector<32x8xf32>
    %637 = tpu.matmul %634, %636, %cst_435 {dimension_numbers = #tpu.dot_dimension_numbers<[1], [0], [0], [1], [0, 0, 1, 1], [], []>} : vector<32x8xbf16>, vector<8x8xbf16>, vector<32x8xf32> -> vector<32x8xf32>
    %c1_436 = arith.constant 1 : index
    %c0_437 = arith.constant 0 : index
    %638 = vector.load %arg6[%c1_436, %c0_437] : memref<40x128xf32, #tpu.memory_space<vmem>>, vector<32x8xf32>
    %639 = arith.truncf %638 : vector<32x8xf32> to vector<32x8xbf16>
    %c1953 = arith.constant 1953 : index
    %c0_438 = arith.constant 0 : index
    %640 = vector.load %arg2[%c1953, %c0_438] : memref<1984x64xf32, #tpu.memory_space<vmem>>, vector<8x8xf32>
    %641 = arith.truncf %640 : vector<8x8xf32> to vector<8x8xbf16>
    %cst_439 = arith.constant dense<0.000000e+00> : vector<32x8xf32>
    %642 = tpu.matmul %639, %641, %cst_439 {dimension_numbers = #tpu.dot_dimension_numbers<[1], [0], [0], [1], [0, 0, 1, 1], [], []>} : vector<32x8xbf16>, vector<8x8xbf16>, vector<32x8xf32> -> vector<32x8xf32>
    %643 = arith.addf %637, %642 : vector<32x8xf32>
    %c2_440 = arith.constant 2 : index
    %c0_441 = arith.constant 0 : index
    %644 = vector.load %arg6[%c2_440, %c0_441] : memref<40x128xf32, #tpu.memory_space<vmem>>, vector<32x8xf32>
    %645 = arith.truncf %644 : vector<32x8xf32> to vector<32x8xbf16>
    %c1961 = arith.constant 1961 : index
    %c0_442 = arith.constant 0 : index
    %646 = vector.load %arg2[%c1961, %c0_442] : memref<1984x64xf32, #tpu.memory_space<vmem>>, vector<8x8xf32>
    %647 = arith.truncf %646 : vector<8x8xf32> to vector<8x8xbf16>
    %cst_443 = arith.constant dense<0.000000e+00> : vector<32x8xf32>
    %648 = tpu.matmul %645, %647, %cst_443 {dimension_numbers = #tpu.dot_dimension_numbers<[1], [0], [0], [1], [0, 0, 1, 1], [], []>} : vector<32x8xbf16>, vector<8x8xbf16>, vector<32x8xf32> -> vector<32x8xf32>
    %649 = arith.addf %643, %648 : vector<32x8xf32>
    %c19 = arith.constant 19 : index
    %c0_444 = arith.constant 0 : index
    %650 = vector.load %arg3[%c19, %c0_444] : memref<21x64xf32, #tpu.memory_space<vmem>>, vector<1x8xf32>
    %651 = vector.broadcast %650 : vector<1x8xf32> to vector<32x8xf32>
    %652 = arith.addf %649, %651 : vector<32x8xf32>
    %cst_445 = arith.constant 5.000000e-01 : f32
    %653 = vector.broadcast %cst_445 : f32 to vector<32x8xf32>
    %654 = arith.mulf %653, %652 : vector<32x8xf32>
    %cst_446 = arith.constant 4.471500e-02 : f32
    %655 = vector.broadcast %cst_446 : f32 to vector<32x8xf32>
    %656 = arith.mulf %655, %652 : vector<32x8xf32>
    %657 = arith.mulf %656, %652 : vector<32x8xf32>
    %658 = arith.mulf %657, %652 : vector<32x8xf32>
    %659 = arith.addf %652, %658 : vector<32x8xf32>
    %cst_447 = arith.constant 0.797884583 : f32
    %660 = vector.broadcast %cst_447 : f32 to vector<32x8xf32>
    %661 = arith.mulf %660, %659 : vector<32x8xf32>
    %662 = math.tanh %661 : vector<32x8xf32>
    %cst_448 = arith.constant 1.000000e+00 : f32
    %663 = vector.broadcast %cst_448 : f32 to vector<32x8xf32>
    %664 = arith.addf %663, %662 : vector<32x8xf32>
    %665 = arith.mulf %654, %664 : vector<32x8xf32>
    %c0_449 = arith.constant 0 : index
    %c0_450 = arith.constant 0 : index
    %c0_451 = arith.constant 0 : index
    %666 = vector.load %arg5[%c0_449, %c0_450, %c0_451] : memref<1x32x8xf32, #tpu.memory_space<vmem>>, vector<1x32x8xf32>
    %667 = vector.shape_cast %666 : vector<1x32x8xf32> to vector<32x8xf32>
    %668 = vector.shape_cast %665 : vector<32x8xf32> to vector<1x32x8xf32>
    tpu.vector_store %arg5[%c0_449, %c0_450, %c0_451], %668 {strides = array<i32>} : memref<1x32x8xf32, #tpu.memory_space<vmem>>, vector<1x32x8xf32>,
    %669 = arith.truncf %665 : vector<32x8xf32> to vector<32x8xbf16>
    %c1969 = arith.constant 1969 : index
    %c0_452 = arith.constant 0 : index
    %670 = vector.load %arg2[%c1969, %c0_452] : memref<1984x64xf32, #tpu.memory_space<vmem>>, vector<8x3xf32>
    %671 = arith.truncf %670 : vector<8x3xf32> to vector<8x3xbf16>
    %cst_453 = arith.constant dense<0.000000e+00> : vector<32x3xf32>
    %672 = tpu.matmul %669, %671, %cst_453 {dimension_numbers = #tpu.dot_dimension_numbers<[1], [0], [0], [1], [0, 0, 1, 1], [], []>} : vector<32x8xbf16>, vector<8x3xbf16>, vector<32x3xf32> -> vector<32x3xf32>
    %c20 = arith.constant 20 : index
    %c0_454 = arith.constant 0 : index
    %673 = vector.load %arg3[%c20, %c0_454] : memref<21x64xf32, #tpu.memory_space<vmem>>, vector<1x3xf32>
    %674 = vector.broadcast %673 : vector<1x3xf32> to vector<32x3xf32>
    %675 = arith.addf %672, %674 : vector<32x3xf32>
    %c0_455 = arith.constant 0 : index
    %c0_456 = arith.constant 0 : index
    %c0_457 = arith.constant 0 : index
    %676 = vector.load %arg4[%c0_455, %c0_456, %c0_457] : memref<1x32x3xf32, #tpu.memory_space<vmem>>, vector<1x32x3xf32>
    %677 = vector.shape_cast %676 : vector<1x32x3xf32> to vector<32x3xf32>
    %678 = vector.shape_cast %675 : vector<32x3xf32> to vector<1x32x3xf32>
    tpu.vector_store %arg4[%c0_455, %c0_456, %c0_457], %678 {strides = array<i32>} : memref<1x32x3xf32, #tpu.memory_space<vmem>>, vector<1x32x3xf32>,
    return
  }
  func.func @transform_0(%arg0: i32) -> (i32, i32, i32) {
    %c0_i32 = arith.constant 0 : i32
    %c0_i32_0 = arith.constant 0 : i32
    %c0_i32_1 = arith.constant 0 : i32
    return %arg0, %c0_i32, %c0_i32_0 : i32, i32, i32
  }
  func.func @transform_1(%arg0: i32) -> (i32, i32) {
    %c0_i32 = arith.constant 0 : i32
    %c0_i32_0 = arith.constant 0 : i32
    %c0_i32_1 = arith.constant 0 : i32
    return %c0_i32, %c0_i32_0 : i32, i32
  }
  func.func @transform_2(%arg0: i32) -> (i32, i32) {
    %c0_i32 = arith.constant 0 : i32
    %c0_i32_0 = arith.constant 0 : i32
    %c0_i32_1 = arith.constant 0 : i32
    return %c0_i32, %c0_i32_0 : i32, i32
  }
  func.func @transform_3(%arg0: i32) -> (i32, i32, i32) {
    %c0_i32 = arith.constant 0 : i32
    %c0_i32_0 = arith.constant 0 : i32
    %c0_i32_1 = arith.constant 0 : i32
    return %arg0, %c0_i32, %c0_i32_0 : i32, i32, i32
  }
  func.func @transform_4(%arg0: i32) -> (i32, i32, i32) {
    %c0_i32 = arith.constant 0 : i32
    %c0_i32_0 = arith.constant 0 : i32
    %c0_i32_1 = arith.constant 0 : i32
    return %arg0, %c0_i32, %c0_i32_0 : i32, i32, i32
  }
}

</mosaic_0001>

<bundles_post_ra>
// kernel: tpu_custom_call.1
= control target key start
LH: loop header
LB: loop body
LE: loop exit
PB: predicated region body
PF: predicated region fallthrough
CT: control target
= control target key end

     0   :  { %s5057_s15 = smov 0   ;;  %s6317_s0 = inlined_call_operand.vmem [shape: f32[2,32,3], index: 0, kind: input, shape index: {}]   ;;  %s6318_s1 = inlined_call_operand.vmem [shape: f32[1984,64], index: 1, kind: input, shape index: {}]   ;;  %s6319_s2 = inlined_call_operand.vmem [shape: f32[21,64], index: 2, kind: input, shape index: {}]   ;;  %s6320_s3 = inlined_call_operand.vmem [shape: f32[2,32,3], index: 3, kind: output, shape index: {0}]   ;;  %s6321_s4 = inlined_call_operand.vmem [shape: f32[2,32,8], index: 4, kind: output, shape index: {1}]  }
   0x1 LB: > { %s4104_s16 = sadd.s32 4294967295, %s5023_s15   ;;  %p4108_p0 = scmp.ge.s32.totalorder %s5023_s15, 1  ;;  %s5023_s15 = sphi %s5057_s15, %s15_s15  }
   0x2   : > { %p165_p1 = scmp.lt.s32.totalorder %s5023_s15, 3 }
   0x4   : > { %p166_p2 = pnand %p4108_p0, %p165_p1 }
   0x5   : > { %v238_v0 = vld [vmem:[%s6318_s1 + $0x3] sm:$0x7] (!%p166_p2)  ;;  %vm246_vm0 = vcmask (!%p166_p2), 1040384   ;;  %vm247_vm1 = vcmask (!%p166_p2), 1041408   ;;  %p196_p3 = scmp.lt.s32.totalorder (!%p166_p2), %s4104_s16, 1  ;;  %v5025_v2 = vmov (!%p166_p2), 65535  }
   0x6   : > { %169 = sbr.rel (%p166_p2) target bundleno = 5434 (0x153a), region = 32  ;;  %v239_v1 = vpack.c.bf16 (!%p166_p2), %v238_v0, %v238_v0  ;;  %v248_v3 = vsel (!%p166_p2), %vm246_vm0, 4294967295, %v5025_v2  ;;  %vm212_vm2 = vcmask (!%p166_p2), 16384   ;;  %v230_v4 = vld [vmem:[%s6318_s1] sm:$0x7] (!%p166_p2)  ;;  %v5026_v6 = vmov (!%p166_p2), 0.0  }
   0x7   : > { %v249_v5 = vsel (!%p166_p2), %vm247_vm1, %v248_v3, 0  ;;  %213 = vst.msk [vmem:[#allocation2] sm:$0x1] (!%p166_p2), %vm212_vm2, %v5026_v6  ;;  %214 = vst.msk [vmem:[#allocation2 + $0x21] sm:$0x1] (!%p166_p2), %vm212_vm2, %v5026_v6  ;;  %v231_v7 = vpack.c.bf16 (!%p166_p2), %v230_v4, %v230_v4  ;;  %vm219_vm3 = vcmask (!%p166_p2), 23552  }
   0x8   : > { %v251_v8 = vand.u32 (!%p166_p2), %v249_v5, %v239_v1  ;;  %v366_v14 = vld [vmem:[%s6318_s1 + $0x6] sm:$0x7] (!%p166_p2)  ;;  %vm475_vm4 = vcmask (!%p166_p2), 57344   ;;  %v497_v35 = vld [vmem:[%s6318_s1 + $0x11] sm:$0xff] (!%p166_p2)  ;;  %vm505_vm5 = vcmask (!%p166_p2), 1043456   ;;  %v489_v38 = vld [vmem:[%s6318_s1 + $0x9] sm:$0xff] (!%p166_p2) }
   0x9   : > { %v309_v9 = vand.u32 (!%p166_p2), %v249_v5, %v231_v7  ;;  %v367_v15 = vpack.c.bf16 (!%p166_p2), %v366_v14, %v366_v14  ;;  %v498_v36 = vpack.c.bf16 (!%p166_p2), %v497_v35, %v497_v35  ;;  %v5105_v39 = vpack.c.bf16 (!%p166_p2), %v489_v38, %v489_v38  ;;  %v4121_v40 = vld [vmem:[%s6319_s2] ss:$0 sm:$0xff] (!%p166_p2)  ;;  %s5028_s18 = smov (!%p166_p2), 16   ;;  %s5029_s19 = smov (!%p166_p2), 8  }
   0xa   : > { %4409 = vmatprep.subr.bf16.mxu0 (!%p166_p2), %v251_v8  ;;  %vm478_vm6 = vcmask (!%p166_p2), 64512   ;;  %vm5027_vm7 = vmmov (!%p166_p2), 0   ;;  %vm932_vm8 = vcmask (!%p166_p2), 122880   ;;  %vm935_vm9 = vcmask (!%p166_p2), 130048   ;;  %s5030_s23 = smov (!%p166_p2), 64  }
   0xb   : > { %4410 = vmatpush3.bf16.msra.mxu0 (!%p166_p2), %v251_v8  ;;  %v375_v25 = vand.u32 (!%p166_p2), %v367_v15, %v249_v5  ;;  %4931 = vmatprep.subr.msk.bf16.mxu1 (!%p166_p2), %vm505_vm5, %v498_v36  ;;  %v507_v37 = vsel (!%p166_p2), %vm505_vm5, %v498_v36, 0  ;;  %vm1283_vm10 = vcmask (!%p166_p2), 253952   ;;  %vm1286_vm11 = vcmask (!%p166_p2), 261120  }
   0xc   : > { %4415 = vmatprep.subr.bf16.mxu0 (!%p166_p2), %v309_v9  ;;  %4428 = vmatpush3.bf16.msra.mxu1 (!%p166_p2), %v507_v37  ;;  %vm1463_vm12 = vcmask (!%p166_p2), 257024   ;;  %vm1634_vm13 = vcmask (!%p166_p2), 516096   ;;  %vm1637_vm14 = vcmask (!%p166_p2), 519168   ;;  %vm1667_vm15 = vcmask (!%p166_p2), 523264  }
   0xd   : > { %s6323_s16 = smov (!%p196_p3, %s4104_s16), 1  ;;  %4932 = vmatprep.subr.msk.bf16.mxu1 %vm505_vm5, %v5105_v39  ;;  %vm1952_vm0 = vcmask 1043968   ;;  %vm2479_vm1 = vcmask 523520   ;;  %vm2953_vm2 = vcmask 261248  }
   0xe   : > { %s5073_s21 = sshll.u32 %s6323_s16, 5 }
   0xf   : > { %s200_s24 = scalar_lea.vmem %s6317_s0, %s5073_s21 }
  0x10   : > { %v215_v10 = vld [vmem:[%s200_s24] sm:$0xff]  ;;  %v216_v11 = vld [vmem:[%s200_s24 + $0x8] sm:$0xff]  ;;  %v217_v12 = vld [vmem:[%s200_s24 + $0x10] sm:$0xff] }
  0x11   : > { %220 = vst.msk [vmem:[#allocation2 + $0x1] sm:$0xff] %vm219_vm3, %v215_v10  ;;  %221 = vst.msk [vmem:[#allocation2 + $0x9] sm:$0xff] %vm219_vm3, %v216_v11  ;;  %v218_v13 = vld [vmem:[%s200_s24 + $0x18] sm:$0xff]  ;;  %s5031_s24 = smov 32  }
  0x12   : > { %222 = vst.msk [vmem:[#allocation2 + $0x11] sm:$0xff] %vm219_vm3, %v217_v12  ;;  %223 = vst.msk [vmem:[#allocation2 + $0x19] sm:$0xff] %vm219_vm3, %v218_v13 }
  0x18   : > { %v224_v16 = vld [vmem:[#allocation2] sm:$0xff]  ;;  %v225_v17 = vld [vmem:[#allocation2 + $0x8] sm:$0xff] }
  0x19   : > { %v232_v18 = vld [vmem:[#allocation2 + $0x1] sm:$0xff]  ;;  %v233_v19 = vld [vmem:[#allocation2 + $0x9] sm:$0xff]  ;;  %v234_v21 = vld [vmem:[#allocation2 + $0x11] sm:$0xff]  ;;  %v228_v23 = vpack.c.bf16 %v225_v17, %v224_v16  ;;  %476 = vst.msk [vmem:[#allocation2] sm:$0x1] %vm475_vm4, %v5026_v6 }
  0x1a   : > { %v236_v20 = vpack.c.bf16 %v233_v19, %v232_v18  ;;  %v235_v22 = vld [vmem:[#allocation2 + $0x19] sm:$0xff]  ;;  %v226_v26 = vld [vmem:[#allocation2 + $0x10] sm:$0xff]  ;;  %v360_v28 = vld [vmem:[#allocation2 + $0x2] sm:$0xff] }
  0x1b   : > { %v237_v24 = vpack.c.bf16 %v235_v22, %v234_v21  ;;  %v227_v27 = vld [vmem:[#allocation2 + $0x18] sm:$0xff]  ;;  %v361_v29 = vld [vmem:[#allocation2 + $0xa] sm:$0xff] }
  0x1c   : > { %4411 = vmatprep.mubr.msk.bf16.mxu0 %vm219_vm3, %v236_v20  ;;  %v229_v30 = vpack.c.bf16 %v227_v27, %v226_v26  ;;  %v364_v31 = vpack.c.bf16 %v361_v29, %v360_v28  ;;  %v362_v32 = vld [vmem:[#allocation2 + $0x12] sm:$0xff]  ;;  %v363_v33 = vld [vmem:[#allocation2 + $0x1a] sm:$0xff] }
  0x1d   : > { %4412 = vmatmul.mubr.msk.bf16.vlgmr.msra.gmra.mrb[0].mxu0 %vm219_vm3, %v237_v24  ;;  %v365_v34 = vpack.c.bf16 %v363_v33, %v362_v32  ;;  %477 = vst.msk [vmem:[#allocation2 + $0x21] sm:$0x1] %vm475_vm4, %v5026_v6  ;;  %v622_v24 = vld [vmem:[%s6318_s1 + $0x19] sm:$0xff] }
  0x1e   : > { %4416 = vmatpush3.bf16.msra.mxu0 %v309_v9  ;;  %4417 = vmatprep.mubr.msk.bf16.mxu0 %vm219_vm3, %v228_v23  ;;  %v623_v32 = vpack.c.bf16 %v622_v24, %v622_v24 }
  0x1f   : > { %4421 = vmatprep.subr.bf16.mxu0 %v375_v25 }
  0x29   : > { %4418 = vmatmul.mubr.msk.bf16.vlgmr.msra.gmra.mrb[0].mxu0 %vm219_vm3, %v229_v30 }
  0x2a   : > { %4422 = vmatpush3.bf16.msra.mxu0 %v375_v25  ;;  %4423 = vmatprep.mubr.msk.bf16.mxu0 %vm219_vm3, %v364_v31  ;;  %v565_v31 = vsel %vm505_vm5, %v5105_v39, 0 }
  0x2b   : > { %4445 = vmatprep.subr.bf16.mxu0 %v5026_v6 }
  0x35   : > { %4424 = vmatmul.mubr.msk.bf16.vlgmr.msra.gmra.mrb[0].mxu0 %vm219_vm3, %v365_v34 }
  0x36   : > { %4447 = vmatprep.mubr.msk.bf16.mxu0 %vm5027_vm7, %v5026_v6 }
 0x108   : > { %v4425_v41 = vpop.f32.mrb[0].mxu0 }
 0x109   : > { %v437_v42 = vadd.f32 %v4425_v41, %v4121_v40  ;;  %v411_v43 = vpop.f32.mrb[1].mxu0 }
 0x10a   : > { %v435_v44 = vadd.f32 %v4121_v40, %v411_v43  ;;  %v4426_v45 = vpop.f32.mrb[2].mxu0 }
 0x10b   : > { %v445_v46 = vmul.f32 0.044715, %v437_v42  ;;  %v438_v47 = vadd.f32 %v4426_v45, %v4121_v40  ;;  %v414_v48 = vpop.f32.mrb[3].mxu0  ;;  %v441_v8 = vmul.f32 0.5, %v437_v42  ;;  %v752_v45 = vld [vmem:[%s6318_s1 + $0x21] sm:$0xff] }
 0x10c   : > { %v443_v49 = vmul.f32 0.044715, %v435_v44  ;;  %v436_v50 = vadd.f32 %v4121_v40, %v414_v48  ;;  %v439_v11 = vmul.f32 0.5, %v435_v44  ;;  %v631_v40 = vsel %vm505_vm5, %v623_v32, 0 }
 0x10d   : > { %v449_v51 = vmul.f32 %v445_v46, %v437_v42  ;;  %v446_v52 = vmul.f32 0.044715, %v438_v47  ;;  %v442_v15 = vmul.f32 0.5, %v438_v47 }
 0x10e   : > { %v447_v53 = vmul.f32 %v443_v49, %v435_v44  ;;  %v444_v54 = vmul.f32 0.044715, %v436_v50  ;;  %v440_v18 = vmul.f32 0.5, %v436_v50 }
 0x10f   : > { %v453_v55 = vmul.f32 %v449_v51, %v437_v42  ;;  %v450_v56 = vmul.f32 %v446_v52, %v438_v47 }
 0x110   : > { %v451_v57 = vmul.f32 %v447_v53, %v435_v44  ;;  %v448_v58 = vmul.f32 %v444_v54, %v436_v50 }
 0x111   : > { %v457_v59 = vadd.f32 %v453_v55, %v437_v42  ;;  %v454_v60 = vmul.f32 %v450_v56, %v438_v47 }
 0x112   : > { %v455_v61 = vadd.f32 %v451_v57, %v435_v44  ;;  %v452_v62 = vmul.f32 %v448_v58, %v436_v50  ;;  %v757_v44 = vld [vmem:[%s6318_s1 + $0x29] sm:$0xff] }
 0x113   : > { %v461_v63 = vmul.f32 0.7978846, %v457_v59  ;;  %v458_v0 = vadd.f32 %v454_v60, %v438_v47  ;;  %v758_v46 = vpack.c.bf16 %v757_v44, %v757_v44  ;;  %v753_v47 = vpack.c.bf16 %v752_v45, %v752_v45 }
 0x114   : > { %v459_v1 = vmul.f32 0.7978846, %v455_v61  ;;  %v456_v2 = vadd.f32 %v452_v62, %v436_v50  ;;  %v4128_v50 = vld [vmem:[%s6319_s2 + $0x1] ss:$0 sm:$0xff] }
 0x115   : > { %4953 = vtanh.f32 %v461_v63  ;;  %v462_v3 = vmul.f32 0.7978846, %v458_v0  ;;  %v763_v48 = vsel %vm505_vm5, %v758_v46, 0  ;;  %v810_v49 = vsel %vm505_vm5, %v753_v47, 0 }
 0x116   : > { %4955 = vtanh.f32 %v459_v1  ;;  %v460_v4 = vmul.f32 0.7978846, %v456_v2  ;;  %4446 = vmatpush3.bf16.msra.mxu0 %v763_v48 }
 0x117   : > { %4957 = vtanh.f32 %v462_v3  ;;  %4457 = vmatprep.subr.bf16.mxu0 %v5026_v6 }
 0x118   : > { %4959 = vtanh.f32 %v460_v4 }
 0x11f   : > { %v4954_v5 = vpop.eup %4953 }
 0x120   : > { %v4956_v7 = vpop.eup %4955  ;;  %v469_v9 = vadd.f32 1.0, %v4954_v5 }
 0x121   : > { %v4958_v10 = vpop.eup %4957  ;;  %v467_v12 = vadd.f32 1.0, %v4956_v7 }
 0x122   : > { %v4960_v13 = vpop.eup %4959  ;;  %v473_v14 = vmul.f32 %v469_v9, %v441_v8  ;;  %v470_v16 = vadd.f32 1.0, %v4958_v10 }
 0x123   : > { %v471_v17 = vmul.f32 %v467_v12, %v439_v11  ;;  %v468_v19 = vadd.f32 1.0, %v4960_v13 }
 0x124   : > { %v474_v20 = vmul.f32 %v470_v16, %v442_v15  ;;  %481 = vst.msk [vmem:[#allocation2 + $0x11] sm:$0xff] %vm478_vm6, %v473_v14 }
 0x125   : > { %479 = vst.msk [vmem:[#allocation2 + $0x1] sm:$0xff] %vm478_vm6, %v471_v17  ;;  %v472_v21 = vmul.f32 %v468_v19, %v440_v18 }
 0x126   : > { %482 = vst.msk [vmem:[#allocation2 + $0x19] sm:$0xff] %vm478_vm6, %v474_v20 }
 0x127   : > { %480 = vst.msk [vmem:[#allocation2 + $0x9] sm:$0xff] %vm478_vm6, %v472_v21 }
 0x12b   : > { %v493_v29 = vld [vmem:[#allocation2 + $0x11] sm:$0xff] }
 0x12c   : > { %v483_v22 = vld [vmem:[#allocation2] sm:$0xff] }
 0x12d   : > { %745 = vst.msk [vmem:[#allocation2] sm:$0x1] %vm475_vm4, %v5026_v6  ;;  %v494_v23 = vld [vmem:[#allocation2 + $0x19] sm:$0xff]  ;;  %v491_v26 = vld [vmem:[#allocation2 + $0x1] sm:$0xff] }
 0x12e   : > { %v484_v25 = vld [vmem:[#allocation2 + $0x8] sm:$0xff]  ;;  %v496_v30 = vpack.c.bf16 %v494_v23, %v493_v29  ;;  %v485_v34 = vld [vmem:[#allocation2 + $0x10] sm:$0xff]  ;;  %v486_v35 = vld [vmem:[#allocation2 + $0x18] sm:$0xff] }
 0x12f   : > { %v492_v27 = vld [vmem:[#allocation2 + $0x9] sm:$0xff]  ;;  %v487_v33 = vpack.c.bf16 %v484_v25, %v483_v22  ;;  %v488_v38 = vpack.c.bf16 %v486_v35, %v485_v34  ;;  %v618_v39 = vld [vmem:[#allocation2 + $0x12] sm:$0xff]  ;;  %v619_v42 = vld [vmem:[#allocation2 + $0x1a] sm:$0xff] }
 0x130   : > { %v495_v28 = vpack.c.bf16 %v492_v27, %v491_v26  ;;  %v616_v36 = vld [vmem:[#allocation2 + $0x2] sm:$0xff]  ;;  %v617_v37 = vld [vmem:[#allocation2 + $0xa] sm:$0xff]  ;;  %v621_v43 = vpack.c.bf16 %v619_v42, %v618_v39  ;;  %3324 = vst.msk [vmem:[#allocation2 + $0x21] sm:$0x1] %vm932_vm8, %v5026_v6 }
 0x131   : > { %v620_v41 = vpack.c.bf16 %v617_v37, %v616_v36 }
 0x132   : > { %4429 = vmatprep.mubr.msk.bf16.mxu1 %vm478_vm6, %v495_v28 }
 0x133   : > { %4430 = vmatmul.mubr.msk.bf16.vlgmr.msra.gmra.mrb[0].mxu1 %vm478_vm6, %v496_v30 }
 0x134   : > { %4434 = vmatpush3.bf16.msra.mxu1 %v565_v31  ;;  %4435 = vmatprep.mubr.msk.bf16.mxu1 %vm478_vm6, %v487_v33 }
 0x135   : > { %4933 = vmatprep.subr.msk.bf16.mxu1 %vm505_vm5, %v623_v32 }
 0x13f   : > { %4436 = vmatmul.mubr.msk.bf16.vlgmr.msra.gmra.mrb[0].mxu1 %vm478_vm6, %v488_v38  ;;  %v856_v38 = vld [vmem:[%s6318_s1 + $0x31] sm:$0xff] }
 0x140   : > { %4440 = vmatpush3.bf16.msra.mxu1 %v631_v40  ;;  %4441 = vmatprep.mubr.msk.bf16.mxu1 %vm478_vm6, %v620_v41  ;;  %v857_v40 = vpack.c.bf16 %v856_v38, %v856_v38 }
 0x141   : > { %4451 = vmatprep.subr.bf16.mxu1 %v5026_v6 }
 0x142   : > { %v862_v46 = vsel %vm505_vm5, %v857_v40, 0 }
 0x14b   : > { %4442 = vmatmul.mubr.msk.bf16.vlgmr.msra.gmra.mrb[0].mxu1 %vm478_vm6, %v621_v43 }
 0x14c   : > { %4453 = vmatprep.mubr.msk.bf16.mxu1 %vm5027_vm7, %v5026_v6  ;;  %4452 = vmatpush3.bf16.msra.mxu1 %v810_v49 }
 0x14d   : > { %4463 = vmatprep.subr.bf16.mxu1 %v5026_v6 }
 0x21e   : > { %v4443_v51 = vpop.f32.mrb[0].mxu1 }
 0x21f   : > { %v693_v52 = vadd.f32 %v4443_v51, %v4128_v50  ;;  %v667_v53 = vpop.f32.mrb[1].mxu1  ;;  %v948_v51 = vld [vmem:[%s6318_s1 + $0x51] sm:$0xff] }
 0x220   : > { %v691_v54 = vadd.f32 %v4128_v50, %v667_v53  ;;  %v4444_v55 = vpop.f32.mrb[2].mxu1 }
 0x221   : > { %v701_v56 = vmul.f32 0.044715, %v693_v52  ;;  %v694_v57 = vadd.f32 %v4444_v55, %v4128_v50  ;;  %v670_v58 = vpop.f32.mrb[3].mxu1  ;;  %v697_v18 = vmul.f32 0.5, %v693_v52 }
 0x222   : > { %v699_v59 = vmul.f32 0.044715, %v691_v54  ;;  %v692_v60 = vadd.f32 %v4128_v50, %v670_v58  ;;  %v695_v21 = vmul.f32 0.5, %v691_v54  ;;  %v947_v50 = vld [vmem:[%s6318_s1 + $0x49] sm:$0xff] }
 0x223   : > { %v705_v61 = vmul.f32 %v701_v56, %v693_v52  ;;  %v702_v62 = vmul.f32 0.044715, %v694_v57  ;;  %v698_v25 = vmul.f32 0.5, %v694_v57  ;;  %v949_v53 = vpack.c.bf16 %v948_v51, %v947_v50  ;;  %v1126_v50 = vld [vmem:[%s6318_s1 + $0x71] sm:$0xff] }
 0x224   : > { %v703_v63 = vmul.f32 %v699_v59, %v691_v54  ;;  %v700_v0 = vmul.f32 0.044715, %v692_v60  ;;  %v696_v28 = vmul.f32 0.5, %v692_v60 }
 0x225   : > { %v709_v1 = vmul.f32 %v705_v61, %v693_v52  ;;  %v706_v2 = vmul.f32 %v702_v62, %v694_v57 }
 0x226   : > { %v707_v3 = vmul.f32 %v703_v63, %v691_v54  ;;  %v704_v4 = vmul.f32 %v700_v0, %v692_v60 }
 0x227   : > { %v713_v5 = vadd.f32 %v709_v1, %v693_v52  ;;  %v710_v7 = vmul.f32 %v706_v2, %v694_v57  ;;  %v941_v52 = vld [vmem:[%s6318_s1 + $0x39] sm:$0xff] }
 0x228   : > { %v711_v8 = vadd.f32 %v707_v3, %v691_v54  ;;  %v708_v9 = vmul.f32 %v704_v4, %v692_v60  ;;  %v942_v54 = vld [vmem:[%s6318_s1 + $0x41] sm:$0xff] }
 0x229   : > { %v717_v10 = vmul.f32 0.7978846, %v713_v5  ;;  %v714_v11 = vadd.f32 %v710_v7, %v694_v57  ;;  %v943_v55 = vpack.c.bf16 %v942_v54, %v941_v52  ;;  %v4132_v3 = vld [vmem:[%s6319_s2 + $0x2] ss:$0 sm:$0xff] }
 0x22a   : > { %v715_v12 = vmul.f32 0.7978846, %v711_v8  ;;  %v712_v13 = vadd.f32 %v708_v9, %v692_v60 }
 0x22b   : > { %4961 = vtanh.f32 %v717_v10  ;;  %v718_v14 = vmul.f32 0.7978846, %v714_v11 }
 0x22c   : > { %4963 = vtanh.f32 %v715_v12  ;;  %v716_v15 = vmul.f32 0.7978846, %v712_v13 }
 0x22d   : > { %4965 = vtanh.f32 %v718_v14 }
 0x22e   : > { %4967 = vtanh.f32 %v716_v15 }
 0x235   : > { %v4962_v16 = vpop.eup %4961 }
 0x236   : > { %v4964_v17 = vpop.eup %4963  ;;  %v725_v19 = vadd.f32 1.0, %v4962_v16 }
 0x237   : > { %v4966_v20 = vpop.eup %4965  ;;  %v723_v22 = vadd.f32 1.0, %v4964_v17 }
 0x238   : > { %v4968_v23 = vpop.eup %4967  ;;  %v5149_v24 = vmul.f32 %v725_v19, %v697_v18  ;;  %v726_v26 = vadd.f32 1.0, %v4966_v20 }
 0x239   : > { %v5151_v27 = vmul.f32 %v723_v22, %v695_v21  ;;  %v724_v29 = vadd.f32 1.0, %v4968_v23 }
 0x23a   : > { %733 = vst.msk [vmem:[#allocation2 + $0x11] sm:$0xff] %vm478_vm6, %v5149_v24  ;;  %v5155_v30 = vmul.f32 %v726_v26, %v698_v25 }
 0x23b   : > { %731 = vst.msk [vmem:[#allocation2 + $0x1] sm:$0xff] %vm478_vm6, %v5151_v27  ;;  %v5159_v31 = vmul.f32 %v724_v29, %v696_v28 }
 0x23c   : > { %734 = vst.msk [vmem:[#allocation2 + $0x19] sm:$0xff] %vm478_vm6, %v5155_v30 }
 0x23d   : > { %732 = vst.msk [vmem:[#allocation2 + $0x9] sm:$0xff] %vm478_vm6, %v5159_v31 }
 0x243   : > { %v738_v32 = vld [vmem:[#allocation2 + $0x11] ss:$2 sm:$0xff]  ;;  %v742_v33 = vld [vmem:[#allocation2 + $0x12] ss:$2 sm:$0xff] }
 0x244   : > { %v744_v34 = vmax.f32 %v738_v32, %v742_v33  ;;  %746 = vst.msk [vmem:[#allocation2 + $0x11] sm:$0x1] %vm475_vm4, %v5026_v6  ;;  %v736_v35 = vld [vmem:[#allocation2 + $0x1] ss:$2 sm:$0xff]  ;;  %v740_v36 = vld [vmem:[#allocation2 + $0x2] ss:$2 sm:$0xff] }
 0x245   : > { %v743_v37 = vmax.f32 %v736_v35, %v740_v36  ;;  %v1042_v35 = vld [vmem:[%s6318_s1 + $0x61] sm:$0xff] }
 0x246   : > { %748 = vst.msk [vmem:[#allocation2 + $0x9] sm:$0xff] %vm478_vm6, %v744_v34  ;;  %v1041_v34 = vld [vmem:[%s6318_s1 + $0x59] sm:$0xff] }
 0x247   : > { %747 = vst.msk [vmem:[#allocation2 + $0x1] sm:$0xff] %vm478_vm6, %v743_v37 }
 0x24d   : > { %v755_v41 = vld [vmem:[#allocation2 + $0x9] sm:$0xff] }
 0x24e   : > { %v749_v39 = vld [vmem:[#allocation2] sm:$0xff]  ;;  %v750_v42 = vld [vmem:[#allocation2 + $0x8] sm:$0xff] }
 0x24f   : > { %v754_v43 = vld [vmem:[#allocation2 + $0x1] sm:$0xff]  ;;  %v751_v45 = vpack.c.bf16 %v750_v42, %v749_v39  ;;  %v854_v48 = vld [vmem:[#allocation2 + $0xa] sm:$0xff]  ;;  %933 = vst.msk [vmem:[#allocation2] sm:$0x1] %vm932_vm8, %v5026_v6 }
 0x250   : > { %v756_v44 = vpack.c.bf16 %v755_v41, %v754_v43  ;;  %v853_v47 = vld [vmem:[#allocation2 + $0x2] sm:$0xff]  ;;  %934 = vst.msk [vmem:[#allocation2 + $0x11] sm:$0x1] %vm932_vm8, %v5026_v6  ;;  %v1043_v41 = vpack.c.bf16 %v1042_v35, %v1041_v34  ;;  %v1222_v34 = vld [vmem:[%s6318_s1 + $0x91] sm:$0xff] }
 0x251   : > { %4454 = vmatmul.mubr.msk.bf16.vlgmr.msra.gmra.mrb[4].mxu1 %vm478_vm6, %v751_v45  ;;  %v855_v49 = vpack.c.bf16 %v854_v48, %v853_v47  ;;  %v1131_v47 = vld [vmem:[%s6318_s1 + $0x81] sm:$0xff]  ;;  %v1125_v48 = vld [vmem:[%s6318_s1 + $0x69] sm:$0xff] }
 0x252   : > { %4448 = vmatmul.mubr.msk.bf16.vlgmr.msra.gmra.mrb[4].mxu0 %vm478_vm6, %v756_v44  ;;  %4465 = vmatprep.mubr.msk.bf16.mxu1 %vm5027_vm7, %v5026_v6  ;;  %v1127_v51 = vpack.c.bf16 %v1126_v50, %v1125_v48  ;;  %v1292_v48 = vld [vmem:[%s6318_s1 + $0xa9] sm:$0xff] }
 0x253   : > { %4458 = vmatpush3.bf16.msra.mxu0 %v862_v46  ;;  %4459 = vmatprep.mubr.msk.bf16.mxu0 %vm5027_vm7, %v5026_v6  ;;  %v1130_v46 = vld [vmem:[%s6318_s1 + $0x79] sm:$0xff] }
 0x254   : > { %4469 = vmatprep.subr.bf16.mxu0 %v5026_v6  ;;  %4464 = vmatpush3.bf16.msra.mxu1 %v949_v53 }
 0x255   : > { %4475 = vmatprep.subr.bf16.mxu1 %v5026_v6 }
 0x25a   : > { %4460 = vmatmul.mubr.msk.bf16.vlgmr.msra.gmra.mrb[8].mxu0 %vm478_vm6, %v855_v49  ;;  %v1132_v49 = vpack.c.bf16 %v1131_v47, %v1130_v46  ;;  %v1301_v46 = vld [vmem:[%s6318_s1 + $0xd1] sm:$0xff] }
 0x25b   : > { %4471 = vmatprep.mubr.msk.bf16.mxu0 %vm5027_vm7, %v5026_v6  ;;  %4470 = vmatpush3.bf16.msra.mxu0 %v943_v55 }
 0x25c   : > { %4481 = vmatprep.subr.bf16.mxu0 %v5026_v6 }
 0x324   : > { %v846_v57 = vpop.f32.mrb[4].mxu1 }
 0x325   : > { %v799_v56 = vpop.f32.mrb[4].mxu0  ;;  %v4455_v60 = vpop.f32.mrb[5].mxu1 }
 0x326   : > { %v847_v58 = vadd.f32 %v846_v57, %v799_v56  ;;  %v4449_v59 = vpop.f32.mrb[5].mxu0  ;;  %v849_v62 = vpop.f32.mrb[6].mxu1 }
 0x327   : > { %v802_v61 = vpop.f32.mrb[6].mxu0  ;;  %v4456_v1 = vpop.f32.mrb[7].mxu1 }
 0x328   : > { %v850_v63 = vadd.f32 %v849_v62, %v802_v61  ;;  %v4450_v0 = vpop.f32.mrb[7].mxu0 }
 0x32d   : > { %v898_v2 = vpop.f32.mrb[8].mxu0 }
 0x32e   : > { %v905_v4 = vadd.f32 %v898_v2, %v847_v58  ;;  %v4461_v5 = vpop.f32.mrb[9].mxu0 }
 0x32f   : > { %v901_v7 = vpop.f32.mrb[10].mxu0 }
 0x330   : > { %v912_v8 = vadd.f32 %v4132_v3, %v905_v4  ;;  %v906_v9 = vadd.f32 %v901_v7, %v850_v63  ;;  %v4462_v10 = vpop.f32.mrb[11].mxu0  ;;  %v4136_v63 = vld [vmem:[%s6319_s2 + $0x3] ss:$0 sm:$0xff] }
 0x332   : > { %v916_v11 = vmul.f32 0.044715, %v912_v8  ;;  %v913_v12 = vadd.f32 %v4132_v3, %v906_v9  ;;  %v914_v23 = vmul.f32 0.5, %v912_v8 }
 0x334   : > { %v918_v13 = vmul.f32 %v916_v11, %v912_v8  ;;  %v917_v14 = vmul.f32 0.044715, %v913_v12  ;;  %v915_v29 = vmul.f32 0.5, %v913_v12 }
 0x336   : > { %v920_v15 = vmul.f32 %v918_v13, %v912_v8  ;;  %v919_v16 = vmul.f32 %v917_v14, %v913_v12 }
 0x338   : > { %v922_v17 = vadd.f32 %v920_v15, %v912_v8  ;;  %v921_v18 = vmul.f32 %v919_v16, %v913_v12 }
 0x33a   : > { %v924_v19 = vmul.f32 0.7978846, %v922_v17  ;;  %v923_v20 = vadd.f32 %v921_v18, %v913_v12 }
 0x33c   : > { %4969 = vtanh.f32 %v924_v19  ;;  %v925_v21 = vmul.f32 0.7978846, %v923_v20 }
 0x33e   : > { %4971 = vtanh.f32 %v925_v21 }
 0x346   : > { %v4970_v22 = vpop.eup %4969 }
 0x347   : > { %v928_v25 = vadd.f32 1.0, %v4970_v22 }
 0x348   : > { %v4972_v26 = vpop.eup %4971 }
 0x349   : > { %v930_v28 = vmul.f32 %v928_v25, %v914_v23  ;;  %v929_v32 = vadd.f32 1.0, %v4972_v26 }
 0x34b   : > { %v931_v33 = vmul.f32 %v929_v32, %v915_v29  ;;  %936 = vst.msk [vmem:[#allocation2 + $0x1] sm:$0xff] %vm935_vm9, %v930_v28 }
 0x34d   : > { %937 = vst.msk [vmem:[#allocation2 + $0x9] sm:$0xff] %vm935_vm9, %v931_v33  ;;  %v1221_v33 = vld [vmem:[%s6318_s1 + $0x89] sm:$0xff] }
 0x352   : > { %v938_v36 = vld [vmem:[#allocation2] sm:$0xff] }
 0x353   : > { %1120 = vst.msk [vmem:[#allocation2] sm:$0x1] %vm932_vm8, %v5026_v6  ;;  %v944_v38 = vld [vmem:[#allocation2 + $0x1] sm:$0xff] }
 0x354   : > { %v939_v37 = vld [vmem:[#allocation2 + $0x8] sm:$0xff] }
 0x355   : > { %v945_v40 = vld [vmem:[#allocation2 + $0x9] sm:$0xff]  ;;  %v940_v42 = vpack.c.bf16 %v939_v37, %v938_v36  ;;  %v1223_v37 = vpack.c.bf16 %v1222_v34, %v1221_v33  ;;  %v1468_v34 = vld [vmem:[%s6318_s1 + $0x101] sm:$0xff] }
 0x356   : > { %v946_v39 = vpack.c.bf16 %v945_v40, %v944_v38  ;;  %v1038_v43 = vld [vmem:[#allocation2 + $0x2] sm:$0xff]  ;;  %v1039_v44 = vld [vmem:[#allocation2 + $0xa] sm:$0xff] }
 0x357   : > { %4472 = vmatmul.mubr.msk.bf16.vlgmr.msra.gmra.mrb[12].mxu0 %vm935_vm9, %v940_v42  ;;  %v1040_v45 = vpack.c.bf16 %v1039_v44, %v1038_v43  ;;  %2841 = vst.msk [vmem:[#allocation2 + $0x11] sm:$0x1] %vm1283_vm10, %v5026_v6  ;;  %v1290_v42 = vld [vmem:[%s6318_s1 + $0x99] sm:$0xff]  ;;  %v1291_v44 = vld [vmem:[%s6318_s1 + $0xa1] sm:$0xff] }
 0x358   : > { %4466 = vmatmul.mubr.msk.bf16.vlgmr.msra.gmra.mrb[8].mxu1 %vm935_vm9, %v946_v39  ;;  %4483 = vmatprep.mubr.msk.bf16.mxu0 %vm5027_vm7, %v5026_v6  ;;  %v1299_v39 = vld [vmem:[%s6318_s1 + $0xc1] sm:$0xff]  ;;  %v1294_v47 = vpack.c.bf16 %v1291_v44, %v1290_v42 }
 0x359   : > { %4476 = vmatpush3.bf16.msra.mxu1 %v1043_v41  ;;  %4477 = vmatprep.mubr.msk.bf16.mxu1 %vm5027_vm7, %v5026_v6  ;;  %v1298_v41 = vld [vmem:[%s6318_s1 + $0xb9] sm:$0xff] }
 0x35a   : > { %4487 = vmatprep.subr.bf16.mxu1 %v5026_v6  ;;  %4482 = vmatpush3.bf16.msra.mxu0 %v1132_v49  ;;  %v1302_v43 = vpack.c.bf16 %v1299_v39, %v1298_v41  ;;  %v1293_v49 = vld [vmem:[%s6318_s1 + $0xb1] sm:$0xff] }
 0x35b   : > { %4493 = vmatprep.subr.bf16.mxu0 %v5026_v6 }
 0x360   : > { %4478 = vmatmul.mubr.msk.bf16.vlgmr.msra.gmra.mrb[12].mxu1 %vm935_vm9, %v1040_v45  ;;  %v1300_v45 = vld [vmem:[%s6318_s1 + $0xc9] sm:$0xff] }
 0x361   : > { %4489 = vmatprep.mubr.msk.bf16.mxu1 %vm5027_vm7, %v5026_v6  ;;  %4488 = vmatpush3.bf16.msra.mxu1 %v1127_v51  ;;  %v1303_v50 = vpack.c.bf16 %v1301_v46, %v1300_v45  ;;  %v1295_v51 = vpack.c.bf16 %v1293_v49, %v1292_v48 }
 0x362   : > { %4499 = vmatprep.subr.bf16.mxu1 %v5026_v6 }
 0x42a   : > { %v1031_v53 = vpop.f32.mrb[12].mxu0 }
 0x42b   : > { %v987_v52 = vpop.f32.mrb[8].mxu1  ;;  %v4473_v56 = vpop.f32.mrb[13].mxu0 }
 0x42c   : > { %v1032_v54 = vadd.f32 %v1031_v53, %v987_v52  ;;  %v4467_v55 = vpop.f32.mrb[9].mxu1  ;;  %v1034_v58 = vpop.f32.mrb[14].mxu0 }
 0x42d   : > { %v990_v57 = vpop.f32.mrb[10].mxu1  ;;  %v4474_v61 = vpop.f32.mrb[15].mxu0 }
 0x42e   : > { %v1035_v59 = vadd.f32 %v1034_v58, %v990_v57  ;;  %v4468_v60 = vpop.f32.mrb[11].mxu1 }
 0x433   : > { %v1081_v62 = vpop.f32.mrb[12].mxu1 }
 0x434   : > { %v1088_v0 = vadd.f32 %v1081_v62, %v1032_v54  ;;  %v4479_v1 = vpop.f32.mrb[13].mxu1  ;;  %v4140_v62 = vld [vmem:[%s6319_s2 + $0x4] ss:$0 sm:$0xff] }
 0x435   : > { %v1084_v2 = vpop.f32.mrb[14].mxu1 }
 0x436   : > { %v1095_v3 = vadd.f32 %v4136_v63, %v1088_v0  ;;  %v1089_v4 = vadd.f32 %v1084_v2, %v1035_v59  ;;  %v4480_v5 = vpop.f32.mrb[15].mxu1 }
 0x438   : > { %v1096_v7 = vadd.f32 %v4136_v63, %v1089_v4  ;;  %v1099_v8 = vmul.f32 0.044715, %v1095_v3  ;;  %v1097_v19 = vmul.f32 0.5, %v1095_v3 }
 0x43a   : > { %v1100_v9 = vmul.f32 0.044715, %v1096_v7  ;;  %v1101_v10 = vmul.f32 %v1099_v8, %v1095_v3  ;;  %v1098_v23 = vmul.f32 0.5, %v1096_v7 }
 0x43c   : > { %v1103_v11 = vmul.f32 %v1101_v10, %v1095_v3  ;;  %v1102_v12 = vmul.f32 %v1100_v9, %v1096_v7 }
 0x43e   : > { %v1105_v13 = vadd.f32 %v1103_v11, %v1095_v3  ;;  %v1104_v14 = vmul.f32 %v1102_v12, %v1096_v7 }
 0x440   : > { %v1107_v15 = vmul.f32 0.7978846, %v1105_v13  ;;  %v1106_v16 = vadd.f32 %v1104_v14, %v1096_v7  ;;  %v1392_v14 = vld [vmem:[%s6318_s1 + $0xd9] sm:$0xff] }
 0x442   : > { %4973 = vtanh.f32 %v1107_v15  ;;  %v1108_v17 = vmul.f32 0.7978846, %v1106_v16  ;;  %v1393_v15 = vld [vmem:[%s6318_s1 + $0xe1] sm:$0xff] }
 0x444   : > { %4975 = vtanh.f32 %v1108_v17 }
 0x44c   : > { %v4974_v18 = vpop.eup %4973 }
 0x44d   : > { %v1111_v20 = vadd.f32 1.0, %v4974_v18  ;;  %v1396_v18 = vpack.c.bf16 %v1393_v15, %v1392_v14 }
 0x44e   : > { %v4976_v21 = vpop.eup %4975 }
 0x44f   : > { %v1113_v22 = vmul.f32 %v1111_v20, %v1097_v19  ;;  %v1112_v25 = vadd.f32 1.0, %v4976_v21  ;;  %v1394_v21 = vld [vmem:[%s6318_s1 + $0xe9] sm:$0xff] }
 0x451   : > { %2947 = vrot.lane.b32.xlu1 %v1113_v22, %s5028_s18  ;;  %1115 = vst.msk [vmem:[#allocation2 + $0x1] sm:$0xff] %vm935_vm9, %v1113_v22  ;;  %v1114_v26 = vmul.f32 %v1112_v25, %v1098_v23  ;;  %v1395_v22 = vld [vmem:[%s6318_s1 + $0xf1] sm:$0xff] }
 0x452   : > { %v1397_v23 = vpack.c.bf16 %v1395_v22, %v1394_v21  ;;  %v1642_v21 = vld [vmem:[%s6318_s1 + $0x161] sm:$0xff] }
 0x453   : > { %1116 = vst.msk [vmem:[#allocation2 + $0x9] sm:$0xff] %vm935_vm9, %v1114_v26 }
 0x455   : > { %2949 = vrot.lane.b32.xlu1 %v1114_v26, %s5028_s18  ;;  %s210_s18 = scalar_lea.vmem %s6321_s4, %s5073_s21 }
 0x459   : > { %3432 = vrot.lane.b32.xlu1 %v5159_v31, %s5029_s19 }
 0x45a   : > { %v1117_v28 = vld [vmem:[#allocation2 + $0x1] ss:$2 sm:$0xff]  ;;  %v1118_v29 = vld [vmem:[#allocation2 + $0x2] ss:$2 sm:$0xff] }
 0x45b   : > { %v1119_v32 = vmax.f32 %v1117_v28, %v1118_v29  ;;  %1121 = vst.msk [vmem:[#allocation2 + $0x9] sm:$0x1] %vm932_vm8, %v5026_v6  ;;  %v1475_v28 = vld [vmem:[%s6318_s1 + $0x119] sm:$0xff]  ;;  %v1476_v29 = vld [vmem:[%s6318_s1 + $0x121] sm:$0xff] }
 0x45c   : > { %v1479_v33 = vpack.c.bf16 %v1476_v29, %v1475_v28  ;;  %v1643_v28 = vld [vmem:[%s6318_s1 + $0x169] sm:$0xff]  ;;  %v1644_v29 = vld [vmem:[%s6318_s1 + $0x171] sm:$0xff] }
 0x45d   : > { %1122 = vst.msk [vmem:[#allocation2 + $0x1] sm:$0xff] %vm935_vm9, %v1119_v32  ;;  %3436 = vrot.lane.b32.xlu1 %v5155_v30, %s5029_s19  ;;  %v1467_v32 = vld [vmem:[%s6318_s1 + $0xf9] sm:$0xff] }
 0x464   : > { %v1123_v31 = vld [vmem:[#allocation2] sm:$0xff] }
 0x465   : > { %v1219_v35 = vld [vmem:[#allocation2 + $0x2] sm:$0xff]  ;;  %1284 = vst.msk [vmem:[#allocation2] sm:$0x1] %vm1283_vm10, %v5026_v6  ;;  %v1124_v30 = vpack.c.bf16 %v1123_v31, %v1123_v31 }
 0x466   : > { %v1128_v36 = vld [vmem:[#allocation2 + $0x1] sm:$0xff]  ;;  %1285 = vst.msk [vmem:[#allocation2 + $0x9] sm:$0x1] %vm1283_vm10, %v5026_v6  ;;  %v1220_v40 = vpack.c.bf16 %v1219_v35, %v1219_v35  ;;  %v1477_v31 = vld [vmem:[%s6318_s1 + $0x129] sm:$0xff]  ;;  %v1478_v35 = vld [vmem:[%s6318_s1 + $0x131] sm:$0xff] }
 0x467   : > { %v1129_v38 = vpack.c.bf16 %v1128_v36, %v1128_v36  ;;  %4490 = vmatmul.mubr.msk.bf16.vlgmr.msra.gmra.mrb[16].mxu1 %vm935_vm9, %v1124_v30  ;;  %v1471_v36 = vpack.c.bf16 %v1468_v34, %v1467_v32  ;;  %v1480_v30 = vpack.c.bf16 %v1478_v35, %v1477_v31  ;;  %v1659_v32 = vld [vmem:[%s6318_s1 + $0x1b9] sm:$0xff]  ;;  %v1660_v34 = vld [vmem:[%s6318_s1 + $0x1c1] sm:$0xff] }
 0x468   : > { %4503 = vmatprep.mubr.msk.bf16.mxu1 %vm5027_vm7, %v5026_v6  ;;  %4500 = vmatpush3.bf16.msra.mxu1 %v1302_v43  ;;  %v1645_v31 = vld [vmem:[%s6318_s1 + $0x179] sm:$0xff]  ;;  %v1646_v35 = vld [vmem:[%s6318_s1 + $0x181] sm:$0xff] }
 0x469   : > { %4484 = vmatmul.mubr.msk.bf16.vlgmr.msra.gmra.mrb[16].mxu0 %vm935_vm9, %v1129_v38  ;;  %4501 = vmatprep.subr.bf16.mxu1 %v5026_v6  ;;  %v1470_v38 = vld [vmem:[%s6318_s1 + $0x111] sm:$0xff] }
 0x46a   : > { %4494 = vmatpush3.bf16.msra.mxu0 %v1223_v37  ;;  %4495 = vmatprep.mubr.msk.bf16.mxu0 %vm5027_vm7, %v5026_v6  ;;  %v1469_v37 = vld [vmem:[%s6318_s1 + $0x109] sm:$0xff] }
 0x46b   : > { %4507 = vmatprep.subr.bf16.mxu0 %v5026_v6 }
 0x46c   : > { %4502 = vmatpush3.bf16.msra.mxu1 %v1303_v50  ;;  %v4144_v50 = vld [vmem:[%s6319_s2 + $0x5] ss:$0 sm:$0xff] }
 0x46d   : > { %4515 = vmatprep.subr.bf16.mxu1 %v5026_v6 }
 0x471   : > { %4496 = vmatmul.mubr.msk.bf16.vlgmr.msra.gmra.mrb[20].mxu0 %vm935_vm9, %v1220_v40  ;;  %v1472_v40 = vpack.c.bf16 %v1470_v38, %v1469_v37  ;;  %v1651_v37 = vpack.c.bf16 %v1646_v35, %v1645_v31  ;;  %v1661_v38 = vld [vmem:[%s6318_s1 + $0x1c9] sm:$0xff]  ;;  %v1838_v31 = vld [vmem:[%s6318_s1 + $0x231] sm:$0xff] }
 0x472   : > { %4511 = vmatprep.mubr.msk.bf16.mxu0 %vm5027_vm7, %v5026_v6  ;;  %4508 = vmatpush3.bf16.msra.mxu0 %v1294_v47  ;;  %v1896_v35 = vld [vmem:[%s6318_s1 + $0x269] sm:$0xff] }
 0x473   : > { %4509 = vmatprep.subr.bf16.mxu0 %v5026_v6 }
 0x476   : > { %4510 = vmatpush3.bf16.msra.mxu0 %v1295_v51 }
 0x477   : > { %4523 = vmatprep.subr.bf16.mxu0 %v5026_v6 }
 0x53a   : > { %v1213_v53 = vpop.f32.mrb[16].mxu1 }
 0x53b   : > { %v4491_v56 = vpop.f32.mrb[17].mxu1 }
 0x53c   : > { %v1170_v52 = vpop.f32.mrb[16].mxu0  ;;  %v1216_v58 = vpop.f32.mrb[18].mxu1 }
 0x53d   : > { %v1214_v54 = vadd.f32 %v1213_v53, %v1170_v52  ;;  %v4485_v55 = vpop.f32.mrb[17].mxu0  ;;  %v4492_v60 = vpop.f32.mrb[19].mxu1 }
 0x53e   : > { %v1173_v57 = vpop.f32.mrb[18].mxu0 }
 0x53f   : > { %v4486_v59 = vpop.f32.mrb[19].mxu0 }
 0x544   : > { %v1261_v61 = vpop.f32.mrb[20].mxu0 }
 0x545   : > { %v1267_v63 = vadd.f32 %v1261_v61, %v1214_v54  ;;  %v4497_v0 = vpop.f32.mrb[21].mxu0 }
 0x546   : > { %v1264_v1 = vpop.f32.mrb[22].mxu0 }
 0x547   : > { %v1273_v2 = vadd.f32 %v4140_v62, %v1267_v63  ;;  %v4498_v3 = vpop.f32.mrb[23].mxu0 }
 0x549   : > { %v1275_v4 = vmul.f32 0.044715, %v1273_v2  ;;  %v1274_v11 = vmul.f32 0.5, %v1273_v2 }
 0x54b   : > { %v1276_v5 = vmul.f32 %v1275_v4, %v1273_v2  ;;  %v1569_v4 = vld [vmem:[%s6318_s1 + $0x139] sm:$0xff] }
 0x54d   : > { %v1277_v7 = vmul.f32 %v1276_v5, %v1273_v2  ;;  %v1570_v5 = vld [vmem:[%s6318_s1 + $0x141] sm:$0xff] }
 0x54f   : > { %v1278_v8 = vadd.f32 %v1277_v7, %v1273_v2 }
 0x551   : > { %v1279_v9 = vmul.f32 0.7978846, %v1278_v8 }
 0x553   : > { %4977 = vtanh.f32 %v1279_v9  ;;  %v1573_v9 = vpack.c.bf16 %v1570_v5, %v1569_v4  ;;  %v1756_v5 = vld [vmem:[%s6318_s1 + $0x1d9] sm:$0xff] }
 0x55d   : > { %v4978_v10 = vpop.eup %4977 }
 0x55e   : > { %v1281_v12 = vadd.f32 1.0, %v4978_v10 }
 0x560   : > { %v1282_v13 = vmul.f32 %v1281_v12, %v1274_v11  ;;  %v1571_v12 = vld [vmem:[%s6318_s1 + $0x149] sm:$0xff] }
 0x562   : > { %1287 = vst.msk [vmem:[#allocation2 + $0x1] sm:$0xff] %vm1286_vm11, %v1282_v13  ;;  %v1572_v13 = vld [vmem:[%s6318_s1 + $0x151] sm:$0xff] }
 0x563   : > { %v1574_v14 = vpack.c.bf16 %v1572_v13, %v1571_v12 }
 0x569   : > { %v1288_v16 = vld [vmem:[#allocation2] sm:$0xff] }
 0x56a   : > { %v1296_v17 = vld [vmem:[#allocation2 + $0x1] sm:$0xff]  ;;  %1461 = vst.msk [vmem:[#allocation2] sm:$0x1] %vm1283_vm10, %v5026_v6  ;;  %v1289_v20 = vpack.c.bf16 %v1288_v16, %v1288_v16 }
 0x56b   : > { %v1297_v19 = vpack.c.bf16 %v1296_v17, %v1296_v17  ;;  %v1390_v25 = vld [vmem:[#allocation2 + $0x2] sm:$0xff]  ;;  %v1655_v17 = vld [vmem:[%s6318_s1 + $0x199] sm:$0xff] }
 0x56c   : > { %4512 = vmatmul.mubr.msk.bf16.vlgmr.msra.gmra.mrb[24].mxu0 %vm1286_vm11, %v1289_v20  ;;  %v1391_v26 = vpack.c.bf16 %v1390_v25, %v1390_v25  ;;  %v1641_v20 = vld [vmem:[%s6318_s1 + $0x159] sm:$0xff]  ;;  %v1658_v25 = vld [vmem:[%s6318_s1 + $0x1b1] sm:$0xff]  ;;  %2359 = vst.msk [vmem:[#allocation2 + $0x9] sm:$0x1] %vm1634_vm13, %v5026_v6 }
 0x56d   : > { %4504 = vmatmul.mubr.msk.bf16.vlgmr.msra.gmra.mrb[20].mxu1 %vm1286_vm11, %v1297_v19  ;;  %4527 = vmatprep.mubr.msk.bf16.mxu0 %vm5027_vm7, %v5026_v6  ;;  %v1649_v22 = vpack.c.bf16 %v1642_v21, %v1641_v20  ;;  %v1762_v20 = vld [vmem:[%s6318_s1 + $0x209] sm:$0xff]  ;;  %v1763_v21 = vld [vmem:[%s6318_s1 + $0x211] sm:$0xff] }
 0x56e   : > { %4516 = vmatpush3.bf16.msra.mxu1 %v1396_v18  ;;  %4519 = vmatprep.mubr.msk.bf16.mxu1 %vm5027_vm7, %v5026_v6  ;;  %v1656_v18 = vld [vmem:[%s6318_s1 + $0x1a1] sm:$0xff] }
 0x56f   : > { %4517 = vmatprep.subr.bf16.mxu1 %v5026_v6  ;;  %4524 = vmatpush3.bf16.msra.mxu0 %v1479_v33  ;;  %v1663_v19 = vpack.c.bf16 %v1656_v18, %v1655_v17  ;;  %v1650_v33 = vpack.c.bf16 %v1644_v29, %v1643_v28  ;;  %v1760_v17 = vld [vmem:[%s6318_s1 + $0x1f9] sm:$0xff]  ;;  %v1761_v18 = vld [vmem:[%s6318_s1 + $0x201] sm:$0xff] }
 0x570   : > { %4525 = vmatprep.subr.bf16.mxu0 %v5026_v6  ;;  %v1894_v28 = vld [vmem:[%s6318_s1 + $0x259] sm:$0xff] }
 0x572   : > { %4518 = vmatpush3.bf16.msra.mxu1 %v1397_v23  ;;  %v1657_v23 = vld [vmem:[%s6318_s1 + $0x1a9] sm:$0xff] }
 0x573   : > { %4531 = vmatprep.subr.bf16.mxu1 %v5026_v6  ;;  %4526 = vmatpush3.bf16.msra.mxu0 %v1480_v30  ;;  %v1662_v30 = vld [vmem:[%s6318_s1 + $0x1d1] sm:$0xff] }
 0x574   : > { %4539 = vmatprep.subr.bf16.mxu0 %v5026_v6 }
 0x575   : > { %4520 = vmatmul.mubr.msk.bf16.vlgmr.msra.gmra.mrb[24].mxu1 %vm1286_vm11, %v1391_v26  ;;  %v1664_v26 = vpack.c.bf16 %v1658_v25, %v1657_v23  ;;  %v1835_v25 = vld [vmem:[%s6318_s1 + $0x219] sm:$0xff] }
 0x576   : > { %4535 = vmatprep.mubr.msk.bf16.mxu1 %vm5027_vm7, %v5026_v6  ;;  %4532 = vmatpush3.bf16.msra.mxu1 %v1471_v36  ;;  %v1665_v36 = vpack.c.bf16 %v1660_v34, %v1659_v32  ;;  %v1895_v32 = vld [vmem:[%s6318_s1 + $0x261] sm:$0xff]  ;;  %v1837_v34 = vld [vmem:[%s6318_s1 + $0x229] sm:$0xff] }
 0x577   : > { %4533 = vmatprep.subr.bf16.mxu1 %v5026_v6 }
 0x57a   : > { %4534 = vmatpush3.bf16.msra.mxu1 %v1472_v40  ;;  %v1647_v40 = vld [vmem:[%s6318_s1 + $0x189] sm:$0xff] }
 0x57b   : > { %4547 = vmatprep.subr.bf16.mxu1 %v5026_v6 }
 0x63f   : > { %v1384_v39 = vpop.f32.mrb[24].mxu0 }
 0x640   : > { %v1341_v41 = vpop.f32.mrb[20].mxu1  ;;  %v4513_v44 = vpop.f32.mrb[25].mxu0 }
 0x641   : > { %v1385_v42 = vadd.f32 %v1384_v39, %v1341_v41  ;;  %v4505_v43 = vpop.f32.mrb[21].mxu1  ;;  %v1387_v46 = vpop.f32.mrb[26].mxu0  ;;  %v1648_v41 = vld [vmem:[%s6318_s1 + $0x191] sm:$0xff]  ;;  %v1666_v39 = vpack.c.bf16 %v1662_v30, %v1661_v38  ;;  %v1839_v30 = vld [vmem:[%s6318_s1 + $0x239] sm:$0xff] }
 0x642   : > { %v1344_v45 = vpop.f32.mrb[22].mxu1  ;;  %v4514_v48 = vpop.f32.mrb[27].mxu0 }
 0x643   : > { %v4506_v47 = vpop.f32.mrb[23].mxu1 }
 0x648   : > { %v1435_v49 = vpop.f32.mrb[24].mxu1 }
 0x649   : > { %v1441_v51 = vadd.f32 %v1435_v49, %v1385_v42  ;;  %v4521_v52 = vpop.f32.mrb[25].mxu1  ;;  %v1652_v42 = vpack.c.bf16 %v1648_v41, %v1647_v40  ;;  %v1840_v40 = vld [vmem:[%s6318_s1 + $0x241] sm:$0xff]  ;;  %v1898_v41 = vld [vmem:[%s6318_s1 + $0x279] sm:$0xff] }
 0x64a   : > { %v1438_v53 = vpop.f32.mrb[26].mxu1 }
 0x64b   : > { %v1447_v54 = vadd.f32 %v4144_v50, %v1441_v51  ;;  %v4522_v55 = vpop.f32.mrb[27].mxu1  ;;  %v4148_v53 = vld [vmem:[%s6319_s2 + $0x6] ss:$0 sm:$0xff] }
 0x64d   : > { %v1449_v56 = vmul.f32 0.044715, %v1447_v54  ;;  %v1448_v62 = vmul.f32 0.5, %v1447_v54 }
 0x64f   : > { %v1450_v57 = vmul.f32 %v1449_v56, %v1447_v54 }
 0x651   : > { %v1451_v58 = vmul.f32 %v1450_v57, %v1447_v54 }
 0x653   : > { %v1452_v59 = vadd.f32 %v1451_v58, %v1447_v54 }
 0x655   : > { %v1453_v60 = vmul.f32 0.7978846, %v1452_v59 }
 0x657   : > { %4979 = vtanh.f32 %v1453_v60 }
 0x661   : > { %v4980_v61 = vpop.eup %4979 }
 0x662   : > { %v1455_v63 = vadd.f32 1.0, %v4980_v61 }
 0x664   : > { %v5362_v0 = vmul.f32 %v1455_v63, %v1448_v62 }
 0x666   : > { %1457 = vst.msk [vmem:[#allocation2 + $0x1] sm:$0xff] %vm1286_vm11, %v5362_v0 }
 0x66d   : > { %v1458_v1 = vld [vmem:[#allocation2 + $0x1] ss:$2 sm:$0xf]  ;;  %v1459_v2 = vld [vmem:[#allocation2 + $0x2] ss:$2 sm:$0xf] }
 0x66e   : > { %v1460_v3 = vmax.f32 %v1458_v1, %v1459_v2  ;;  %1462 = vst.msk [vmem:[#allocation2 + $0x5] sm:$0x1] %vm1283_vm10, %v5026_v6 }
 0x670   : > { %1464 = vst.msk [vmem:[#allocation2 + $0x1] sm:$0xf] %vm1463_vm12, %v1460_v3 }
 0x677   : > { %v1465_v7 = vld [vmem:[#allocation2] sm:$0xf] }
 0x678   : > { %v1473_v8 = vld [vmem:[#allocation2 + $0x1] sm:$0xf]  ;;  %v1466_v11 = vpack.c.bf16 %v1465_v7, %v1465_v7  ;;  %1635 = vst.msk [vmem:[#allocation2] sm:$0x1] %vm1634_vm13, %v5026_v6 }
 0x679   : > { %v1474_v10 = vpack.c.bf16 %v1473_v8, %v1473_v8  ;;  %v1567_v15 = vld [vmem:[#allocation2 + $0x2] sm:$0xf] }
 0x67a   : > { %4536 = vmatmul.mubr.msk.bf16.vlgmr.msra.gmra.mrb[28].mxu1 %vm1286_vm11, %v1466_v11  ;;  %v1568_v16 = vpack.c.bf16 %v1567_v15, %v1567_v15  ;;  %1636 = vst.msk [vmem:[#allocation2 + $0x5] sm:$0x1] %vm1634_vm13, %v5026_v6  ;;  %v1757_v7 = vld [vmem:[%s6318_s1 + $0x1e1] sm:$0xff]  ;;  %v1759_v15 = vld [vmem:[%s6318_s1 + $0x1f1] sm:$0xff] }
 0x67b   : > { %4528 = vmatmul.mubr.msk.bf16.vlgmr.msra.gmra.mrb[28].mxu0 %vm1286_vm11, %v1474_v10  ;;  %4555 = vmatprep.mubr.msk.bf16.mxu1 %vm5027_vm7, %v5026_v6  ;;  %v1764_v11 = vpack.c.bf16 %v1757_v7, %v1756_v5 }
 0x67c   : > { %4540 = vmatpush3.bf16.msra.mxu0 %v1573_v9  ;;  %4543 = vmatprep.mubr.msk.bf16.mxu0 %vm5027_vm7, %v5026_v6 }
 0x67d   : > { %4541 = vmatprep.subr.bf16.mxu0 %v5026_v6  ;;  %4548 = vmatpush3.bf16.msra.mxu1 %v1663_v19  ;;  %v1766_v19 = vpack.c.bf16 %v1761_v18, %v1760_v17 }
 0x67e   : > { %4549 = vmatprep.subr.bf16.mxu1 %v5026_v6 }
 0x680   : > { %4542 = vmatpush3.bf16.msra.mxu0 %v1574_v14  ;;  %v1758_v14 = vld [vmem:[%s6318_s1 + $0x1e9] sm:$0xff] }
 0x681   : > { %4559 = vmatprep.subr.bf16.mxu0 %v5026_v6  ;;  %4550 = vmatpush3.bf16.msra.mxu1 %v1664_v26  ;;  %v1836_v26 = vld [vmem:[%s6318_s1 + $0x221] sm:$0xff] }
 0x682   : > { %4551 = vmatprep.subr.bf16.mxu1 %v5026_v6  ;;  %v1843_v29 = vpack.c.bf16 %v1836_v26, %v1835_v25  ;;  %v1958_v25 = vld [vmem:[%s6318_s1 + $0x2a9] sm:$0xff] }
 0x683   : > { %4544 = vmatmul.mubr.msk.bf16.vlgmr.msra.gmra.mrb[32].mxu0 %vm1286_vm11, %v1568_v16  ;;  %v1765_v16 = vpack.c.bf16 %v1759_v15, %v1758_v14  ;;  %v1983_v14 = vld [vmem:[%s6318_s1 + $0x321] sm:$0xff]  ;;  %v1956_v15 = vld [vmem:[%s6318_s1 + $0x299] sm:$0xff] }
 0x684   : > { %4567 = vmatprep.mubr.msk.bf16.mxu0 %vm5027_vm7, %v5026_v6  ;;  %4560 = vmatpush3.bf16.msra.mxu0 %v1649_v22  ;;  %v1767_v22 = vpack.c.bf16 %v1763_v21, %v1762_v20 }
 0x685   : > { %4561 = vmatprep.subr.bf16.mxu0 %v5026_v6  ;;  %4552 = vmatpush3.bf16.msra.mxu1 %v1665_v36  ;;  %v1844_v36 = vpack.c.bf16 %v1838_v31, %v1837_v34 }
 0x686   : > { %4553 = vmatprep.subr.bf16.mxu1 %v5026_v6 }
 0x688   : > { %4562 = vmatpush3.bf16.msra.mxu0 %v1650_v33  ;;  %v1902_v33 = vpack.c.bf16 %v1895_v32, %v1894_v28  ;;  %v1987_v32 = vld [vmem:[%s6318_s1 + $0x341] sm:$0xff] }
 0x689   : > { %4563 = vmatprep.subr.bf16.mxu0 %v5026_v6  ;;  %4554 = vmatpush3.bf16.msra.mxu1 %v1666_v39  ;;  %v1845_v39 = vpack.c.bf16 %v1840_v40, %v1839_v30 }
 0x68a   : > { %4571 = vmatprep.subr.bf16.mxu1 %v5026_v6 }
 0x68c   : > { %4564 = vmatpush3.bf16.msra.mxu0 %v1651_v37  ;;  %v1897_v37 = vld [vmem:[%s6318_s1 + $0x271] sm:$0xff] }
 0x68d   : > { %4565 = vmatprep.subr.bf16.mxu0 %v5026_v6  ;;  %v1903_v38 = vpack.c.bf16 %v1897_v37, %v1896_v35  ;;  %v1988_v35 = vld [vmem:[%s6318_s1 + $0x349] sm:$0xff] }
 0x68e   : > { %v1962_v37 = vld [vmem:[%s6318_s1 + $0x2c9] sm:$0xff] }
 0x690   : > { %4566 = vmatpush3.bf16.msra.mxu0 %v1652_v42  ;;  %v1899_v42 = vld [vmem:[%s6318_s1 + $0x281] sm:$0xff] }
 0x691   : > { %4583 = vmatprep.subr.bf16.mxu0 %v5026_v6 }
 0x74d   : > { %v1561_v44 = vpop.f32.mrb[28].mxu1 }
 0x74e   : > { %v1518_v43 = vpop.f32.mrb[28].mxu0  ;;  %v4537_v47 = vpop.f32.mrb[29].mxu1 }
 0x74f   : > { %v1562_v45 = vadd.f32 %v1561_v44, %v1518_v43  ;;  %v4529_v46 = vpop.f32.mrb[29].mxu0  ;;  %v1564_v49 = vpop.f32.mrb[30].mxu1  ;;  %v1904_v43 = vpack.c.bf16 %v1899_v42, %v1898_v41  ;;  %v1841_v44 = vld [vmem:[%s6318_s1 + $0x249] sm:$0xff]  ;;  %v1990_v41 = vld [vmem:[%s6318_s1 + $0x359] sm:$0xff] }
 0x750   : > { %v1521_v48 = vpop.f32.mrb[30].mxu0  ;;  %v4538_v51 = vpop.f32.mrb[31].mxu1  ;;  %v1900_v46 = vld [vmem:[%s6318_s1 + $0x289] sm:$0xff]  ;;  %v1964_v42 = vld [vmem:[%s6318_s1 + $0x2d9] sm:$0xff] }
 0x751   : > { %v4530_v50 = vpop.f32.mrb[31].mxu0  ;;  %v1901_v48 = vld [vmem:[%s6318_s1 + $0x291] sm:$0xff] }
 0x752   : > { %v1905_v49 = vpack.c.bf16 %v1901_v48, %v1900_v46  ;;  %v1992_v46 = vld [vmem:[%s6318_s1 + $0x369] sm:$0xff] }
 0x756   : > { %v1612_v52 = vpop.f32.mrb[32].mxu0 }
 0x757   : > { %v1618_v54 = vadd.f32 %v1612_v52, %v1562_v45  ;;  %v4545_v55 = vpop.f32.mrb[33].mxu0  ;;  %v1842_v45 = vld [vmem:[%s6318_s1 + $0x251] sm:$0xff] }
 0x758   : > { %v1615_v56 = vpop.f32.mrb[34].mxu0  ;;  %v1846_v47 = vpack.c.bf16 %v1842_v45, %v1841_v44 }
 0x759   : > { %v1624_v57 = vadd.f32 %v4148_v53, %v1618_v54  ;;  %v4546_v58 = vpop.f32.mrb[35].mxu0 }
 0x75b   : > { %v1626_v59 = vmul.f32 0.044715, %v1624_v57  ;;  %v1625_v2 = vmul.f32 0.5, %v1624_v57 }
 0x75d   : > { %v1627_v60 = vmul.f32 %v1626_v59, %v1624_v57 }
 0x75f   : > { %v1628_v61 = vmul.f32 %v1627_v60, %v1624_v57  ;;  %v4152_v60 = vld [vmem:[%s6319_s2 + $0x7] ss:$0 sm:$0xff] }
 0x761   : > { %v1629_v62 = vadd.f32 %v1628_v61, %v1624_v57 }
 0x763   : > { %v1630_v63 = vmul.f32 0.7978846, %v1629_v62 }
 0x765   : > { %4981 = vtanh.f32 %v1630_v63 }
 0x76f   : > { %v4982_v1 = vpop.eup %4981 }
 0x770   : > { %v1632_v3 = vadd.f32 1.0, %v4982_v1 }
 0x772   : > { %v1633_v4 = vmul.f32 %v1632_v3, %v1625_v2 }
 0x774   : > { %1638 = vst.msk [vmem:[#allocation2 + $0x1] sm:$0xf] %vm1637_vm14, %v1633_v4 }
 0x77b   : > { %v1639_v8 = vld [vmem:[#allocation2] sm:$0xf] }
 0x77c   : > { %v1653_v9 = vld [vmem:[#allocation2 + $0x1] sm:$0xf]  ;;  %1831 = vst [vmem:[#allocation2] sm:$0x1] %v5026_v6  ;;  %v1640_v13 = vpack.c.bf16 %v1639_v8, %v1639_v8 }
 0x77d   : > { %v1754_v10 = vld [vmem:[#allocation2 + $0x2] sm:$0xf]  ;;  %v1654_v12 = vpack.c.bf16 %v1653_v9, %v1653_v9 }
 0x77e   : > { %1832 = vst [vmem:[#allocation2 + $0x5] sm:$0x1] %v5026_v6  ;;  %4568 = vmatmul.mubr.msk.bf16.vlgmr.msra.gmra.mrb[36].mxu0 %vm1667_vm15, %v1640_v13  ;;  %v1755_v23 = vpack.c.bf16 %v1754_v10, %v1754_v10  ;;  %v1982_v13 = vld [vmem:[%s6318_s1 + $0x319] sm:$0xff] }
 0x77f   : > { %4556 = vmatmul.mubr.msk.bf16.vlgmr.msra.gmra.mrb[32].mxu1 %vm1667_vm15, %v1654_v12  ;;  %4591 = vmatprep.mubr.msk.bf16.mxu0 %vm5027_vm7, %v5026_v6 }
 0x780   : > { %4572 = vmatpush3.bf16.msra.mxu1 %v1764_v11  ;;  %4579 = vmatprep.mubr.msk.bf16.mxu1 %vm5027_vm7, %v5026_v6 }
 0x781   : > { %4573 = vmatprep.subr.bf16.mxu1 %v5026_v6  ;;  %4584 = vmatpush3.bf16.msra.mxu0 %v1843_v29  ;;  %v1986_v29 = vld [vmem:[%s6318_s1 + $0x339] sm:$0xff] }
 0x782   : > { %4585 = vmatprep.subr.bf16.mxu0 %v5026_v6  ;;  %v2000_v34 = vpack.c.bf16 %v1987_v32, %v1986_v29  ;;  %v2095_v29 = vld [vmem:[%s6318_s1 + $0x3d1] sm:$0xff] }
 0x784   : > { %4574 = vmatpush3.bf16.msra.mxu1 %v1765_v16  ;;  %v1957_v16 = vld [vmem:[%s6318_s1 + $0x2a1] sm:$0xff] }
 0x785   : > { %4575 = vmatprep.subr.bf16.mxu1 %v5026_v6  ;;  %4586 = vmatpush3.bf16.msra.mxu0 %v1844_v36  ;;  %v1972_v21 = vpack.c.bf16 %v1957_v16, %v1956_v15  ;;  %v1989_v36 = vld [vmem:[%s6318_s1 + $0x351] sm:$0xff]  ;;  %v2089_v15 = vld [vmem:[%s6318_s1 + $0x3a1] sm:$0xff] }
 0x786   : > { %4587 = vmatprep.subr.bf16.mxu0 %v5026_v6  ;;  %v2001_v30 = vpack.c.bf16 %v1989_v36, %v1988_v35  ;;  %v2099_v35 = vld [vmem:[%s6318_s1 + $0x3f1] sm:$0xff] }
 0x788   : > { %4576 = vmatpush3.bf16.msra.mxu1 %v1766_v19  ;;  %v1998_v19 = vpack.c.bf16 %v1983_v14, %v1982_v13  ;;  %v2088_v14 = vld [vmem:[%s6318_s1 + $0x399] sm:$0xff] }
 0x789   : > { %4577 = vmatprep.subr.bf16.mxu1 %v5026_v6  ;;  %4588 = vmatpush3.bf16.msra.mxu0 %v1845_v39  ;;  %v1991_v39 = vld [vmem:[%s6318_s1 + $0x361] sm:$0xff] }
 0x78a   : > { %4589 = vmatprep.subr.bf16.mxu0 %v5026_v6  ;;  %v2002_v44 = vpack.c.bf16 %v1991_v39, %v1990_v41  ;;  %v2103_v41 = vld [vmem:[%s6318_s1 + $0x411] sm:$0xff] }
 0x78c   : > { %4578 = vmatpush3.bf16.msra.mxu1 %v1767_v22  ;;  %v1984_v22 = vld [vmem:[%s6318_s1 + $0x329] sm:$0xff] }
 0x78d   : > { %4595 = vmatprep.subr.bf16.mxu1 %v5026_v6  ;;  %4590 = vmatpush3.bf16.msra.mxu0 %v1846_v47  ;;  %v1993_v47 = vld [vmem:[%s6318_s1 + $0x371] sm:$0xff] }
 0x78e   : > { %4607 = vmatprep.subr.bf16.mxu0 %v5026_v6  ;;  %v2003_v48 = vpack.c.bf16 %v1993_v47, %v1992_v46  ;;  %v2287_v46 = vld [vmem:[%s6318_s1 + $0x499] sm:$0xff]  ;;  %v2288_v47 = vld [vmem:[%s6318_s1 + $0x4a1] sm:$0xff] }
 0x78f   : > { %4580 = vmatmul.mubr.msk.bf16.vlgmr.msra.gmra.mrb[36].mxu1 %vm1667_vm15, %v1755_v23  ;;  %v1985_v23 = vld [vmem:[%s6318_s1 + $0x331] sm:$0xff] }
 0x790   : > { %4603 = vmatprep.mubr.msk.bf16.mxu1 %vm5027_vm7, %v5026_v6  ;;  %4596 = vmatpush3.bf16.msra.mxu1 %v1902_v33  ;;  %v1999_v26 = vpack.c.bf16 %v1985_v23, %v1984_v22  ;;  %v1961_v33 = vld [vmem:[%s6318_s1 + $0x2c1] sm:$0xff]  ;;  %v2091_v22 = vld [vmem:[%s6318_s1 + $0x3b1] sm:$0xff] }
 0x791   : > { %4597 = vmatprep.subr.bf16.mxu1 %v5026_v6 }
 0x794   : > { %4598 = vmatpush3.bf16.msra.mxu1 %v1903_v38  ;;  %v1963_v38 = vld [vmem:[%s6318_s1 + $0x2d1] sm:$0xff] }
 0x795   : > { %4599 = vmatprep.subr.bf16.mxu1 %v5026_v6  ;;  %v1975_v40 = vpack.c.bf16 %v1963_v38, %v1962_v37  ;;  %v2100_v37 = vld [vmem:[%s6318_s1 + $0x3f9] sm:$0xff]  ;;  %v2101_v38 = vld [vmem:[%s6318_s1 + $0x401] sm:$0xff] }
 0x798   : > { %4600 = vmatpush3.bf16.msra.mxu1 %v1904_v43  ;;  %v1965_v43 = vld [vmem:[%s6318_s1 + $0x2e1] sm:$0xff] }
 0x799   : > { %4601 = vmatprep.subr.bf16.mxu1 %v5026_v6  ;;  %v1976_v45 = vpack.c.bf16 %v1965_v43, %v1964_v42  ;;  %v2187_v43 = vld [vmem:[%s6318_s1 + $0x459] sm:$0xff] }
 0x79c   : > { %4602 = vmatpush3.bf16.msra.mxu1 %v1905_v49  ;;  %v1966_v49 = vld [vmem:[%s6318_s1 + $0x2e9] sm:$0xff] }
 0x79d   : > { %4627 = vmatprep.subr.bf16.mxu1 %v5026_v6 }
 0x851   : > { %v1748_v51 = vpop.f32.mrb[36].mxu0 }
 0x852   : > { %v1705_v50 = vpop.f32.mrb[32].mxu1  ;;  %v4569_v54 = vpop.f32.mrb[37].mxu0 }
 0x853   : > { %v1749_v52 = vadd.f32 %v1748_v51, %v1705_v50  ;;  %v4557_v53 = vpop.f32.mrb[33].mxu1  ;;  %v1751_v56 = vpop.f32.mrb[38].mxu0  ;;  %v1967_v50 = vld [vmem:[%s6318_s1 + $0x2f1] sm:$0xff]  ;;  %v1968_v54 = vld [vmem:[%s6318_s1 + $0x2f9] sm:$0xff] }
 0x854   : > { %v1708_v55 = vpop.f32.mrb[34].mxu1  ;;  %v4570_v58 = vpop.f32.mrb[39].mxu0  ;;  %v1977_v51 = vpack.c.bf16 %v1967_v50, %v1966_v49  ;;  %v1995_v53 = vld [vmem:[%s6318_s1 + $0x381] sm:$0xff]  ;;  %v2189_v49 = vld [vmem:[%s6318_s1 + $0x469] sm:$0xff]  ;;  %v2190_v50 = vld [vmem:[%s6318_s1 + $0x471] sm:$0xff] }
 0x855   : > { %v4558_v57 = vpop.f32.mrb[35].mxu1  ;;  %v1969_v56 = vld [vmem:[%s6318_s1 + $0x301] sm:$0xff]  ;;  %v1997_v58 = vld [vmem:[%s6318_s1 + $0x391] sm:$0xff] }
 0x856   : > { %v1996_v57 = vld [vmem:[%s6318_s1 + $0x389] sm:$0xff] }
 0x862   : > { %v1805_v59 = vpop.f32.mrb[36].mxu1 }
 0x863   : > { %v1811_v61 = vadd.f32 %v1805_v59, %v1749_v52  ;;  %v4581_v62 = vpop.f32.mrb[37].mxu1  ;;  %v1994_v52 = vld [vmem:[%s6318_s1 + $0x379] sm:$0xff]  ;;  %v1978_v59 = vpack.c.bf16 %v1969_v56, %v1968_v54  ;;  %v2192_v56 = vld [vmem:[%s6318_s1 + $0x481] sm:$0xff] }
 0x864   : > { %v1808_v63 = vpop.f32.mrb[38].mxu1  ;;  %v2004_v55 = vpack.c.bf16 %v1995_v53, %v1994_v52  ;;  %v2005_v62 = vpack.c.bf16 %v1997_v58, %v1996_v57  ;;  %v2289_v52 = vld [vmem:[%s6318_s1 + $0x4a9] sm:$0xff]  ;;  %v2290_v53 = vld [vmem:[%s6318_s1 + $0x4b1] sm:$0xff]  ;;  %v2291_v58 = vld [vmem:[%s6318_s1 + $0x4b9] sm:$0xff] }
 0x865   : > { %v1817_v1 = vadd.f32 %v4152_v60, %v1811_v61  ;;  %v4582_v2 = vpop.f32.mrb[39].mxu1  ;;  %v1970_v60 = vld [vmem:[%s6318_s1 + $0x309] sm:$0xff]  ;;  %v1971_v61 = vld [vmem:[%s6318_s1 + $0x311] sm:$0xff]  ;;  %v2296_v54 = vpack.c.bf16 %v2290_v53, %v2289_v52 }
 0x866   : > { %v1979_v63 = vpack.c.bf16 %v1971_v61, %v1970_v60  ;;  %v2193_v60 = vld [vmem:[%s6318_s1 + $0x489] sm:$0xff]  ;;  %v2365_v53 = vld [vmem:[%s6318_s1 + $0x4f1] sm:$0xff] }
 0x867   : > { %v1819_v3 = vmul.f32 0.044715, %v1817_v1  ;;  %v1818_v10 = vmul.f32 0.5, %v1817_v1  ;;  %v2364_v52 = vld [vmem:[%s6318_s1 + $0x4e9] sm:$0xff] }
 0x869   : > { %v1820_v4 = vmul.f32 %v1819_v3, %v1817_v1 }
 0x86b   : > { %v1821_v5 = vmul.f32 %v1820_v4, %v1817_v1 }
 0x86d   : > { %v1822_v7 = vadd.f32 %v1821_v5, %v1817_v1  ;;  %v4153_v1 = vld [vmem:[%s6319_s2 + $0x8] ss:$0 sm:$0xff] }
 0x86f   : > { %v1823_v8 = vmul.f32 0.7978846, %v1822_v7 }
 0x871   : > { %4983 = vtanh.f32 %v1823_v8 }
 0x87b   : > { %v4984_v9 = vpop.eup %4983 }
 0x87c   : > { %v1825_v11 = vadd.f32 1.0, %v4984_v9 }
 0x87e   : > { %v1826_v12 = vmul.f32 %v1825_v11, %v1818_v10 }
 0x880   : > { %1949 = vrot.lane.b32.xlu0 %v1826_v12, %s5030_s23  ;;  %1827 = vst.msk [vmem:[#allocation2 + $0x1] sm:$0xf] %vm1637_vm14, %v1826_v12 }
 0x884   : > { %2476 = vrot.lane.b32.xlu0 %v5362_v0, %s5031_s24  ;;  %s205_s24 = scalar_lea.vmem %s6320_s3, %s5073_s21 }
 0x887   : > { %v1828_v17 = vld [vmem:[#allocation2 + $0x1] ss:$2 sm:$0x3]  ;;  %v1829_v18 = vld [vmem:[#allocation2 + $0x2] ss:$2 sm:$0x3] }
 0x888   : > { %3430 = vrot.lane.b32.xlu0 %v5151_v27, %s5029_s19  ;;  %v1830_v0 = vmax.f32 %v1828_v17, %v1829_v18  ;;  %v1959_v27 = vld [vmem:[%s6318_s1 + $0x2b1] sm:$0xff]  ;;  %v2104_v18 = vpack.c.bf16 %v2089_v15, %v2088_v14  ;;  %v4156_v15 = vld [vmem:[%s6319_s2 + $0x9] ss:$0 sm:$0xff] }
 0x889   : > { %v1973_v28 = vpack.c.bf16 %v1959_v27, %v1958_v25  ;;  %v2092_v25 = vld [vmem:[%s6318_s1 + $0x3b9] sm:$0xff]  ;;  %v2093_v27 = vld [vmem:[%s6318_s1 + $0x3c1] sm:$0xff] }
 0x88a   : > { %v1833_v20 = vpack.c.bf16 %v1830_v0, %v1830_v0 }
 0x88c   : > { %3434 = vrot.lane.b32.xlu0 %v5149_v24, %s5029_s19  ;;  %4592 = vmatmul.mubr.msk.bf16.vlgmr.msra.gmra.mrb[40].mxu0 %vm1667_vm15, %v1833_v20  ;;  %v1960_v24 = vld [vmem:[%s6318_s1 + $0x2b9] sm:$0xff] }
 0x88d   : > { %4604 = vmatmul.mubr.msk.bf16.vlgmr.msra.gmra.mrb[40].mxu1 %vm1667_vm15, %v1833_v20  ;;  %4608 = vmatpush3.bf16.msra.mxu0 %v1998_v19  ;;  %v1974_v31 = vpack.c.bf16 %v1961_v33, %v1960_v24  ;;  %v2096_v24 = vld [vmem:[%s6318_s1 + $0x3d9] sm:$0xff]  ;;  %v2097_v33 = vld [vmem:[%s6318_s1 + $0x3e1] sm:$0xff] }
 0x88e   : > { %4628 = vmatpush3.bf16.msra.mxu1 %v1972_v21  ;;  %4609 = vmatprep.subr.bf16.mxu0 %v5026_v6  ;;  %v2090_v21 = vld [vmem:[%s6318_s1 + $0x3a9] sm:$0xff] }
 0x88f   : > { %4629 = vmatprep.subr.bf16.mxu1 %v5026_v6  ;;  %4623 = vmatprep.mubr.msk.bf16.mxu0 %vm5027_vm7, %v5026_v6  ;;  %v2105_v23 = vpack.c.bf16 %v2091_v22, %v2090_v21 }
 0x890   : > { %4643 = vmatprep.mubr.msk.bf16.mxu1 %vm5027_vm7, %v5026_v6 }
 0x891   : > { %4610 = vmatpush3.bf16.msra.mxu0 %v1999_v26  ;;  %v2106_v26 = vpack.c.bf16 %v2093_v27, %v2092_v25 }
 0x892   : > { %4630 = vmatpush3.bf16.msra.mxu1 %v1973_v28  ;;  %4611 = vmatprep.subr.bf16.mxu0 %v5026_v6  ;;  %v2094_v28 = vld [vmem:[%s6318_s1 + $0x3c9] sm:$0xff] }
 0x893   : > { %4631 = vmatprep.subr.bf16.mxu1 %v5026_v6  ;;  %v2107_v32 = vpack.c.bf16 %v2095_v29, %v2094_v28 }
 0x895   : > { %4612 = vmatpush3.bf16.msra.mxu0 %v2000_v34  ;;  %v2108_v34 = vpack.c.bf16 %v2097_v33, %v2096_v24  ;;  %v2174_v24 = vld [vmem:[%s6318_s1 + $0x421] sm:$0xff] }
 0x896   : > { %4632 = vmatpush3.bf16.msra.mxu1 %v1974_v31  ;;  %4613 = vmatprep.subr.bf16.mxu0 %v5026_v6  ;;  %v2098_v31 = vld [vmem:[%s6318_s1 + $0x3e9] sm:$0xff] }
 0x897   : > { %4633 = vmatprep.subr.bf16.mxu1 %v5026_v6  ;;  %v2109_v36 = vpack.c.bf16 %v2099_v35, %v2098_v31 }
 0x899   : > { %4614 = vmatpush3.bf16.msra.mxu0 %v2001_v30  ;;  %v2110_v30 = vpack.c.bf16 %v2101_v38, %v2100_v37  ;;  %v2175_v38 = vld [vmem:[%s6318_s1 + $0x429] sm:$0xff] }
 0x89a   : > { %4634 = vmatpush3.bf16.msra.mxu1 %v1975_v40  ;;  %4615 = vmatprep.subr.bf16.mxu0 %v5026_v6  ;;  %v2102_v40 = vld [vmem:[%s6318_s1 + $0x409] sm:$0xff] }
 0x89b   : > { %4635 = vmatprep.subr.bf16.mxu1 %v5026_v6  ;;  %v2111_v39 = vpack.c.bf16 %v2103_v41, %v2102_v40  ;;  %v2177_v41 = vld [vmem:[%s6318_s1 + $0x439] sm:$0xff] }
 0x89d   : > { %4616 = vmatpush3.bf16.msra.mxu0 %v2002_v44  ;;  %v2188_v44 = vld [vmem:[%s6318_s1 + $0x461] sm:$0xff] }
 0x89e   : > { %4636 = vmatpush3.bf16.msra.mxu1 %v1976_v45  ;;  %4617 = vmatprep.subr.bf16.mxu0 %v5026_v6  ;;  %v2195_v45 = vpack.c.bf16 %v2188_v44, %v2187_v43  ;;  %v2179_v43 = vld [vmem:[%s6318_s1 + $0x449] sm:$0xff]  ;;  %v2180_v44 = vld [vmem:[%s6318_s1 + $0x451] sm:$0xff] }
 0x89f   : > { %4637 = vmatprep.subr.bf16.mxu1 %v5026_v6 }
 0x8a1   : > { %4618 = vmatpush3.bf16.msra.mxu0 %v2003_v48  ;;  %v2295_v48 = vpack.c.bf16 %v2288_v47, %v2287_v46  ;;  %v2362_v47 = vld [vmem:[%s6318_s1 + $0x4d9] sm:$0xff] }
 0x8a2   : > { %4638 = vmatpush3.bf16.msra.mxu1 %v1977_v51  ;;  %4619 = vmatprep.subr.bf16.mxu0 %v5026_v6  ;;  %v2196_v51 = vpack.c.bf16 %v2190_v50, %v2189_v49  ;;  %v2421_v49 = vld [vmem:[%s6318_s1 + $0x519] sm:$0xff] }
 0x8a3   : > { %4639 = vmatprep.subr.bf16.mxu1 %v5026_v6 }
 0x8a5   : > { %4620 = vmatpush3.bf16.msra.mxu0 %v2004_v55  ;;  %v2191_v55 = vld [vmem:[%s6318_s1 + $0x479] sm:$0xff] }
 0x8a6   : > { %4640 = vmatpush3.bf16.msra.mxu1 %v1978_v59  ;;  %4621 = vmatprep.subr.bf16.mxu0 %v5026_v6  ;;  %v2197_v57 = vpack.c.bf16 %v2192_v56, %v2191_v55  ;;  %v2292_v59 = vld [vmem:[%s6318_s1 + $0x4c1] sm:$0xff]  ;;  %v2423_v55 = vld [vmem:[%s6318_s1 + $0x529] sm:$0xff]  ;;  %v2424_v56 = vld [vmem:[%s6318_s1 + $0x531] sm:$0xff] }
 0x8a7   : > { %4641 = vmatprep.subr.bf16.mxu1 %v5026_v6  ;;  %v2297_v61 = vpack.c.bf16 %v2292_v59, %v2291_v58  ;;  %v2430_v58 = vpack.c.bf16 %v2424_v56, %v2423_v55  ;;  %v2366_v59 = vld [vmem:[%s6318_s1 + $0x4f9] sm:$0xff]  ;;  %v2490_v55 = vld [vmem:[%s6318_s1 + $0x591] sm:$0xff] }
 0x8a9   : > { %4622 = vmatpush3.bf16.msra.mxu0 %v2005_v62  ;;  %v2194_v62 = vld [vmem:[%s6318_s1 + $0x491] sm:$0xff] }
 0x8aa   : > { %4642 = vmatpush3.bf16.msra.mxu1 %v1979_v63  ;;  %4647 = vmatprep.subr.bf16.mxu0 %v5026_v6  ;;  %v2293_v63 = vld [vmem:[%s6318_s1 + $0x4c9] sm:$0xff] }
 0x8ab   : > { %4667 = vmatprep.subr.bf16.mxu1 %v5026_v6 }
 0x8f2   : > { %v1950_v12 = vpop.permute.xlu0 %1949 }
 0x95f   : > { %v1888_v2 = vpop.f32.mrb[40].mxu0 }
 0x960   : > { %v1889_v3 = vadd.f32 %v4153_v1, %v1888_v2  ;;  %v1940_v4 = vpop.f32.mrb[40].mxu1  ;;  %v4593_v5 = vpop.f32.mrb[41].mxu0  ;;  %v2198_v2 = vpack.c.bf16 %v2194_v62, %v2193_v60  ;;  %v2367_v60 = vld [vmem:[%s6318_s1 + $0x501] sm:$0xff] }
 0x961   : > { %v1941_v7 = vadd.f32 %v4153_v1, %v1940_v4  ;;  %v4605_v8 = vpop.f32.mrb[41].mxu1  ;;  %v1891_v9 = vpop.f32.mrb[42].mxu0  ;;  %v2294_v1 = vld [vmem:[%s6318_s1 + $0x4d1] sm:$0xff]  ;;  %v2426_v62 = vld [vmem:[%s6318_s1 + $0x541] sm:$0xff] }
 0x962   : > { %1946 = vst [vmem:[#allocation2 + $0x1] ss:$2 sm:$0x3] %v1889_v3  ;;  %v1943_v10 = vpop.f32.mrb[42].mxu1  ;;  %v4594_v11 = vpop.f32.mrb[43].mxu0  ;;  %v2298_v3 = vpack.c.bf16 %v2294_v1, %v2293_v63  ;;  %v2372_v63 = vpack.c.bf16 %v2367_v60, %v2366_v59 }
 0x963   : > { %1947 = vst [vmem:[#allocation2 + $0x2] ss:$2 sm:$0x3] %v1941_v7  ;;  %v4606_v13 = vpop.f32.mrb[43].mxu1  ;;  %v2477_v59 = vpop.permute.xlu0 %2476 }
 0x964   : > { %1953 = vst.msk [vmem:[#allocation2 + $0x1] sm:$0xf] %vm1952_vm0, %v1950_v12 }
 0x96b   : > { %v1954_v16 = vld [vmem:[#allocation2] sm:$0xf] }
 0x96c   : > { %v1980_v17 = vld [vmem:[#allocation2 + $0x1] sm:$0xf]  ;;  %2168 = vst.msk [vmem:[#allocation2] sm:$0x1] %vm1634_vm13, %v5026_v6  ;;  %v1955_v20 = vpack.c.bf16 %v1954_v16, %v1954_v16 }
 0x96d   : > { %v2086_v0 = vld [vmem:[#allocation2 + $0x2] sm:$0xf]  ;;  %v1981_v19 = vpack.c.bf16 %v1980_v17, %v1980_v17 }
 0x96e   : > { %2169 = vst.msk [vmem:[#allocation2 + $0x5] sm:$0x1] %vm1634_vm13, %v5026_v6  ;;  %4644 = vmatmul.mubr.bf16.vlgmr.msra.gmra.mrb[44].mxu1 %v1955_v20  ;;  %v2087_v42 = vpack.c.bf16 %v2086_v0, %v2086_v0 }
 0x96f   : > { %4624 = vmatmul.mubr.bf16.vlgmr.msra.gmra.mrb[44].mxu0 %v1981_v19  ;;  %4675 = vmatprep.mubr.msk.bf16.mxu1 %vm5027_vm7, %v5026_v6 }
 0x970   : > { %4648 = vmatpush3.bf16.msra.mxu0 %v2104_v18  ;;  %4663 = vmatprep.mubr.msk.bf16.mxu0 %vm5027_vm7, %v5026_v6 }
 0x971   : > { %4649 = vmatprep.subr.bf16.mxu0 %v5026_v6  ;;  %4668 = vmatpush3.bf16.msra.mxu1 %v2195_v45  ;;  %v2184_v45 = vpack.c.bf16 %v2180_v44, %v2179_v43  ;;  %v2485_v43 = vld [vmem:[%s6318_s1 + $0x569] sm:$0xff]  ;;  %v2486_v44 = vld [vmem:[%s6318_s1 + $0x571] sm:$0xff] }
 0x972   : > { %4669 = vmatprep.subr.bf16.mxu1 %v5026_v6 }
 0x974   : > { %4650 = vmatpush3.bf16.msra.mxu0 %v2105_v23 }
 0x975   : > { %4651 = vmatprep.subr.bf16.mxu0 %v5026_v6  ;;  %4670 = vmatpush3.bf16.msra.mxu1 %v2196_v51  ;;  %v2422_v51 = vld [vmem:[%s6318_s1 + $0x521] sm:$0xff] }
 0x976   : > { %4671 = vmatprep.subr.bf16.mxu1 %v5026_v6 }
 0x978   : > { %4652 = vmatpush3.bf16.msra.mxu0 %v2106_v26 }
 0x979   : > { %4653 = vmatprep.subr.bf16.mxu0 %v5026_v6  ;;  %4672 = vmatpush3.bf16.msra.mxu1 %v2197_v57  ;;  %v2371_v57 = vpack.c.bf16 %v2365_v53, %v2364_v52  ;;  %v2504_v52 = vld [vmem:[%s6318_s1 + $0x5d1] sm:$0xff] }
 0x97a   : > { %4673 = vmatprep.subr.bf16.mxu1 %v5026_v6 }
 0x97c   : > { %4654 = vmatpush3.bf16.msra.mxu0 %v2107_v32  ;;  %v2173_v32 = vld [vmem:[%s6318_s1 + $0x419] sm:$0xff] }
 0x97d   : > { %4655 = vmatprep.subr.bf16.mxu0 %v5026_v6  ;;  %4674 = vmatpush3.bf16.msra.mxu1 %v2198_v2  ;;  %v2368_v2 = vld [vmem:[%s6318_s1 + $0x509] sm:$0xff] }
 0x97e   : > { %4679 = vmatprep.subr.bf16.mxu1 %v5026_v6 }
 0x980   : > { %4656 = vmatpush3.bf16.msra.mxu0 %v2108_v34  ;;  %v2181_v34 = vpack.c.bf16 %v2174_v24, %v2173_v32  ;;  %v2497_v24 = vld [vmem:[%s6318_s1 + $0x599] sm:$0xff] }
 0x981   : > { %4657 = vmatprep.subr.bf16.mxu0 %v5026_v6 }
 0x984   : > { %4658 = vmatpush3.bf16.msra.mxu0 %v2109_v36 }
 0x985   : > { %4659 = vmatprep.subr.bf16.mxu0 %v5026_v6 }
 0x988   : > { %4660 = vmatpush3.bf16.msra.mxu0 %v2110_v30  ;;  %v2176_v30 = vld [vmem:[%s6318_s1 + $0x431] sm:$0xff] }
 0x989   : > { %4661 = vmatprep.subr.bf16.mxu0 %v5026_v6  ;;  %v2182_v40 = vpack.c.bf16 %v2176_v30, %v2175_v38 }
 0x98c   : > { %4662 = vmatpush3.bf16.msra.mxu0 %v2111_v39  ;;  %v2178_v39 = vld [vmem:[%s6318_s1 + $0x441] sm:$0xff] }
 0x98d   : > { %4691 = vmatprep.subr.bf16.mxu0 %v5026_v6 }
 0x98f   : > { %4664 = vmatmul.mubr.bf16.vlgmr.msra.gmra.mrb[48].mxu0 %v2087_v42  ;;  %v2183_v42 = vpack.c.bf16 %v2178_v39, %v2177_v41  ;;  %v2499_v41 = vld [vmem:[%s6318_s1 + $0x5a9] sm:$0xff]  ;;  %v2500_v39 = vld [vmem:[%s6318_s1 + $0x5b1] sm:$0xff] }
 0x990   : > { %4699 = vmatprep.mubr.msk.bf16.mxu0 %vm5027_vm7, %v5026_v6  ;;  %4692 = vmatpush3.bf16.msra.mxu0 %v2295_v48  ;;  %v2363_v48 = vld [vmem:[%s6318_s1 + $0x4e1] sm:$0xff] }
 0x991   : > { %4693 = vmatprep.subr.bf16.mxu0 %v5026_v6  ;;  %v2370_v50 = vpack.c.bf16 %v2363_v48, %v2362_v47  ;;  %v2502_v47 = vld [vmem:[%s6318_s1 + $0x5c1] sm:$0xff]  ;;  %v2487_v48 = vld [vmem:[%s6318_s1 + $0x579] sm:$0xff] }
 0x994   : > { %4694 = vmatpush3.bf16.msra.mxu0 %v2296_v54  ;;  %v2429_v54 = vpack.c.bf16 %v2422_v51, %v2421_v49  ;;  %v2503_v51 = vld [vmem:[%s6318_s1 + $0x5c9] sm:$0xff] }
 0x995   : > { %4695 = vmatprep.subr.bf16.mxu0 %v5026_v6  ;;  %v2508_v56 = vpack.c.bf16 %v2504_v52, %v2503_v51 }
 0x998   : > { %4696 = vmatpush3.bf16.msra.mxu0 %v2297_v61  ;;  %v2425_v61 = vld [vmem:[%s6318_s1 + $0x539] sm:$0xff] }
 0x999   : > { %4697 = vmatprep.subr.bf16.mxu0 %v5026_v6  ;;  %v2431_v1 = vpack.c.bf16 %v2426_v62, %v2425_v61 }
 0x99c   : > { %4698 = vmatpush3.bf16.msra.mxu0 %v2298_v3  ;;  %v2369_v3 = vld [vmem:[%s6318_s1 + $0x511] sm:$0xff] }
 0x99d   : > { %4715 = vmatprep.subr.bf16.mxu0 %v5026_v6 }
 0xa41   : > { %v2080_v5 = vpop.f32.mrb[44].mxu1 }
 0xa42   : > { %v2040_v4 = vpop.f32.mrb[44].mxu0  ;;  %v4645_v9 = vpop.f32.mrb[45].mxu1 }
 0xa43   : > { %v2081_v7 = vadd.f32 %v2080_v5, %v2040_v4  ;;  %v4625_v8 = vpop.f32.mrb[45].mxu0  ;;  %v2083_v11 = vpop.f32.mrb[46].mxu1  ;;  %v2427_v4 = vld [vmem:[%s6318_s1 + $0x549] sm:$0xff]  ;;  %v2428_v5 = vld [vmem:[%s6318_s1 + $0x551] sm:$0xff] }
 0xa44   : > { %v2043_v10 = vpop.f32.mrb[46].mxu0  ;;  %v4646_v13 = vpop.f32.mrb[47].mxu1  ;;  %v2432_v8 = vpack.c.bf16 %v2428_v5, %v2427_v4 }
 0xa45   : > { %v4626_v12 = vpop.f32.mrb[47].mxu0 }
 0xa62   : > { %v2146_v14 = vpop.f32.mrb[48].mxu0 }
 0xa63   : > { %v2152_v16 = vadd.f32 %v2146_v14, %v2081_v7  ;;  %v4665_v17 = vpop.f32.mrb[49].mxu0  ;;  %v2373_v7 = vpack.c.bf16 %v2369_v3, %v2368_v2 }
 0xa64   : > { %v2149_v18 = vpop.f32.mrb[50].mxu0 }
 0xa65   : > { %v2158_v0 = vadd.f32 %v4156_v15, %v2152_v16  ;;  %v4666_v19 = vpop.f32.mrb[51].mxu0 }
 0xa66   : > { %v4160_v19 = vld [vmem:[%s6319_s2 + $0xa] ss:$0 sm:$0xff] }
 0xa67   : > { %v2160_v20 = vmul.f32 0.044715, %v2158_v0  ;;  %v2159_v26 = vmul.f32 0.5, %v2158_v0 }
 0xa69   : > { %v2161_v21 = vmul.f32 %v2160_v20, %v2158_v0 }
 0xa6b   : > { %v2162_v22 = vmul.f32 %v2161_v21, %v2158_v0 }
 0xa6d   : > { %v2163_v23 = vadd.f32 %v2162_v22, %v2158_v0 }
 0xa6f   : > { %v2164_v25 = vmul.f32 0.7978846, %v2163_v23 }
 0xa71   : > { %4985 = vtanh.f32 %v2164_v25 }
 0xa7b   : > { %v4986_v27 = vpop.eup %4985 }
 0xa7c   : > { %v2166_v28 = vadd.f32 1.0, %v4986_v27 }
 0xa7e   : > { %v2167_v29 = vmul.f32 %v2166_v28, %v2159_v26 }
 0xa80   : > { %2170 = vst.msk [vmem:[#allocation2 + $0x1] sm:$0xf] %vm1637_vm14, %v2167_v29 }
 0xa87   : > { %v2185_v33 = vld [vmem:[#allocation2 + $0x1] sm:$0xf] }
 0xa88   : > { %v2285_v31 = vld [vmem:[#allocation2 + $0x2] sm:$0xf]  ;;  %v2186_v36 = vpack.c.bf16 %v2185_v33, %v2185_v33 }
 0xa89   : > { %v2171_v35 = vld [vmem:[#allocation2] sm:$0xf]  ;;  %v2286_v37 = vpack.c.bf16 %v2285_v31, %v2285_v31 }
 0xa8a   : > { %2358 = vst.msk [vmem:[#allocation2] sm:$0x1] %vm1634_vm13, %v5026_v6  ;;  %4676 = vmatmul.mubr.msk.bf16.vlgmr.msra.gmra.mrb[48].mxu1 %vm1667_vm15, %v2186_v36  ;;  %v2172_v46 = vpack.c.bf16 %v2171_v35, %v2171_v35  ;;  %v2498_v31 = vld [vmem:[%s6318_s1 + $0x5a1] sm:$0xff]  ;;  %v2483_v35 = vld [vmem:[%s6318_s1 + $0x559] sm:$0xff] }
 0xa8b   : > { %4700 = vmatmul.mubr.msk.bf16.vlgmr.msra.gmra.mrb[52].mxu0 %vm1667_vm15, %v2286_v37  ;;  %4680 = vmatpush3.bf16.msra.mxu1 %v2181_v34  ;;  %v2484_v36 = vld [vmem:[%s6318_s1 + $0x561] sm:$0xff]  ;;  %v2505_v38 = vpack.c.bf16 %v2498_v31, %v2497_v24  ;;  %v2683_v24 = vld [vmem:[%s6318_s1 + $0x649] sm:$0xff] }
 0xa8c   : > { %4687 = vmatprep.mubr.msk.bf16.mxu1 %vm5027_vm7, %v5026_v6  ;;  %4681 = vmatprep.subr.bf16.mxu1 %v5026_v6  ;;  %v2491_v30 = vpack.c.bf16 %v2484_v36, %v2483_v35  ;;  %v2777_v31 = vld [vmem:[%s6318_s1 + $0x669] sm:$0xff]  ;;  %v2778_v35 = vld [vmem:[%s6318_s1 + $0x671] sm:$0xff] }
 0xa8d   : > { %4723 = vmatprep.mubr.msk.bf16.mxu0 %vm5027_vm7, %v5026_v6  ;;  %4716 = vmatpush3.bf16.msra.mxu0 %v2429_v54  ;;  %v2489_v54 = vld [vmem:[%s6318_s1 + $0x589] sm:$0xff] }
 0xa8e   : > { %4717 = vmatprep.subr.bf16.mxu0 %v5026_v6 }
 0xa8f   : > { %4682 = vmatpush3.bf16.msra.mxu1 %v2182_v40 }
 0xa90   : > { %4683 = vmatprep.subr.bf16.mxu1 %v5026_v6 }
 0xa91   : > { %4718 = vmatpush3.bf16.msra.mxu0 %v2430_v58  ;;  %v4161_v58 = vld [vmem:[%s6319_s2 + $0xb] ss:$0 sm:$0xff] }
 0xa92   : > { %4719 = vmatprep.subr.bf16.mxu0 %v5026_v6 }
 0xa93   : > { %4684 = vmatpush3.bf16.msra.mxu1 %v2183_v42  ;;  %v2506_v42 = vpack.c.bf16 %v2500_v39, %v2499_v41 }
 0xa94   : > { %4685 = vmatprep.subr.bf16.mxu1 %v5026_v6 }
 0xa95   : > { %4720 = vmatpush3.bf16.msra.mxu0 %v2431_v1 }
 0xa96   : > { %4721 = vmatprep.subr.bf16.mxu0 %v5026_v6 }
 0xa97   : > { %4686 = vmatpush3.bf16.msra.mxu1 %v2184_v45  ;;  %v2492_v45 = vpack.c.bf16 %v2486_v44, %v2485_v43 }
 0xa98   : > { %4703 = vmatprep.subr.bf16.mxu1 %v5026_v6 }
 0xa99   : > { %4722 = vmatpush3.bf16.msra.mxu0 %v2432_v8  ;;  %v2597_v8 = vld [vmem:[%s6318_s1 + $0x5d9] sm:$0xff] }
 0xa9a   : > { %4688 = vmatmul.mubr.msk.bf16.vlgmr.msra.gmra.mrb[52].mxu1 %vm1667_vm15, %v2172_v46  ;;  %4739 = vmatprep.subr.bf16.mxu0 %v5026_v6  ;;  %v2501_v46 = vld [vmem:[%s6318_s1 + $0x5b9] sm:$0xff] }
 0xa9b   : > { %4711 = vmatprep.mubr.msk.bf16.mxu1 %vm5027_vm7, %v5026_v6  ;;  %4704 = vmatpush3.bf16.msra.mxu1 %v2370_v50  ;;  %v2507_v49 = vpack.c.bf16 %v2502_v47, %v2501_v46  ;;  %v2488_v50 = vld [vmem:[%s6318_s1 + $0x581] sm:$0xff]  ;;  %v4167_v47 = vld [vmem:[%s6319_s2 + $0xc] ss:$0 sm:$0xff] }
 0xa9c   : > { %4705 = vmatprep.subr.bf16.mxu1 %v5026_v6  ;;  %v2493_v53 = vpack.c.bf16 %v2488_v50, %v2487_v48 }
 0xa9f   : > { %4706 = vmatpush3.bf16.msra.mxu1 %v2371_v57  ;;  %v2494_v57 = vpack.c.bf16 %v2490_v55, %v2489_v54 }
 0xaa0   : > { %4707 = vmatprep.subr.bf16.mxu1 %v5026_v6 }
 0xaa3   : > { %4708 = vmatpush3.bf16.msra.mxu1 %v2372_v63 }
 0xaa4   : > { %4709 = vmatprep.subr.bf16.mxu1 %v5026_v6 }
 0xaa7   : > { %4710 = vmatpush3.bf16.msra.mxu1 %v2373_v7 }
 0xaa8   : > { %4727 = vmatprep.subr.bf16.mxu1 %v5026_v6 }
 0xb5d   : > { %v2236_v9 = vpop.f32.mrb[48].mxu1 }
 0xb5e   : > { %v2336_v10 = vpop.f32.mrb[52].mxu0  ;;  %v4677_v11 = vpop.f32.mrb[49].mxu1 }
 0xb5f   : > { %v4701_v12 = vpop.f32.mrb[53].mxu0  ;;  %v2239_v13 = vpop.f32.mrb[50].mxu1 }
 0xb60   : > { %v2339_v14 = vpop.f32.mrb[54].mxu0  ;;  %v4678_v15 = vpop.f32.mrb[51].mxu1 }
 0xb61   : > { %v4702_v16 = vpop.f32.mrb[55].mxu0 }
 0xb62   : > { %v2599_v16 = vld [vmem:[%s6318_s1 + $0x5e9] sm:$0xff] }
 0xb6d   : > { %v2279_v17 = vpop.f32.mrb[52].mxu1 }
 0xb6e   : > { %v2280_v18 = vadd.f32 %v2279_v17, %v2236_v9  ;;  %v4689_v0 = vpop.f32.mrb[53].mxu1  ;;  %v2598_v9 = vld [vmem:[%s6318_s1 + $0x5e1] sm:$0xff]  ;;  %v2600_v17 = vld [vmem:[%s6318_s1 + $0x5f1] sm:$0xff] }
 0xb6f   : > { %v2282_v20 = vpop.f32.mrb[54].mxu1  ;;  %v2605_v12 = vpack.c.bf16 %v2598_v9, %v2597_v8  ;;  %v2601_v0 = vld [vmem:[%s6318_s1 + $0x5f9] sm:$0xff]  ;;  %v2675_v8 = vld [vmem:[%s6318_s1 + $0x629] sm:$0xff]  ;;  %v2676_v9 = vld [vmem:[%s6318_s1 + $0x631] sm:$0xff] }
 0xb70   : > { %v2342_v21 = vadd.f32 %v2336_v10, %v2280_v18  ;;  %v4690_v22 = vpop.f32.mrb[55].mxu1  ;;  %v2606_v18 = vpack.c.bf16 %v2600_v17, %v2599_v16  ;;  %v2898_v16 = vld [vmem:[%s6318_s1 + $0x6a1] sm:$0xff]  ;;  %v2846_v17 = vld [vmem:[%s6318_s1 + $0x689] sm:$0xff] }
 0xb71   : > { %v2604_v22 = vld [vmem:[%s6318_s1 + $0x611] sm:$0xff] }
 0xb72   : > { %v2348_v23 = vadd.f32 %v4160_v19, %v2342_v21  ;;  %v2602_v19 = vld [vmem:[%s6318_s1 + $0x601] sm:$0xff]  ;;  %v2603_v21 = vld [vmem:[%s6318_s1 + $0x609] sm:$0xff] }
 0xb73   : > { %v2607_v20 = vpack.c.bf16 %v2602_v19, %v2601_v0  ;;  %v2899_v19 = vld [vmem:[%s6318_s1 + $0x6a9] sm:$0xff] }
 0xb74   : > { %v2350_v25 = vmul.f32 0.044715, %v2348_v23  ;;  %v2349_v33 = vmul.f32 0.5, %v2348_v23 }
 0xb76   : > { %v2351_v27 = vmul.f32 %v2350_v25, %v2348_v23 }
 0xb78   : > { %v2352_v26 = vmul.f32 %v2351_v27, %v2348_v23  ;;  %v2681_v27 = vld [vmem:[%s6318_s1 + $0x639] sm:$0xff] }
 0xb7a   : > { %v2353_v28 = vadd.f32 %v2352_v26, %v2348_v23  ;;  %v2608_v23 = vpack.c.bf16 %v2604_v22, %v2603_v21  ;;  %v2682_v26 = vld [vmem:[%s6318_s1 + $0x641] sm:$0xff] }
 0xb7c   : > { %v2354_v29 = vmul.f32 0.7978846, %v2353_v28  ;;  %v2775_v28 = vld [vmem:[%s6318_s1 + $0x659] sm:$0xff] }
 0xb7e   : > { %4987 = vtanh.f32 %v2354_v29  ;;  %v2685_v29 = vpack.c.bf16 %v2682_v26, %v2681_v27 }
 0xb88   : > { %v4988_v32 = vpop.eup %4987 }
 0xb89   : > { %v2356_v34 = vadd.f32 1.0, %v4988_v32  ;;  %v2776_v32 = vld [vmem:[%s6318_s1 + $0x661] sm:$0xff] }
 0xb8b   : > { %v2357_v37 = vmul.f32 %v2356_v34, %v2349_v33  ;;  %v2684_v33 = vld [vmem:[%s6318_s1 + $0x651] sm:$0xff]  ;;  %v2779_v34 = vpack.c.bf16 %v2776_v32, %v2775_v28 }
 0xb8c   : > { %v2686_v36 = vpack.c.bf16 %v2684_v33, %v2683_v24 }
 0xb8d   : > { %v2360_v40 = vpack.c.bf16 %v2357_v37, %v2357_v37  ;;  %v2780_v37 = vpack.c.bf16 %v2778_v35, %v2777_v31  ;;  %v4171_v35 = vld [vmem:[%s6319_s2 + $0xd] ss:$0 sm:$0xff] }
 0xb8f   : > { %4712 = vmatmul.mubr.msk.bf16.vlgmr.msra.gmra.mrb[56].mxu1 %vm1667_vm15, %v2360_v40  ;;  %4724 = vmatmul.mubr.msk.bf16.vlgmr.msra.gmra.mrb[56].mxu0 %vm1667_vm15, %v2360_v40 }
 0xb90   : > { %4728 = vmatpush3.bf16.msra.mxu1 %v2505_v38  ;;  %4740 = vmatpush3.bf16.msra.mxu0 %v2491_v30 }
 0xb91   : > { %4729 = vmatprep.subr.bf16.mxu1 %v5026_v6  ;;  %4741 = vmatprep.subr.bf16.mxu0 %v5026_v6 }
 0xb92   : > { %4735 = vmatprep.mubr.msk.bf16.mxu1 %vm5027_vm7, %v5026_v6  ;;  %4747 = vmatprep.mubr.msk.bf16.mxu0 %vm5027_vm7, %v5026_v6 }
 0xb94   : > { %4730 = vmatpush3.bf16.msra.mxu1 %v2506_v42  ;;  %4742 = vmatpush3.bf16.msra.mxu0 %v2492_v45 }
 0xb95   : > { %4731 = vmatprep.subr.bf16.mxu1 %v5026_v6  ;;  %4743 = vmatprep.subr.bf16.mxu0 %v5026_v6 }
 0xb98   : > { %4732 = vmatpush3.bf16.msra.mxu1 %v2507_v49  ;;  %4744 = vmatpush3.bf16.msra.mxu0 %v2493_v53 }
 0xb99   : > { %4733 = vmatprep.subr.bf16.mxu1 %v5026_v6  ;;  %4745 = vmatprep.subr.bf16.mxu0 %v5026_v6 }
 0xb9c   : > { %4734 = vmatpush3.bf16.msra.mxu1 %v2508_v56  ;;  %4746 = vmatpush3.bf16.msra.mxu0 %v2494_v57 }
 0xb9d   : > { %4751 = vmatprep.subr.bf16.mxu1 %v5026_v6  ;;  %4763 = vmatprep.subr.bf16.mxu0 %v5026_v6 }
 0xc62   : > { %v2415_v60 = vpop.f32.mrb[56].mxu1  ;;  %v2467_v61 = vpop.f32.mrb[56].mxu0 }
 0xc63   : > { %v2416_v62 = vadd.f32 %v4161_v58, %v2415_v60  ;;  %v2468_v63 = vadd.f32 %v4161_v58, %v2467_v61  ;;  %v4713_v1 = vpop.f32.mrb[57].mxu1  ;;  %v4725_v2 = vpop.f32.mrb[57].mxu0 }
 0xc64   : > { %v2418_v3 = vpop.f32.mrb[58].mxu1  ;;  %v2470_v4 = vpop.f32.mrb[58].mxu0 }
 0xc65   : > { %2473 = vst [vmem:[#allocation2 + $0x1] ss:$2 sm:$0xf] %v2416_v62  ;;  %2474 = vst [vmem:[#allocation2 + $0x2] ss:$2 sm:$0xf] %v2468_v63 }
 0xc66   : > { %v4714_v5 = vpop.f32.mrb[59].mxu1  ;;  %v4726_v7 = vpop.f32.mrb[59].mxu0  ;;  %2480 = vst.msk [vmem:[#allocation2 + $0x1] sm:$0xff] %vm2479_vm1, %v2477_v59  ;;  %v2673_v62 = vld [vmem:[%s6318_s1 + $0x619] sm:$0xff]  ;;  %v2674_v63 = vld [vmem:[%s6318_s1 + $0x621] sm:$0xff] }
 0xc67   : > { %v2677_v2 = vpack.c.bf16 %v2674_v63, %v2673_v62  ;;  %v4172_v62 = vld [vmem:[%s6319_s2 + $0xe] ss:$0 sm:$0xff] }
 0xc6d   : > { %v2495_v10 = vld [vmem:[#allocation2 + $0x1] sm:$0xff] }
 0xc6e   : > { %v2481_v11 = vld [vmem:[#allocation2] sm:$0xff]  ;;  %v2496_v14 = vpack.c.bf16 %v2495_v10, %v2495_v10  ;;  %v2678_v10 = vpack.c.bf16 %v2676_v9, %v2675_v8 }
 0xc6f   : > { %v2595_v13 = vld [vmem:[#allocation2 + $0x2] sm:$0xff]  ;;  %v2482_v15 = vpack.c.bf16 %v2481_v11, %v2481_v11  ;;  %2668 = vst.msk [vmem:[#allocation2] sm:$0x1] %vm1283_vm10, %v5026_v6 }
 0xc70   : > { %2669 = vst.msk [vmem:[#allocation2 + $0x9] sm:$0x1] %vm1283_vm10, %v5026_v6  ;;  %4736 = vmatmul.mubr.msk.bf16.vlgmr.msra.gmra.mrb[60].mxu1 %vm1667_vm15, %v2496_v14  ;;  %v2596_v25 = vpack.c.bf16 %v2595_v13, %v2595_v13  ;;  %v2845_v13 = vld [vmem:[%s6318_s1 + $0x681] sm:$0xff]  ;;  %v2897_v14 = vld [vmem:[%s6318_s1 + $0x699] sm:$0xff] }
 0xc71   : > { %4748 = vmatmul.mubr.msk.bf16.vlgmr.msra.gmra.mrb[60].mxu0 %vm1667_vm15, %v2482_v15  ;;  %4752 = vmatpush3.bf16.msra.mxu1 %v2605_v12  ;;  %v2844_v12 = vld [vmem:[%s6318_s1 + $0x679] sm:$0xff]  ;;  %v2901_v0 = vpack.c.bf16 %v2898_v16, %v2897_v14  ;;  %v3067_v14 = vld [vmem:[%s6318_s1 + $0x709] sm:$0xff] }
 0xc72   : > { %4759 = vmatprep.mubr.msk.bf16.mxu1 %vm5027_vm7, %v5026_v6  ;;  %4753 = vmatprep.subr.bf16.mxu1 %v5026_v6  ;;  %v2848_v15 = vpack.c.bf16 %v2845_v13, %v2844_v12  ;;  %v3065_v12 = vld [vmem:[%s6318_s1 + $0x6f9] sm:$0xff]  ;;  %v3066_v13 = vld [vmem:[%s6318_s1 + $0x701] sm:$0xff] }
 0xc73   : > { %4767 = vmatprep.mubr.msk.bf16.mxu0 %vm5027_vm7, %v5026_v6  ;;  %4764 = vmatpush3.bf16.msra.mxu0 %v2685_v29 }
 0xc74   : > { %4765 = vmatprep.subr.bf16.mxu0 %v5026_v6 }
 0xc75   : > { %4754 = vmatpush3.bf16.msra.mxu1 %v2606_v18  ;;  %v2847_v18 = vld [vmem:[%s6318_s1 + $0x691] sm:$0xff] }
 0xc76   : > { %4755 = vmatprep.subr.bf16.mxu1 %v5026_v6  ;;  %v2849_v21 = vpack.c.bf16 %v2847_v18, %v2846_v17  ;;  %v3069_v18 = vpack.c.bf16 %v3066_v13, %v3065_v12 }
 0xc77   : > { %4766 = vmatpush3.bf16.msra.mxu0 %v2686_v36 }
 0xc78   : > { %4771 = vmatprep.subr.bf16.mxu0 %v5026_v6 }
 0xc79   : > { %4756 = vmatpush3.bf16.msra.mxu1 %v2607_v20  ;;  %v2900_v20 = vld [vmem:[%s6318_s1 + $0x6b1] sm:$0xff] }
 0xc7a   : > { %4757 = vmatprep.subr.bf16.mxu1 %v5026_v6  ;;  %v2902_v22 = vpack.c.bf16 %v2900_v20, %v2899_v19  ;;  %v3068_v20 = vld [vmem:[%s6318_s1 + $0x711] sm:$0xff] }
 0xc7d   : > { %4758 = vmatpush3.bf16.msra.mxu1 %v2608_v23 }
 0xc7e   : > { %4779 = vmatprep.subr.bf16.mxu1 %v5026_v6 }
 0xc80   : > { %4760 = vmatmul.mubr.msk.bf16.vlgmr.msra.gmra.mrb[64].mxu1 %vm1667_vm15, %v2596_v25 }
 0xc81   : > { %4783 = vmatprep.mubr.msk.bf16.mxu1 %vm5027_vm7, %v5026_v6  ;;  %4780 = vmatpush3.bf16.msra.mxu1 %v2779_v34 }
 0xc82   : > { %4781 = vmatprep.subr.bf16.mxu1 %v5026_v6 }
 0xc85   : > { %4782 = vmatpush3.bf16.msra.mxu1 %v2780_v37 }
 0xc86   : > { %4795 = vmatprep.subr.bf16.mxu1 %v5026_v6 }
 0xd43   : > { %v2546_v38 = vpop.f32.mrb[60].mxu1 }
 0xd44   : > { %v2589_v30 = vpop.f32.mrb[60].mxu0  ;;  %v4737_v41 = vpop.f32.mrb[61].mxu1 }
 0xd45   : > { %v2590_v40 = vadd.f32 %v2589_v30, %v2546_v38  ;;  %v4749_v39 = vpop.f32.mrb[61].mxu0  ;;  %v2549_v42 = vpop.f32.mrb[62].mxu1 }
 0xd46   : > { %v2592_v43 = vpop.f32.mrb[62].mxu0  ;;  %v4738_v44 = vpop.f32.mrb[63].mxu1 }
 0xd47   : > { %v4750_v45 = vpop.f32.mrb[63].mxu0 }
 0xd53   : > { %v2646_v46 = vpop.f32.mrb[64].mxu1 }
 0xd54   : > { %v2652_v48 = vadd.f32 %v2646_v46, %v2590_v40  ;;  %v4761_v49 = vpop.f32.mrb[65].mxu1 }
 0xd55   : > { %v2649_v50 = vpop.f32.mrb[66].mxu1  ;;  %v2968_v49 = vld [vmem:[%s6318_s1 + $0x6d9] sm:$0xff] }
 0xd56   : > { %v2658_v51 = vadd.f32 %v4167_v47, %v2652_v48  ;;  %v4762_v52 = vpop.f32.mrb[67].mxu1  ;;  %v2969_v50 = vld [vmem:[%s6318_s1 + $0x6e1] sm:$0xff] }
 0xd57   : > { %v2972_v52 = vpack.c.bf16 %v2969_v50, %v2968_v49 }
 0xd58   : > { %v2660_v53 = vmul.f32 0.044715, %v2658_v51  ;;  %v2659_v59 = vmul.f32 0.5, %v2658_v51 }
 0xd5a   : > { %v2661_v54 = vmul.f32 %v2660_v53, %v2658_v51  ;;  %v2960_v53 = vld [vmem:[%s6318_s1 + $0x6c1] sm:$0xff] }
 0xd5c   : > { %v2662_v55 = vmul.f32 %v2661_v54, %v2658_v51  ;;  %v2970_v54 = vld [vmem:[%s6318_s1 + $0x6e9] sm:$0xff] }
 0xd5e   : > { %v2663_v56 = vadd.f32 %v2662_v55, %v2658_v51  ;;  %v2959_v51 = vld [vmem:[%s6318_s1 + $0x6b9] sm:$0xff]  ;;  %v2971_v55 = vld [vmem:[%s6318_s1 + $0x6f1] sm:$0xff] }
 0xd60   : > { %v2664_v57 = vmul.f32 0.7978846, %v2663_v56  ;;  %v2963_v56 = vpack.c.bf16 %v2960_v53, %v2959_v51 }
 0xd62   : > { %4989 = vtanh.f32 %v2664_v57  ;;  %v2961_v57 = vld [vmem:[%s6318_s1 + $0x6c9] sm:$0xff] }
 0xd6c   : > { %v4990_v58 = vpop.eup %4989 }
 0xd6d   : > { %v2666_v60 = vadd.f32 1.0, %v4990_v58  ;;  %v2962_v58 = vld [vmem:[%s6318_s1 + $0x6d1] sm:$0xff] }
 0xd6f   : > { %v2667_v61 = vmul.f32 %v2666_v60, %v2659_v59  ;;  %v2973_v59 = vpack.c.bf16 %v2971_v55, %v2970_v54  ;;  %v2964_v60 = vpack.c.bf16 %v2962_v58, %v2961_v57 }
 0xd71   : > { %2670 = vst.msk [vmem:[#allocation2 + $0x1] sm:$0xff] %vm1286_vm11, %v2667_v61  ;;  %v2948_v61 = vpop.permute.xlu1 %2947 }
 0xd75   : > { %v2950_v63 = vpop.permute.xlu1 %2949 }
 0xd78   : > { %v2679_v1 = vld [vmem:[#allocation2 + $0x1] sm:$0xff] }
 0xd79   : > { %v2773_v3 = vld [vmem:[#allocation2 + $0x2] sm:$0xff]  ;;  %v2680_v5 = vpack.c.bf16 %v2679_v1, %v2679_v1 }
 0xd7a   : > { %v2671_v4 = vld [vmem:[#allocation2] sm:$0xff]  ;;  %v2774_v7 = vpack.c.bf16 %v2773_v3, %v2773_v3 }
 0xd7b   : > { %2840 = vst.msk [vmem:[#allocation2] sm:$0x1] %vm1283_vm10, %v5026_v6  ;;  %4768 = vmatmul.mubr.msk.bf16.vlgmr.msra.gmra.mrb[64].mxu0 %vm1286_vm11, %v2680_v5  ;;  %v2672_v11 = vpack.c.bf16 %v2671_v4, %v2671_v4 }
 0xd7c   : > { %4784 = vmatmul.mubr.msk.bf16.vlgmr.msra.gmra.mrb[68].mxu1 %vm1286_vm11, %v2774_v7  ;;  %4772 = vmatpush3.bf16.msra.mxu0 %v2677_v2 }
 0xd7d   : > { %4775 = vmatprep.mubr.msk.bf16.mxu0 %vm5027_vm7, %v5026_v6  ;;  %4773 = vmatprep.subr.bf16.mxu0 %v5026_v6 }
 0xd7e   : > { %4799 = vmatprep.mubr.msk.bf16.mxu1 %vm5027_vm7, %v5026_v6  ;;  %4796 = vmatpush3.bf16.msra.mxu1 %v2901_v0 }
 0xd7f   : > { %4797 = vmatprep.subr.bf16.mxu1 %v5026_v6 }
 0xd80   : > { %4774 = vmatpush3.bf16.msra.mxu0 %v2678_v10 }
 0xd81   : > { %4787 = vmatprep.subr.bf16.mxu0 %v5026_v6 }
 0xd82   : > { %4798 = vmatpush3.bf16.msra.mxu1 %v2902_v22 }
 0xd83   : > { %4776 = vmatmul.mubr.msk.bf16.vlgmr.msra.gmra.mrb[68].mxu0 %vm1286_vm11, %v2672_v11  ;;  %4811 = vmatprep.subr.bf16.mxu1 %v5026_v6 }
 0xd84   : > { %4791 = vmatprep.mubr.msk.bf16.mxu0 %vm5027_vm7, %v5026_v6  ;;  %4788 = vmatpush3.bf16.msra.mxu0 %v2848_v15 }
 0xd85   : > { %4789 = vmatprep.subr.bf16.mxu0 %v5026_v6 }
 0xd88   : > { %4790 = vmatpush3.bf16.msra.mxu0 %v2849_v21 }
 0xd89   : > { %4803 = vmatprep.subr.bf16.mxu0 %v5026_v6 }
 0xe4e   : > { %v2724_v23 = vpop.f32.mrb[64].mxu0 }
 0xe4f   : > { %v2818_v25 = vpop.f32.mrb[68].mxu1  ;;  %v4769_v27 = vpop.f32.mrb[65].mxu0 }
 0xe50   : > { %v4785_v26 = vpop.f32.mrb[69].mxu1  ;;  %v2727_v28 = vpop.f32.mrb[66].mxu0 }
 0xe51   : > { %v2821_v29 = vpop.f32.mrb[70].mxu1  ;;  %v4770_v32 = vpop.f32.mrb[67].mxu0  ;;  %v3155_v26 = vld [vmem:[%s6318_s1 + $0x729] sm:$0xff]  ;;  %v3156_v28 = vld [vmem:[%s6318_s1 + $0x731] sm:$0xff] }
 0xe52   : > { %v4786_v24 = vpop.f32.mrb[71].mxu1  ;;  %v3149_v29 = vld [vmem:[%s6318_s1 + $0x719] sm:$0xff]  ;;  %v3157_v32 = vpack.c.bf16 %v3156_v28, %v3155_v26 }
 0xe53   : > { %v3150_v24 = vld [vmem:[%s6318_s1 + $0x721] sm:$0xff] }
 0xe56   : > { %v2767_v33 = vpop.f32.mrb[68].mxu0 }
 0xe57   : > { %v2768_v34 = vadd.f32 %v2767_v33, %v2724_v23  ;;  %v4777_v31 = vpop.f32.mrb[69].mxu0  ;;  %v3070_v23 = vpack.c.bf16 %v3068_v20, %v3067_v14  ;;  %v3151_v33 = vpack.c.bf16 %v3150_v24, %v3149_v29  ;;  %v3378_v20 = vld [vmem:[%s6318_s1 + $0x759] sm:$0xff] }
 0xe58   : > { %v2770_v36 = vpop.f32.mrb[70].mxu0 }
 0xe59   : > { %v2824_v37 = vadd.f32 %v2818_v25, %v2768_v34  ;;  %v4778_v38 = vpop.f32.mrb[71].mxu0 }
 0xe5b   : > { %v2830_v30 = vadd.f32 %v4171_v35, %v2824_v37 }
 0xe5d   : > { %v2832_v40 = vmul.f32 0.044715, %v2830_v30  ;;  %v2831_v45 = vmul.f32 0.5, %v2830_v30 }
 0xe5f   : > { %v2833_v41 = vmul.f32 %v2832_v40, %v2830_v30 }
 0xe61   : > { %v2834_v39 = vmul.f32 %v2833_v41, %v2830_v30 }
 0xe63   : > { %v2835_v42 = vadd.f32 %v2834_v39, %v2830_v30 }
 0xe65   : > { %v2836_v43 = vmul.f32 0.7978846, %v2835_v42 }
 0xe67   : > { %4991 = vtanh.f32 %v2836_v43  ;;  %v4178_v43 = vld [vmem:[%s6319_s2 + $0xf] ss:$0 sm:$0xff] }
 0xe71   : > { %v4992_v44 = vpop.eup %4991 }
 0xe72   : > { %v2838_v46 = vadd.f32 1.0, %v4992_v44 }
 0xe74   : > { %v2839_v47 = vmul.f32 %v2838_v46, %v2831_v45 }
 0xe76   : > { %v2842_v48 = vpack.c.bf16 %v2839_v47, %v2839_v47 }
 0xe78   : > { %4792 = vmatmul.mubr.msk.bf16.vlgmr.msra.gmra.mrb[72].mxu0 %vm1286_vm11, %v2842_v48  ;;  %4800 = vmatmul.mubr.msk.bf16.vlgmr.msra.gmra.mrb[72].mxu1 %vm1286_vm11, %v2842_v48 }
 0xe79   : > { %4807 = vmatprep.mubr.msk.bf16.mxu0 %vm5027_vm7, %v5026_v6  ;;  %4815 = vmatprep.mubr.msk.bf16.mxu1 %vm5027_vm7, %v5026_v6 }
 0xe7a   : > { %4804 = vmatpush3.bf16.msra.mxu0 %v2972_v52  ;;  %4812 = vmatpush3.bf16.msra.mxu1 %v2963_v56 }
 0xe7b   : > { %4805 = vmatprep.subr.bf16.mxu0 %v5026_v6  ;;  %4813 = vmatprep.subr.bf16.mxu1 %v5026_v6 }
 0xe7e   : > { %4806 = vmatpush3.bf16.msra.mxu0 %v2973_v59  ;;  %4814 = vmatpush3.bf16.msra.mxu1 %v2964_v60 }
 0xe7f   : > { %4819 = vmatprep.subr.bf16.mxu0 %v5026_v6  ;;  %4827 = vmatprep.subr.bf16.mxu1 %v5026_v6 }
 0xf4b   : > { %v2891_v1 = vpop.f32.mrb[72].mxu0  ;;  %v2937_v2 = vpop.f32.mrb[72].mxu1 }
 0xf4c   : > { %v2892_v3 = vadd.f32 %v4172_v62, %v2891_v1  ;;  %v2938_v4 = vadd.f32 %v4172_v62, %v2937_v2  ;;  %v4793_v5 = vpop.f32.mrb[73].mxu0  ;;  %v4801_v7 = vpop.f32.mrb[73].mxu1 }
 0xf4d   : > { %v2894_v8 = vpop.f32.mrb[74].mxu0  ;;  %v2940_v9 = vpop.f32.mrb[74].mxu1  ;;  %v3249_v7 = vld [vmem:[%s6318_s1 + $0x739] sm:$0xff] }
 0xf4e   : > { %2943 = vst [vmem:[#allocation2 + $0x1] ss:$2 sm:$0xff] %v2892_v3  ;;  %2944 = vst [vmem:[#allocation2 + $0x2] ss:$2 sm:$0xff] %v2938_v4  ;;  %v4794_v10 = vpop.f32.mrb[75].mxu0  ;;  %v4802_v11 = vpop.f32.mrb[75].mxu1 }
 0xf4f   : > { %2954 = vst.msk [vmem:[#allocation2 + $0x1] sm:$0xff] %vm2953_vm2, %v2948_v61  ;;  %2955 = vst.msk [vmem:[#allocation2 + $0x9] sm:$0xff] %vm2953_vm2, %v2950_v63  ;;  %v3250_v8 = vld [vmem:[%s6318_s1 + $0x741] sm:$0xff] }
 0xf50   : > { %v3251_v13 = vpack.c.bf16 %v3250_v8, %v3249_v7  ;;  %v3433_v7 = vpop.permute.xlu1 %3432  ;;  %v3431_v8 = vpop.permute.xlu0 %3430 }
 0xf56   : > { %v2965_v15 = vld [vmem:[#allocation2 + $0x1] sm:$0xff]  ;;  %v2966_v16 = vld [vmem:[#allocation2 + $0x9] sm:$0xff] }
 0xf57   : > { %v2956_v17 = vld [vmem:[#allocation2] sm:$0xff]  ;;  %v2967_v0 = vpack.c.bf16 %v2966_v16, %v2965_v15  ;;  %v2957_v19 = vld [vmem:[#allocation2 + $0x8] sm:$0xff] }
 0xf58   : > { %3142 = vst.msk [vmem:[#allocation2] sm:$0x1] %vm932_vm8, %v5026_v6  ;;  %v3063_v21 = vld [vmem:[#allocation2 + $0xa] sm:$0xff]  ;;  %v2958_v22 = vpack.c.bf16 %v2957_v19, %v2956_v17  ;;  %v3062_v25 = vld [vmem:[#allocation2 + $0x2] sm:$0xff] }
 0xf59   : > { %3143 = vst.msk [vmem:[#allocation2 + $0x11] sm:$0x1] %vm932_vm8, %v5026_v6  ;;  %4808 = vmatmul.mubr.msk.bf16.vlgmr.msra.gmra.mrb[76].mxu0 %vm1286_vm11, %v2967_v0  ;;  %v3064_v27 = vpack.c.bf16 %v3063_v21, %v3062_v25  ;;  %v3327_v0 = vld [vmem:[%s6318_s1 + $0x749] sm:$0xff]  ;;  %v3328_v19 = vld [vmem:[%s6318_s1 + $0x751] sm:$0xff] }
 0xf5a   : > { %4816 = vmatmul.mubr.msk.bf16.vlgmr.msra.gmra.mrb[76].mxu1 %vm1286_vm11, %v2958_v22  ;;  %4820 = vmatpush3.bf16.msra.mxu0 %v3069_v18  ;;  %v3329_v21 = vpack.c.bf16 %v3328_v19, %v3327_v0  ;;  %v3379_v22 = vld [vmem:[%s6318_s1 + $0x761] sm:$0xff] }
 0xf5b   : > { %4821 = vmatprep.subr.bf16.mxu0 %v5026_v6  ;;  %4823 = vmatprep.mubr.msk.bf16.mxu0 %vm5027_vm7, %v5026_v6 }
 0xf5c   : > { %4829 = vmatprep.mubr.msk.bf16.mxu1 %vm5027_vm7, %v5026_v6  ;;  %4828 = vmatpush3.bf16.msra.mxu1 %v3157_v32 }
 0xf5d   : > { %4839 = vmatprep.subr.bf16.mxu1 %v5026_v6 }
 0xf5e   : > { %4822 = vmatpush3.bf16.msra.mxu0 %v3070_v23  ;;  %v3380_v23 = vpack.c.bf16 %v3379_v22, %v3378_v20  ;;  %v3437_v20 = vpop.permute.xlu1 %3436  ;;  %v3581_v22 = vld [vmem:[%s6318_s1 + $0x789] sm:$0xff] }
 0xf5f   : > { %4833 = vmatprep.subr.bf16.mxu0 %v5026_v6 }
 0xf61   : > { %4824 = vmatmul.mubr.msk.bf16.vlgmr.msra.gmra.mrb[80].mxu0 %vm1286_vm11, %v3064_v27 }
 0xf62   : > { %4835 = vmatprep.mubr.msk.bf16.mxu0 %vm5027_vm7, %v5026_v6  ;;  %4834 = vmatpush3.bf16.msra.mxu0 %v3151_v33 }
 0xf63   : > { %4845 = vmatprep.subr.bf16.mxu0 %v5026_v6 }
0x102c   : > { %v3011_v34 = vpop.f32.mrb[76].mxu0 }
0x102d   : > { %v3055_v31 = vpop.f32.mrb[76].mxu1  ;;  %v4809_v35 = vpop.f32.mrb[77].mxu0 }
0x102e   : > { %v3056_v36 = vadd.f32 %v3055_v31, %v3011_v34  ;;  %v4817_v37 = vpop.f32.mrb[77].mxu1  ;;  %v3014_v38 = vpop.f32.mrb[78].mxu0 }
0x102f   : > { %v3058_v30 = vpop.f32.mrb[78].mxu1  ;;  %v4810_v40 = vpop.f32.mrb[79].mxu0 }
0x1030   : > { %v3059_v41 = vadd.f32 %v3058_v30, %v3014_v38  ;;  %v4818_v39 = vpop.f32.mrb[79].mxu1 }
0x1034   : > { %v3108_v42 = vpop.f32.mrb[80].mxu0 }
0x1035   : > { %v3115_v44 = vadd.f32 %v3108_v42, %v3056_v36  ;;  %v4825_v45 = vpop.f32.mrb[81].mxu0  ;;  %v4182_v36 = vld [vmem:[%s6319_s2 + $0x10] ss:$0 sm:$0xff] }
0x1036   : > { %v3111_v46 = vpop.f32.mrb[82].mxu0 }
0x1037   : > { %v3122_v47 = vadd.f32 %v4178_v43, %v3115_v44  ;;  %v3116_v48 = vadd.f32 %v3111_v46, %v3059_v41  ;;  %v4826_v49 = vpop.f32.mrb[83].mxu0 }
0x1039   : > { %v3126_v50 = vmul.f32 0.044715, %v3122_v47  ;;  %v3123_v51 = vadd.f32 %v4178_v43, %v3116_v48  ;;  %v3124_v62 = vmul.f32 0.5, %v3122_v47 }
0x103b   : > { %v3128_v52 = vmul.f32 %v3126_v50, %v3122_v47  ;;  %v3127_v53 = vmul.f32 0.044715, %v3123_v51  ;;  %v3125_v3 = vmul.f32 0.5, %v3123_v51 }
0x103d   : > { %v3130_v54 = vmul.f32 %v3128_v52, %v3122_v47  ;;  %v3129_v55 = vmul.f32 %v3127_v53, %v3123_v51 }
0x103f   : > { %v3132_v56 = vadd.f32 %v3130_v54, %v3122_v47  ;;  %v3131_v57 = vmul.f32 %v3129_v55, %v3123_v51 }
0x1041   : > { %v3134_v58 = vmul.f32 0.7978846, %v3132_v56  ;;  %v3133_v59 = vadd.f32 %v3131_v57, %v3123_v51 }
0x1043   : > { %4993 = vtanh.f32 %v3134_v58  ;;  %v3135_v60 = vmul.f32 0.7978846, %v3133_v59 }
0x1045   : > { %4995 = vtanh.f32 %v3135_v60 }
0x104d   : > { %v4994_v61 = vpop.eup %4993 }
0x104e   : > { %v3138_v63 = vadd.f32 1.0, %v4994_v61 }
0x104f   : > { %v4996_v1 = vpop.eup %4995 }
0x1050   : > { %v3140_v2 = vmul.f32 %v3138_v63, %v3124_v62  ;;  %v3139_v4 = vadd.f32 1.0, %v4996_v1  ;;  %v3462_v62 = vld [vmem:[%s6318_s1 + $0x779] sm:$0xff]  ;;  %v3463_v63 = vld [vmem:[%s6318_s1 + $0x781] sm:$0xff] }
0x1051   : > { %v3464_v1 = vpack.c.bf16 %v3463_v63, %v3462_v62 }
0x1052   : > { %3144 = vst.msk [vmem:[#allocation2 + $0x1] sm:$0xff] %vm935_vm9, %v3140_v2  ;;  %v3141_v5 = vmul.f32 %v3139_v4, %v3125_v3  ;;  %v3453_v2 = vld [vmem:[%s6318_s1 + $0x769] sm:$0xff]  ;;  %v3454_v3 = vld [vmem:[%s6318_s1 + $0x771] sm:$0xff] }
0x1053   : > { %v3455_v4 = vpack.c.bf16 %v3454_v3, %v3453_v2 }
0x1054   : > { %3145 = vst.msk [vmem:[#allocation2 + $0x9] sm:$0xff] %vm935_vm9, %v3141_v5  ;;  %v4183_v5 = vld [vmem:[%s6319_s2 + $0x11] ss:$0 sm:$0xff] }
0x1059   : > { %v3146_v9 = vld [vmem:[#allocation2] sm:$0xff] }
0x105a   : > { %3323 = vst.msk [vmem:[#allocation2] sm:$0x1] %vm932_vm8, %v5026_v6  ;;  %v3152_v10 = vld [vmem:[#allocation2 + $0x1] sm:$0xff] }
0x105b   : > { %v3153_v11 = vld [vmem:[#allocation2 + $0x9] sm:$0xff] }
0x105c   : > { %v3147_v12 = vld [vmem:[#allocation2 + $0x8] sm:$0xff]  ;;  %v3154_v14 = vpack.c.bf16 %v3153_v11, %v3152_v10 }
0x105d   : > { %v3148_v15 = vpack.c.bf16 %v3147_v12, %v3146_v9  ;;  %v3246_v16 = vld [vmem:[#allocation2 + $0x2] sm:$0xff]  ;;  %v3247_v17 = vld [vmem:[#allocation2 + $0xa] sm:$0xff] }
0x105e   : > { %4830 = vmatmul.mubr.msk.bf16.vlgmr.msra.gmra.mrb[80].mxu1 %vm935_vm9, %v3154_v14  ;;  %v3248_v18 = vpack.c.bf16 %v3247_v17, %v3246_v16 }
0x105f   : > { %4836 = vmatmul.mubr.msk.bf16.vlgmr.msra.gmra.mrb[84].mxu0 %vm935_vm9, %v3148_v15  ;;  %4840 = vmatpush3.bf16.msra.mxu1 %v3251_v13 }
0x1060   : > { %4841 = vmatprep.mubr.msk.bf16.mxu1 %vm5027_vm7, %v5026_v6  ;;  %4851 = vmatprep.subr.bf16.mxu1 %v5026_v6 }
0x1061   : > { %4847 = vmatprep.mubr.msk.bf16.mxu0 %vm5027_vm7, %v5026_v6  ;;  %4846 = vmatpush3.bf16.msra.mxu0 %v3329_v21  ;;  %v3435_v21 = vpop.permute.xlu0 %3434 }
0x1062   : > { %4857 = vmatprep.subr.bf16.mxu0 %v3464_v1 }
0x1066   : > { %4842 = vmatmul.mubr.msk.bf16.vlgmr.msra.gmra.mrb[84].mxu1 %vm935_vm9, %v3248_v18 }
0x1067   : > { %4853 = vmatprep.mubr.msk.bf16.mxu1 %vm5027_vm7, %v5026_v6  ;;  %4852 = vmatpush3.bf16.msra.mxu1 %v3380_v23  ;;  %vm3442_vm7 = vcmask 130112   ;;  %v3582_v23 = vld [vmem:[%s6318_s1 + $0x791] sm:$0xff] }
0x1131   : > { %v3195_v25 = vpop.f32.mrb[80].mxu1 }
0x1132   : > { %v3239_v27 = vpop.f32.mrb[84].mxu0  ;;  %v4831_v28 = vpop.f32.mrb[81].mxu1 }
0x1133   : > { %v3240_v26 = vadd.f32 %v3239_v27, %v3195_v25  ;;  %v4837_v29 = vpop.f32.mrb[85].mxu0  ;;  %v3198_v32 = vpop.f32.mrb[82].mxu1 }
0x1134   : > { %v3242_v24 = vpop.f32.mrb[86].mxu0  ;;  %v4832_v34 = vpop.f32.mrb[83].mxu1 }
0x1135   : > { %v3243_v33 = vadd.f32 %v3242_v24, %v3198_v32  ;;  %v4838_v31 = vpop.f32.mrb[87].mxu0  ;;  %v3583_v34 = vpack.c.bf16 %v3582_v23, %v3581_v22 }
0x1139   : > { %v3289_v35 = vpop.f32.mrb[84].mxu1 }
0x113a   : > { %v3296_v37 = vadd.f32 %v3289_v35, %v3240_v26  ;;  %v4843_v38 = vpop.f32.mrb[85].mxu1 }
0x113b   : > { %v3292_v30 = vpop.f32.mrb[86].mxu1 }
0x113c   : > { %v3303_v40 = vadd.f32 %v4182_v36, %v3296_v37  ;;  %v3297_v41 = vadd.f32 %v3292_v30, %v3243_v33  ;;  %v4844_v39 = vpop.f32.mrb[87].mxu1 }
0x113e   : > { %v3307_v42 = vmul.f32 0.044715, %v3303_v40  ;;  %v3304_v43 = vadd.f32 %v4182_v36, %v3297_v41  ;;  %v3305_v56 = vmul.f32 0.5, %v3303_v40 }
0x1140   : > { %v3309_v44 = vmul.f32 %v3307_v42, %v3303_v40  ;;  %v3308_v45 = vmul.f32 0.044715, %v3304_v43  ;;  %v3306_v57 = vmul.f32 0.5, %v3304_v43 }
0x1142   : > { %v3311_v46 = vmul.f32 %v3309_v44, %v3303_v40  ;;  %v3310_v47 = vmul.f32 %v3308_v45, %v3304_v43  ;;  %v3700_v45 = vld [vmem:[%s6318_s1 + $0x799] sm:$0xff] }
0x1144   : > { %v3313_v48 = vadd.f32 %v3311_v46, %v3303_v40  ;;  %v3312_v49 = vmul.f32 %v3310_v47, %v3304_v43  ;;  %v6261_v46 = vpack.c.bf16 %v3700_v45, %v3700_v45  ;;  %v4192_v47 = vld [vmem:[%s6319_s2 + $0x12] ss:$0 sm:$0xff] }
0x1146   : > { %v3315_v50 = vmul.f32 0.7978846, %v3313_v48  ;;  %v3314_v51 = vadd.f32 %v3312_v49, %v3304_v43 }
0x1148   : > { %4997 = vtanh.f32 %v3315_v50  ;;  %v3316_v52 = vmul.f32 0.7978846, %v3314_v51 }
0x114a   : > { %4999 = vtanh.f32 %v3316_v52 }
0x1152   : > { %v4998_v53 = vpop.eup %4997 }
0x1153   : > { %v3319_v54 = vadd.f32 1.0, %v4998_v53 }
0x1154   : > { %v5000_v55 = vpop.eup %4999 }
0x1155   : > { %v3320_v58 = vadd.f32 1.0, %v5000_v55  ;;  %v3321_v59 = vmul.f32 %v3319_v54, %v3305_v56 }
0x1157   : > { %v3322_v60 = vmul.f32 %v3320_v58, %v3306_v57 }
0x1159   : > { %v3325_v61 = vpack.c.bf16 %v3322_v60, %v3321_v59 }
0x115b   : > { %4848 = vmatmul.mubr.msk.bf16.vlgmr.msra.gmra.mrb[88].mxu0 %vm935_vm9, %v3325_v61  ;;  %4854 = vmatmul.mubr.msk.bf16.vlgmr.msra.gmra.mrb[88].mxu1 %vm935_vm9, %v3325_v61 }
0x115c   : > { %4858 = vmatpush3.bf16.msra.mxu0 %v3464_v1 }
0x115d   : > { %4863 = vmatprep.subr.bf16.mxu0 %v3455_v4 }
0x122e   : > { %v3371_v9 = vpop.f32.mrb[88].mxu0  ;;  %v3415_v10 = vpop.f32.mrb[88].mxu1 }
0x122f   : > { %v3372_v11 = vadd.f32 %v4183_v5, %v3371_v9  ;;  %v3416_v12 = vadd.f32 %v4183_v5, %v3415_v10  ;;  %v4849_v13 = vpop.f32.mrb[89].mxu0  ;;  %v4855_v14 = vpop.f32.mrb[89].mxu1 }
0x1230   : > { %v3374_v15 = vpop.f32.mrb[90].mxu0  ;;  %v3418_v16 = vpop.f32.mrb[90].mxu1 }
0x1231   : > { %3422 = vst [vmem:[#allocation2 + $0x1] ss:$2 sm:$0xff] %v3372_v11  ;;  %3424 = vst [vmem:[#allocation2 + $0x2] ss:$2 sm:$0xff] %v3416_v12  ;;  %v3375_v17 = vadd.f32 %v4183_v5, %v3374_v15  ;;  %v3419_v18 = vadd.f32 %v4183_v5, %v3418_v16  ;;  %v4850_v0 = vpop.f32.mrb[91].mxu0  ;;  %v4856_v19 = vpop.f32.mrb[91].mxu1 }
0x1232   : > { %3443 = vst.msk [vmem:[#allocation2 + $0x1] sm:$0xff] %vm3442_vm7, %v3431_v8  ;;  %3444 = vst.msk [vmem:[#allocation2 + $0x9] sm:$0xff] %vm3442_vm7, %v3433_v7 }
0x1233   : > { %3423 = vst [vmem:[#allocation2 + $0x11] ss:$2 sm:$0xff] %v3375_v17  ;;  %3425 = vst [vmem:[#allocation2 + $0x12] ss:$2 sm:$0xff] %v3419_v18 }
0x1234   : > { %3445 = vst.msk [vmem:[#allocation2 + $0x11] sm:$0xff] %vm3442_vm7, %v3435_v21  ;;  %3446 = vst.msk [vmem:[#allocation2 + $0x19] sm:$0xff] %vm3442_vm7, %v3437_v20 }
0x1239   : > { %v3456_v25 = vld [vmem:[#allocation2 + $0x1] sm:$0xff]  ;;  %v3457_v27 = vld [vmem:[#allocation2 + $0x9] sm:$0xff] }
0x123a   : > { %v3447_v26 = vld [vmem:[#allocation2] sm:$0xff]  ;;  %v3460_v28 = vpack.c.bf16 %v3457_v27, %v3456_v25  ;;  %v3448_v29 = vld [vmem:[#allocation2 + $0x8] sm:$0xff] }
0x123b   : > { %3688 = vst.msk [vmem:[#allocation2] sm:$0x1] %vm475_vm4, %v5026_v6  ;;  %v3458_v32 = vld [vmem:[#allocation2 + $0x11] sm:$0xff]  ;;  %v3459_v24 = vld [vmem:[#allocation2 + $0x19] sm:$0xff]  ;;  %v3451_v31 = vpack.c.bf16 %v3448_v29, %v3447_v26  ;;  %v3575_v40 = vld [vmem:[#allocation2 + $0x2] sm:$0xff] }
0x123c   : > { %4859 = vmatprep.mubr.msk.bf16.mxu0 %vm935_vm9, %v3460_v28  ;;  %v3461_v33 = vpack.c.bf16 %v3459_v24, %v3458_v32  ;;  %v3578_v35 = vld [vmem:[#allocation2 + $0x1a] sm:$0xff]  ;;  %v3449_v36 = vld [vmem:[#allocation2 + $0x10] sm:$0xff] }
0x123d   : > { %3689 = vst.msk [vmem:[#allocation2 + $0x21] sm:$0x1] %vm475_vm4, %v5026_v6  ;;  %v3450_v37 = vld [vmem:[#allocation2 + $0x18] sm:$0xff]  ;;  %v3576_v38 = vld [vmem:[#allocation2 + $0xa] sm:$0xff]  ;;  %v3708_v6 = vld [vmem:[%s6318_s1 + $0x7a1] sm:$0xff] }
0x123e   : > { %4860 = vmatmul.mubr.msk.bf16.vlgmr.msra.gmra.mrb[92].mxu0 %vm935_vm9, %v3461_v33  ;;  %v3452_v30 = vpack.c.bf16 %v3450_v37, %v3449_v36  ;;  %v3579_v41 = vpack.c.bf16 %v3576_v38, %v3575_v40  ;;  %v3577_v39 = vld [vmem:[#allocation2 + $0x12] sm:$0xff]  ;;  %v3709_v43 = vpack.c.bf16 %v3708_v6, %v3708_v6  ;;  %v3832_v24 = vld [vmem:[%s6318_s1 + $0x7a9] sm:$0xff]  ;;  %v3775_v38 = vsel %vm505_vm5, %v6261_v46, 0 }
0x123f   : > { %4864 = vmatpush3.bf16.msra.mxu0 %v3455_v4  ;;  %4865 = vmatprep.mubr.msk.bf16.mxu0 %vm935_vm9, %v3451_v31  ;;  %v3580_v42 = vpack.c.bf16 %v3578_v35, %v3577_v39  ;;  %v3833_v40 = vpack.c.bf16 %v3832_v24, %v3832_v24 }
0x1240   : > { %4869 = vmatprep.subr.bf16.mxu0 %v3583_v34  ;;  %4934 = vmatprep.subr.msk.bf16.mxu1 %vm505_vm5, %v3709_v43  ;;  %v3717_v44 = vsel %vm505_vm5, %v3709_v43, 0 }
0x1241   : > { %4876 = vmatpush3.bf16.msra.mxu1 %v3717_v44  ;;  %v3841_v45 = vsel %vm505_vm5, %v3833_v40, 0 }
0x1242   : > { %4935 = vmatprep.subr.msk.bf16.mxu1 %vm505_vm5, %v6261_v46 }
0x124a   : > { %4866 = vmatmul.mubr.msk.bf16.vlgmr.msra.gmra.mrb[92].mxu0 %vm935_vm9, %v3452_v30 }
0x124b   : > { %4870 = vmatpush3.bf16.msra.mxu0 %v3583_v34  ;;  %4871 = vmatprep.mubr.msk.bf16.mxu0 %vm935_vm9, %v3579_v41 }
0x1256   : > { %4872 = vmatmul.mubr.msk.bf16.vlgmr.msra.gmra.mrb[92].mxu0 %vm935_vm9, %v3580_v42 }
0x1329   : > { %v4873_v48 = vpop.f32.mrb[92].mxu0 }
0x132a   : > { %v3650_v49 = vadd.f32 %v4873_v48, %v4192_v47  ;;  %v3624_v50 = vpop.f32.mrb[93].mxu0 }
0x132b   : > { %v3648_v51 = vadd.f32 %v4192_v47, %v3624_v50  ;;  %v4874_v52 = vpop.f32.mrb[94].mxu0  ;;  %v3947_v50 = vld [vmem:[%s6318_s1 + $0x7b1] sm:$0xff] }
0x132c   : > { %v3658_v53 = vmul.f32 0.044715, %v3650_v49  ;;  %v3651_v54 = vadd.f32 %v4874_v52, %v4192_v47  ;;  %v3627_v55 = vpop.f32.mrb[95].mxu0  ;;  %v3654_v16 = vmul.f32 0.5, %v3650_v49 }
0x132d   : > { %v3656_v56 = vmul.f32 0.044715, %v3648_v51  ;;  %v3649_v57 = vadd.f32 %v4192_v47, %v3627_v55  ;;  %v3652_v0 = vmul.f32 0.5, %v3648_v51 }
0x132e   : > { %v3662_v58 = vmul.f32 %v3658_v53, %v3650_v49  ;;  %v3659_v59 = vmul.f32 0.044715, %v3651_v54  ;;  %v3655_v22 = vmul.f32 0.5, %v3651_v54  ;;  %v4199_v53 = vld [vmem:[%s6319_s2 + $0x13] ss:$0 sm:$0xff] }
0x132f   : > { %v3660_v60 = vmul.f32 %v3656_v56, %v3648_v51  ;;  %v3657_v61 = vmul.f32 0.044715, %v3649_v57  ;;  %v3653_v27 = vmul.f32 0.5, %v3649_v57 }
0x1330   : > { %v3666_v62 = vmul.f32 %v3662_v58, %v3650_v49  ;;  %v3663_v63 = vmul.f32 %v3659_v59, %v3651_v54 }
0x1331   : > { %v3664_v1 = vmul.f32 %v3660_v60, %v3648_v51  ;;  %v3661_v2 = vmul.f32 %v3657_v61, %v3649_v57 }
0x1332   : > { %v3670_v3 = vadd.f32 %v3666_v62, %v3650_v49  ;;  %v3667_v4 = vmul.f32 %v3663_v63, %v3651_v54 }
0x1333   : > { %v3668_v5 = vadd.f32 %v3664_v1, %v3648_v51  ;;  %v3665_v7 = vmul.f32 %v3661_v2, %v3649_v57  ;;  %v3948_v51 = vpack.c.bf16 %v3947_v50, %v3947_v50 }
0x1334   : > { %v3674_v8 = vmul.f32 0.7978846, %v3670_v3  ;;  %v3671_v9 = vadd.f32 %v3667_v4, %v3651_v54 }
0x1335   : > { %v3672_v10 = vmul.f32 0.7978846, %v3668_v5  ;;  %v3669_v11 = vadd.f32 %v3665_v7, %v3649_v57  ;;  %4937 = vmatprep.subr.msk.bf16.mxu0 %vm505_vm5, %v3948_v51  ;;  %v3961_v52 = vsel %vm505_vm5, %v3948_v51, 0 }
0x1336   : > { %5001 = vtanh.f32 %v3674_v8  ;;  %v3675_v12 = vmul.f32 0.7978846, %v3671_v9  ;;  %4894 = vmatpush3.bf16.msra.mxu0 %v3961_v52 }
0x1337   : > { %5003 = vtanh.f32 %v3672_v10  ;;  %v3673_v13 = vmul.f32 0.7978846, %v3669_v11 }
0x1338   : > { %5005 = vtanh.f32 %v3675_v12 }
0x1339   : > { %5007 = vtanh.f32 %v3673_v13 }
0x1340   : > { %v5002_v14 = vpop.eup %5001 }
0x1341   : > { %v5004_v15 = vpop.eup %5003  ;;  %v3682_v17 = vadd.f32 1.0, %v5002_v14 }
0x1342   : > { %v5006_v18 = vpop.eup %5005  ;;  %v3680_v19 = vadd.f32 1.0, %v5004_v15 }
0x1343   : > { %v5008_v20 = vpop.eup %5007  ;;  %v3686_v21 = vmul.f32 %v3682_v17, %v3654_v16  ;;  %v3683_v23 = vadd.f32 1.0, %v5006_v18 }
0x1344   : > { %v3684_v25 = vmul.f32 %v3680_v19, %v3652_v0  ;;  %v3681_v26 = vadd.f32 1.0, %v5008_v20 }
0x1345   : > { %3692 = vst.msk [vmem:[#allocation2 + $0x11] sm:$0xff] %vm478_vm6, %v3686_v21  ;;  %v3687_v28 = vmul.f32 %v3683_v23, %v3655_v22 }
0x1346   : > { %3690 = vst.msk [vmem:[#allocation2 + $0x1] sm:$0xff] %vm478_vm6, %v3684_v25  ;;  %v3685_v29 = vmul.f32 %v3681_v26, %v3653_v27 }
0x1347   : > { %3693 = vst.msk [vmem:[#allocation2 + $0x19] sm:$0xff] %vm478_vm6, %v3687_v28 }
0x1348   : > { %3691 = vst.msk [vmem:[#allocation2 + $0x9] sm:$0xff] %vm478_vm6, %v3685_v29 }
0x134c   : > { %v3704_v36 = vld [vmem:[#allocation2 + $0x11] sm:$0xff] }
0x134d   : > { %v3702_v33 = vld [vmem:[#allocation2 + $0x1] sm:$0xff] }
0x134e   : > { %v3705_v32 = vld [vmem:[#allocation2 + $0x19] sm:$0xff] }
0x134f   : > { %v3703_v34 = vld [vmem:[#allocation2 + $0x9] sm:$0xff]  ;;  %v3707_v37 = vpack.c.bf16 %v3705_v32, %v3704_v36  ;;  %v3694_v30 = vld [vmem:[#allocation2] sm:$0xff]  ;;  %v3697_v42 = vld [vmem:[#allocation2 + $0x18] sm:$0xff] }
0x1350   : > { %v3695_v31 = vld [vmem:[#allocation2 + $0x8] sm:$0xff]  ;;  %v3706_v35 = vpack.c.bf16 %v3703_v34, %v3702_v33  ;;  %v3696_v39 = vld [vmem:[#allocation2 + $0x10] sm:$0xff]  ;;  %v3829_v48 = vld [vmem:[#allocation2 + $0x1a] sm:$0xff] }
0x1351   : > { %v3698_v41 = vpack.c.bf16 %v3695_v31, %v3694_v30  ;;  %v3826_v6 = vld [vmem:[#allocation2 + $0x2] sm:$0xff]  ;;  %v3827_v43 = vld [vmem:[#allocation2 + $0xa] sm:$0xff]  ;;  %v3699_v44 = vpack.c.bf16 %v3697_v42, %v3696_v39  ;;  %v3828_v47 = vld [vmem:[#allocation2 + $0x12] sm:$0xff] }
0x1352   : > { %4877 = vmatprep.mubr.msk.bf16.mxu1 %vm478_vm6, %v3706_v35  ;;  %v3830_v46 = vpack.c.bf16 %v3827_v43, %v3826_v6  ;;  %v3831_v49 = vpack.c.bf16 %v3829_v48, %v3828_v47 }
0x1353   : > { %4878 = vmatmul.mubr.msk.bf16.vlgmr.msra.gmra.mrb[92].mxu1 %vm478_vm6, %v3707_v37 }
0x1354   : > { %4882 = vmatpush3.bf16.msra.mxu1 %v3775_v38  ;;  %4883 = vmatprep.mubr.msk.bf16.mxu1 %vm478_vm6, %v3698_v41  ;;  %v4200_v38 = vld [vmem:[%s6319_s2 + $0x14] ss:$0 sm:$0xff] }
0x1355   : > { %4936 = vmatprep.subr.msk.bf16.mxu1 %vm505_vm5, %v3833_v40 }
0x135f   : > { %4884 = vmatmul.mubr.msk.bf16.vlgmr.msra.gmra.mrb[92].mxu1 %vm478_vm6, %v3699_v44 }
0x1360   : > { %4888 = vmatpush3.bf16.msra.mxu1 %v3841_v45  ;;  %4889 = vmatprep.mubr.msk.bf16.mxu1 %vm478_vm6, %v3830_v46 }
0x136b   : > { %4890 = vmatmul.mubr.msk.bf16.vlgmr.msra.gmra.mrb[92].mxu1 %vm478_vm6, %v3831_v49 }
0x143e   : > { %v4891_v54 = vpop.f32.mrb[92].mxu1 }
0x143f   : > { %v3903_v55 = vadd.f32 %v4891_v54, %v4199_v53  ;;  %v3877_v56 = vpop.f32.mrb[93].mxu1 }
0x1440   : > { %v3901_v57 = vadd.f32 %v4199_v53, %v3877_v56  ;;  %v4892_v58 = vpop.f32.mrb[94].mxu1 }
0x1441   : > { %v3911_v59 = vmul.f32 0.044715, %v3903_v55  ;;  %v3904_v60 = vadd.f32 %v4892_v58, %v4199_v53  ;;  %v3880_v61 = vpop.f32.mrb[95].mxu1  ;;  %v3907_v21 = vmul.f32 0.5, %v3903_v55 }
0x1442   : > { %v3909_v62 = vmul.f32 0.044715, %v3901_v57  ;;  %v3902_v63 = vadd.f32 %v4199_v53, %v3880_v61  ;;  %v3905_v25 = vmul.f32 0.5, %v3901_v57 }
0x1443   : > { %v3915_v1 = vmul.f32 %v3911_v59, %v3903_v55  ;;  %v3912_v2 = vmul.f32 0.044715, %v3904_v60  ;;  %v3908_v28 = vmul.f32 0.5, %v3904_v60 }
0x1444   : > { %v3913_v3 = vmul.f32 %v3909_v62, %v3901_v57  ;;  %v3910_v4 = vmul.f32 0.044715, %v3902_v63  ;;  %v3906_v24 = vmul.f32 0.5, %v3902_v63 }
0x1445   : > { %v3919_v5 = vmul.f32 %v3915_v1, %v3903_v55  ;;  %v3916_v7 = vmul.f32 %v3912_v2, %v3904_v60 }
0x1446   : > { %v3917_v8 = vmul.f32 %v3913_v3, %v3901_v57  ;;  %v3914_v9 = vmul.f32 %v3910_v4, %v3902_v63 }
0x1447   : > { %v3923_v10 = vadd.f32 %v3919_v5, %v3903_v55  ;;  %v3920_v11 = vmul.f32 %v3916_v7, %v3904_v60 }
0x1448   : > { %v3921_v12 = vadd.f32 %v3917_v8, %v3901_v57  ;;  %v3918_v13 = vmul.f32 %v3914_v9, %v3902_v63 }
0x1449   : > { %v3927_v14 = vmul.f32 0.7978846, %v3923_v10  ;;  %v3924_v15 = vadd.f32 %v3920_v11, %v3904_v60 }
0x144a   : > { %v3925_v16 = vmul.f32 0.7978846, %v3921_v12  ;;  %v3922_v17 = vadd.f32 %v3918_v13, %v3902_v63 }
0x144b   : > { %5009 = vtanh.f32 %v3927_v14  ;;  %v3928_v18 = vmul.f32 0.7978846, %v3924_v15 }
0x144c   : > { %5011 = vtanh.f32 %v3925_v16  ;;  %v3926_v0 = vmul.f32 0.7978846, %v3922_v17 }
0x144d   : > { %5013 = vtanh.f32 %v3928_v18 }
0x144e   : > { %5015 = vtanh.f32 %v3926_v0 }
0x1455   : > { %v5010_v19 = vpop.eup %5009 }
0x1456   : > { %v5012_v20 = vpop.eup %5011  ;;  %v3935_v22 = vadd.f32 1.0, %v5010_v19 }
0x1457   : > { %v5014_v23 = vpop.eup %5013  ;;  %v3933_v27 = vadd.f32 1.0, %v5012_v20 }
0x1458   : > { %v5016_v26 = vpop.eup %5015  ;;  %v3936_v29 = vadd.f32 1.0, %v5014_v23  ;;  %v3939_v32 = vmul.f32 %v3935_v22, %v3907_v21 }
0x1459   : > { %v3934_v33 = vadd.f32 1.0, %v5016_v26  ;;  %v3937_v34 = vmul.f32 %v3933_v27, %v3905_v25 }
0x145a   : > { %v3940_v31 = vmul.f32 %v3936_v29, %v3908_v28  ;;  %3943 = vst.msk [vmem:[%s210_s18 + $0x10] sm:$0xff] %vm478_vm6, %v3939_v32 }
0x145b   : > { %v3938_v35 = vmul.f32 %v3934_v33, %v3906_v24  ;;  %3941 = vst.msk [vmem:[%s210_s18] sm:$0xff] %vm478_vm6, %v3937_v34 }
0x145c   : > { %3944 = vst.msk [vmem:[%s210_s18 + $0x18] sm:$0xff] %vm478_vm6, %v3940_v31  ;;  %v3946_v36 = vpack.c.bf16 %v3940_v31, %v3939_v32 }
0x145d   : > { %3942 = vst.msk [vmem:[%s210_s18 + $0x8] sm:$0xff] %vm478_vm6, %v3938_v35  ;;  %v3945_v37 = vpack.c.bf16 %v3938_v35, %v3937_v34 }
0x145f   : > { %4895 = vmatprep.mubr.msk.bf16.mxu0 %vm478_vm6, %v3945_v37 }
0x1460   : > { %4896 = vmatmul.mubr.msk.bf16.vlgmr.msra.gmra.mrb[96].mxu0 %vm478_vm6, %v3946_v36 }
0x1533   : > { %v4897_v30 = vpop.f32.mrb[96].mxu0 }
0x1534   : > { %v4006_v40 = vadd.f32 %v4897_v30, %v4200_v38  ;;  %v3997_v41 = vpop.f32.mrb[97].mxu0 }
0x1535   : > { %v3998_v39 = vadd.f32 %v4200_v38, %v3997_v41  ;;  %v4898_v42 = vpop.f32.mrb[98].mxu0 }
0x1536   : > { %4014 = vst.msk [vmem:[%s205_s24 + $0x10] sm:$0xff] %vm219_vm3, %v4006_v40  ;;  %v4009_v6 = vadd.f32 %v4898_v42, %v4200_v38  ;;  %v4000_v43 = vpop.f32.mrb[99].mxu0 }
0x1537   : > { %4012 = vst.msk [vmem:[%s205_s24] sm:$0xff] %vm219_vm3, %v3998_v39  ;;  %v4001_v44 = vadd.f32 %v4200_v38, %v4000_v43 }
0x1538   : > { %4015 = vst.msk [vmem:[%s205_s24 + $0x18] sm:$0xff] %vm219_vm3, %v4009_v6 }
0x1539   : > { %4013 = vst.msk [vmem:[%s205_s24 + $0x8] sm:$0xff] %vm219_vm3, %v4001_v44 }
0x153a PF: > { %s15_s15 = sadd.s32 1, %s5023_s15  }
0x153b   : > { %p12_p4 = scmp.ge.s32.totalorder %s15_s15, 4  }
0x153d   :  { %14 = sbr.rel (!%p12_p4) target bundleno = 1 (0x1), region = 78 }

</bundles_post_ra>
